<compile_context>
chip_gen: v6e
topology: v6e:2x2x1
jax: 0.10.0
libtpu: 0.0.40
codegen_flags: <defaults>
</compile_context>

<pallas_src>
import functools

import jax
import jax.numpy as jnp
import numpy as np
from jax import lax
from jax.experimental import pallas as pl
from jax.experimental.pallas import tpu as pltpu

COMPUTE_DTYPE = jnp.bfloat16      # MXU operand dtype; accumulation is always f32


# ----------------------------- fused Pallas kernel ----------------------------- #
def _dqn_fused_kernel(col1s_ref, w1_ref, b1_ref,
                      w2_ref, b2_ref,
                      w3cat_ref, b3_ref,
                      wfc1_ref, bfc1_ref,
                      wfc2_ref, bfc2_ref,
                      out_ref, *, n_off2, n_pos2, bp):
    f32 = jnp.float32
    cdt = w1_ref.dtype
    rows2 = n_pos2 * bp                               # rows per conv2 kernel offset

    # conv1 as ONE im2col GEMM, already replicated into conv2 patch order:
    # (n_off2*rows2, Cin*64) @ (Cin*64, 32), fused bias + ReLU in f32.
    h1 = jnp.dot(col1s_ref[...], w1_ref[...], preferred_element_type=f32)
    h1 = jnp.maximum(h1 + b1_ref[...], 0.0)           # (n_off2*rows2, 32) f32

    # conv2: 16 static 8-aligned row-slice matmuls, bf16 operands, f32 acc.
    # Two accumulator chains, initialized from the first products (no zeros).
    def tap(off):
        blk = h1[off * rows2:(off + 1) * rows2, :].astype(cdt)       # (rows2, 32)
        return jnp.dot(blk, w2_ref[off], preferred_element_type=f32)  # (rows2, 64)

    acc_a = tap(0)
    acc_b = tap(1)
    for off in range(2, n_off2):
        if off % 2 == 0:
            acc_a = acc_a + tap(off)
        else:
            acc_b = acc_b + tap(off)
    h2 = jnp.maximum(acc_a + acc_b + b2_ref[...], 0.0)               # (rows2, 64) f32

    # conv3: single GEMM against all 9 taps concatenated along N, then pick the
    # matching (position, tap) diagonal blocks.  h2 rows are (position, padded
    # batch), so every block slice is static and 8-row aligned.
    c3 = b3_ref.shape[-1]
    prod3 = jnp.dot(h2.astype(cdt), w3cat_ref[...],
                    preferred_element_type=f32)                      # (rows2, 9*64)
    acc3 = prod3[0:bp, 0:c3]
    for p in range(1, n_pos2):
        acc3 = acc3 + prod3[p * bp:(p + 1) * bp, p * c3:(p + 1) * c3]
    h3 = jnp.maximum(acc3 + b3_ref[...], 0.0).astype(cdt)            # (bp, 64)

    # fc1 + ReLU
    h4 = jnp.dot(h3, wfc1_ref[...], preferred_element_type=f32)
    h4 = jnp.maximum(h4 + bfc1_ref[...], 0.0).astype(cdt)            # (bp, 512)

    # fc2 — output channels zero-padded to 128 for a lane-dense store.
    out = jnp.dot(h4, wfc2_ref[...], preferred_element_type=f32) + bfc2_ref[...]
    out_ref[...] = out.astype(out_ref.dtype)


# --------------------------------- JAX glue ------------------------------------ #
def _conv_out(n, k, s):
    return (n - k) // s + 1


def im2col(x, kh, kw, stride):
    """NCHW -> (B*Ho*Wo, C*kh*kw); patch order (c, kh, kw) matches the PyTorch
    (out_c, in_c*kh*kw) weight reshape."""
    B, C, H, W = x.shape
    Ho = _conv_out(H, kh, stride)
    Wo = _conv_out(W, kw, stride)
    cols = []
    for i in range(kh):
        for j in range(kw):
            cols.append(x[:, :, i:i + stride * Ho:stride, j:j + stride * Wo:stride])
    col = jnp.stack(cols, axis=2)                       # (B, C, kh*kw, Ho, Wo)
    col = col.reshape(B, C * kh * kw, Ho, Wo)
    col = col.transpose(0, 2, 3, 1).reshape(B * Ho * Wo, C * kh * kw)
    return col


def prepare_params(params, input_dims, batch, n_actions):
    """One-time repack of the PyTorch-layout weights into kernel-ready matrices,
    plus the conv2 patch-gather row indices for the wrapper-side take()."""
    C, H, W = input_dims
    Ho1, Wo1 = _conv_out(H, 8, 4), _conv_out(W, 8, 4)
    Ho2, Wo2 = _conv_out(Ho1, 4, 2), _conv_out(Wo1, 4, 2)
    Ho3, Wo3 = _conv_out(Ho2, 3, 1), _conv_out(Wo2, 3, 1)
    assert Ho3 == 1 and Wo3 == 1, "fused conv3 path assumes a 1x1 conv3 output"
    assert n_actions <= 128

    bp = ((batch + 7) // 8) * 8                 # batch rows padded to a sublane tile
    n_pos2 = Ho2 * Wo2
    n_off2 = 16                                 # 4x4 conv2 kernel
    cdt, f32 = COMPUTE_DTYPE, jnp.float32

    # conv2 gather indices into the conv1 im2col rows; padded batch rows reuse
    # batch 0 (harmless duplicates, sliced off in the wrapper).
    src = np.zeros((n_off2, n_pos2, bp), np.int32)
    for i in range(4):
        for j in range(4):
            off = i * 4 + j
            for oh2 in range(Ho2):
                for ow2 in range(Wo2):
                    p = oh2 * Wo2 + ow2
                    for b in range(bp):
                        bb = b if b < batch else 0
                        src[off, p, b] = bb * Ho1 * Wo1 + (2 * oh2 + i) * Wo1 + (2 * ow2 + j)

    n_pad = max(128, ((n_actions + 127) // 128) * 128)   # lane-dense fc2 output
    wfc2 = jnp.zeros((512, n_pad), cdt).at[:, :n_actions].set(
        params["fc2_w"].T.astype(cdt))
    bfc2 = jnp.zeros((1, n_pad), f32).at[:, :n_actions].set(
        params["fc2_b"].astype(f32))

    w3 = jnp.transpose(params["conv3_w"], (2, 3, 1, 0)).reshape(n_pos2, 64, 64)
    w3cat = jnp.transpose(w3, (1, 0, 2)).reshape(64, n_pos2 * 64).astype(cdt)

    return {
        "src_idx": jnp.asarray(src.reshape(-1), jnp.int32),           # (16*n_pos2*bp,)
        "w1": params["conv1_w"].reshape(32, -1).T.astype(cdt),        # (C*64, 32)
        "b1": params["conv1_b"].reshape(1, -1).astype(f32),
        "w2": jnp.transpose(params["conv2_w"], (2, 3, 1, 0))
                 .reshape(n_off2, 32, 64).astype(cdt),                # (16, 32, 64)
        "b2": params["conv2_b"].reshape(1, -1).astype(f32),
        "w3cat": w3cat,                                               # (64, 9*64)
        "b3": params["conv3_b"].reshape(1, -1).astype(f32),
        "wfc1": params["fc1_w"].T.astype(cdt),                        # (64, 512)
        "bfc1": params["fc1_b"].reshape(1, -1).astype(f32),
        "wfc2": wfc2,                                                 # (512, n_pad)
        "bfc2": bfc2,                                                 # (1, n_pad)
    }


@functools.partial(jax.jit, static_argnames=("n_actions",))
def dqn_forward(prep, state, n_actions):
    """Mirrors DeepQNetwork.forward: conv1/2/3 + ReLU, flatten, fc1 + ReLU, fc2."""
    B = state.shape[0]
    col1 = im2col(state, 8, 8, 4)                                   # (B*64, C*64) f32
    col1s = jnp.take(col1, prep["src_idx"], axis=0).astype(COMPUTE_DTYPE)

    n_off2 = prep["w2"].shape[0]
    c3 = prep["b3"].shape[-1]
    n_pos2 = prep["w3cat"].shape[-1] // c3
    bp = prep["src_idx"].shape[0] // (n_off2 * n_pos2)
    n_pad = prep["wfc2"].shape[1]
    k1 = prep["w1"].shape[0]

    flops = 2 * (n_off2 * n_pos2 * bp * k1 * 32          # conv1 (stacked)
                 + n_off2 * n_pos2 * bp * 32 * 64        # conv2 taps
                 + n_pos2 * bp * 64 * n_pos2 * 64        # conv3 (cross-term GEMM)
                 + bp * 64 * 512 + bp * 512 * n_pad)     # fc1 + fc2
    bytes_accessed = int(sum(int(np.prod(a.shape)) * jnp.dtype(a.dtype).itemsize
                             for a in (col1s, prep["w1"], prep["w2"], prep["w3cat"],
                                       prep["wfc1"], prep["wfc2"]))
                         + bp * n_pad * 4)

    kernel = functools.partial(_dqn_fused_kernel,
                               n_off2=n_off2, n_pos2=n_pos2, bp=bp)
    vmem = pl.BlockSpec(memory_space=pltpu.MemorySpace.VMEM)
    out_pad = pl.pallas_call(
        kernel,
        out_shape=jax.ShapeDtypeStruct((bp, n_pad), jnp.float32),
        in_specs=[vmem] * 11,
        out_specs=vmem,
        cost_estimate=pl.CostEstimate(flops=flops, transcendentals=0,
                                      bytes_accessed=bytes_accessed),
    )(col1s, prep["w1"], prep["b1"], prep["w2"], prep["b2"],
      prep["w3cat"], prep["b3"], prep["wfc1"], prep["bfc1"],
      prep["wfc2"], prep["bfc2"])
    return out_pad[:B, :n_actions]


# ------------------------------ reference & init ------------------------------- #
def reference_forward(params, state):
    dn = ("NCHW", "OIHW", "NCHW")
    x = lax.conv_general_dilated(state, params["conv1_w"], (4, 4), "VALID",
                                 dimension_numbers=dn)
    x = jax.nn.relu(x + params["conv1_b"][None, :, None, None])
    x = lax.conv_general_dilated(x, params["conv2_w"], (2, 2), "VALID",
                                 dimension_numbers=dn)
    x = jax.nn.relu(x + params["conv2_b"][None, :, None, None])
    x = lax.conv_general_dilated(x, params["conv3_w"], (1, 1), "VALID",
                                 dimension_numbers=dn)
    x = jax.nn.relu(x + params["conv3_b"][None, :, None, None])
    x = x.reshape(x.shape[0], -1)
    x = jax.nn.relu(x @ params["fc1_w"].T + params["fc1_b"])
    return x @ params["fc2_w"].T + params["fc2_b"]


def init_params(key, in_channels, n_actions, fc_input_dims):
    ks = jax.random.split(key, 10)
    s = 0.05
    return {
        "conv1_w": s * jax.random.normal(ks[0], (32, in_channels, 8, 8), jnp.float32),
        "conv1_b": s * jax.random.normal(ks[1], (32,), jnp.float32),
        "conv2_w": s * jax.random.normal(ks[2], (64, 32, 4, 4), jnp.float32),
        "conv2_b": s * jax.random.normal(ks[3], (64,), jnp.float32),
        "conv3_w": s * jax.random.normal(ks[4], (64, 64, 3, 3), jnp.float32),
        "conv3_b": s * jax.random.normal(ks[5], (64,), jnp.float32),
        "fc1_w": s * jax.random.normal(ks[6], (512, fc_input_dims), jnp.float32),
        "fc1_b": s * jax.random.normal(ks[7], (512,), jnp.float32),
        "fc2_w": s * jax.random.normal(ks[8], (n_actions, 512), jnp.float32),
        "fc2_b": s * jax.random.normal(ks[9], (n_actions,), jnp.float32),
    }


if __name__ == "__main__":
    # DQN-consistent toy shapes: 36 -> 8 (k8 s4) -> 3 (k4 s2) -> 1 (k3 s1)
    # => fc_input_dims = 64*1*1 = 64.
    B, C, H, W = 2, 4, 36, 36
    n_actions = 6
    fc_input_dims = 64 * 1 * 1

    key = jax.random.PRNGKey(0)
    k_params, k_state = jax.random.split(key)
    params = init_params(k_params, C, n_actions, fc_input_dims)
    state = jax.random.normal(k_state, (B, C, H, W), jnp.float32)

    prep = prepare_params(params, (C, H, W), B, n_actions)
    actions = dqn_forward(prep, state, n_actions=n_actions)
    actions = jax.block_until_ready(actions)

    assert actions.shape == (B, n_actions)
    assert bool(jnp.all(jnp.isfinite(actions)))

    # Loose tolerance: kernel feeds the MXU bf16 operands (f32 accumulation).
    ref = reference_forward(params, state)
    max_err = float(jnp.max(jnp.abs(actions - ref)))
    assert max_err < 5e-2, f"mismatch vs reference: {max_err}"

    print("KERNEL_OK")
</pallas_src>

<mosaic_0001>
module attributes {stable_mosaic.version = 11 : i64} {
  func.func @_dqn_fused_kernel(%arg0: memref<1152x256xbf16, #tpu.memory_space<vmem>>, %arg1: memref<256x32xbf16, #tpu.memory_space<vmem>>, %arg2: memref<1x32xf32, #tpu.memory_space<vmem>>, %arg3: memref<16x32x64xbf16, #tpu.memory_space<vmem>>, %arg4: memref<1x64xf32, #tpu.memory_space<vmem>>, %arg5: memref<64x576xbf16, #tpu.memory_space<vmem>>, %arg6: memref<1x64xf32, #tpu.memory_space<vmem>>, %arg7: memref<64x512xbf16, #tpu.memory_space<vmem>>, %arg8: memref<1x512xf32, #tpu.memory_space<vmem>>, %arg9: memref<512x128xbf16, #tpu.memory_space<vmem>>, %arg10: memref<1x128xf32, #tpu.memory_space<vmem>>, %arg11: memref<8x128xf32, #tpu.memory_space<vmem>>) attributes {dimension_semantics = [], scalar_prefetch = 0 : i64, scratch_operands = 0 : i64, tpu.core_type = #tpu.core_type<tc>} {
    %c0 = arith.constant 0 : index
    %c0_0 = arith.constant 0 : index
    %0 = vector.load %arg0[%c0, %c0_0] : memref<1152x256xbf16, #tpu.memory_space<vmem>>, vector<1152x256xbf16>
    %c0_1 = arith.constant 0 : index
    %c0_2 = arith.constant 0 : index
    %1 = vector.load %arg1[%c0_1, %c0_2] : memref<256x32xbf16, #tpu.memory_space<vmem>>, vector<256x32xbf16>
    %cst = arith.constant dense<0.000000e+00> : vector<1152x32xf32>
    %2 = tpu.matmul %0, %1, %cst {dimension_numbers = #tpu.dot_dimension_numbers<[1], [0], [0], [1], [0, 0, 1, 1], [], []>} : vector<1152x256xbf16>, vector<256x32xbf16>, vector<1152x32xf32> -> vector<1152x32xf32>
    %c0_3 = arith.constant 0 : index
    %c0_4 = arith.constant 0 : index
    %3 = vector.load %arg2[%c0_3, %c0_4] : memref<1x32xf32, #tpu.memory_space<vmem>>, vector<1x32xf32>
    %4 = vector.broadcast %3 : vector<1x32xf32> to vector<1152x32xf32>
    %5 = arith.addf %2, %4 : vector<1152x32xf32>
    %cst_5 = arith.constant 0.000000e+00 : f32
    %6 = vector.broadcast %cst_5 : f32 to vector<1152x32xf32>
    %7 = arith.maximumf %5, %6 : vector<1152x32xf32>
    %8 = vector.extract_strided_slice %7 {offsets = [0, 0], sizes = [72, 32], strides = [1, 1]} : vector<1152x32xf32> to vector<72x32xf32>
    %9 = arith.truncf %8 : vector<72x32xf32> to vector<72x32xbf16>
    %c0_6 = arith.constant 0 : index
    %c0_7 = arith.constant 0 : index
    %c0_8 = arith.constant 0 : index
    %10 = vector.load %arg3[%c0_6, %c0_7, %c0_8] : memref<16x32x64xbf16, #tpu.memory_space<vmem>>, vector<1x32x64xbf16>
    %11 = vector.shape_cast %10 : vector<1x32x64xbf16> to vector<32x64xbf16>
    %cst_9 = arith.constant dense<0.000000e+00> : vector<72x64xf32>
    %12 = tpu.matmul %9, %11, %cst_9 {dimension_numbers = #tpu.dot_dimension_numbers<[1], [0], [0], [1], [0, 0, 1, 1], [], []>} : vector<72x32xbf16>, vector<32x64xbf16>, vector<72x64xf32> -> vector<72x64xf32>
    %13 = vector.extract_strided_slice %7 {offsets = [72, 0], sizes = [72, 32], strides = [1, 1]} : vector<1152x32xf32> to vector<72x32xf32>
    %14 = arith.truncf %13 : vector<72x32xf32> to vector<72x32xbf16>
    %c1 = arith.constant 1 : index
    %c0_10 = arith.constant 0 : index
    %c0_11 = arith.constant 0 : index
    %15 = vector.load %arg3[%c1, %c0_10, %c0_11] : memref<16x32x64xbf16, #tpu.memory_space<vmem>>, vector<1x32x64xbf16>
    %16 = vector.shape_cast %15 : vector<1x32x64xbf16> to vector<32x64xbf16>
    %cst_12 = arith.constant dense<0.000000e+00> : vector<72x64xf32>
    %17 = tpu.matmul %14, %16, %cst_12 {dimension_numbers = #tpu.dot_dimension_numbers<[1], [0], [0], [1], [0, 0, 1, 1], [], []>} : vector<72x32xbf16>, vector<32x64xbf16>, vector<72x64xf32> -> vector<72x64xf32>
    %18 = vector.extract_strided_slice %7 {offsets = [144, 0], sizes = [72, 32], strides = [1, 1]} : vector<1152x32xf32> to vector<72x32xf32>
    %19 = arith.truncf %18 : vector<72x32xf32> to vector<72x32xbf16>
    %c2 = arith.constant 2 : index
    %c0_13 = arith.constant 0 : index
    %c0_14 = arith.constant 0 : index
    %20 = vector.load %arg3[%c2, %c0_13, %c0_14] : memref<16x32x64xbf16, #tpu.memory_space<vmem>>, vector<1x32x64xbf16>
    %21 = vector.shape_cast %20 : vector<1x32x64xbf16> to vector<32x64xbf16>
    %cst_15 = arith.constant dense<0.000000e+00> : vector<72x64xf32>
    %22 = tpu.matmul %19, %21, %cst_15 {dimension_numbers = #tpu.dot_dimension_numbers<[1], [0], [0], [1], [0, 0, 1, 1], [], []>} : vector<72x32xbf16>, vector<32x64xbf16>, vector<72x64xf32> -> vector<72x64xf32>
    %23 = arith.addf %12, %22 : vector<72x64xf32>
    %24 = vector.extract_strided_slice %7 {offsets = [216, 0], sizes = [72, 32], strides = [1, 1]} : vector<1152x32xf32> to vector<72x32xf32>
    %25 = arith.truncf %24 : vector<72x32xf32> to vector<72x32xbf16>
    %c3 = arith.constant 3 : index
    %c0_16 = arith.constant 0 : index
    %c0_17 = arith.constant 0 : index
    %26 = vector.load %arg3[%c3, %c0_16, %c0_17] : memref<16x32x64xbf16, #tpu.memory_space<vmem>>, vector<1x32x64xbf16>
    %27 = vector.shape_cast %26 : vector<1x32x64xbf16> to vector<32x64xbf16>
    %cst_18 = arith.constant dense<0.000000e+00> : vector<72x64xf32>
    %28 = tpu.matmul %25, %27, %cst_18 {dimension_numbers = #tpu.dot_dimension_numbers<[1], [0], [0], [1], [0, 0, 1, 1], [], []>} : vector<72x32xbf16>, vector<32x64xbf16>, vector<72x64xf32> -> vector<72x64xf32>
    %29 = arith.addf %17, %28 : vector<72x64xf32>
    %30 = vector.extract_strided_slice %7 {offsets = [288, 0], sizes = [72, 32], strides = [1, 1]} : vector<1152x32xf32> to vector<72x32xf32>
    %31 = arith.truncf %30 : vector<72x32xf32> to vector<72x32xbf16>
    %c4 = arith.constant 4 : index
    %c0_19 = arith.constant 0 : index
    %c0_20 = arith.constant 0 : index
    %32 = vector.load %arg3[%c4, %c0_19, %c0_20] : memref<16x32x64xbf16, #tpu.memory_space<vmem>>, vector<1x32x64xbf16>
    %33 = vector.shape_cast %32 : vector<1x32x64xbf16> to vector<32x64xbf16>
    %cst_21 = arith.constant dense<0.000000e+00> : vector<72x64xf32>
    %34 = tpu.matmul %31, %33, %cst_21 {dimension_numbers = #tpu.dot_dimension_numbers<[1], [0], [0], [1], [0, 0, 1, 1], [], []>} : vector<72x32xbf16>, vector<32x64xbf16>, vector<72x64xf32> -> vector<72x64xf32>
    %35 = arith.addf %23, %34 : vector<72x64xf32>
    %36 = vector.extract_strided_slice %7 {offsets = [360, 0], sizes = [72, 32], strides = [1, 1]} : vector<1152x32xf32> to vector<72x32xf32>
    %37 = arith.truncf %36 : vector<72x32xf32> to vector<72x32xbf16>
    %c5 = arith.constant 5 : index
    %c0_22 = arith.constant 0 : index
    %c0_23 = arith.constant 0 : index
    %38 = vector.load %arg3[%c5, %c0_22, %c0_23] : memref<16x32x64xbf16, #tpu.memory_space<vmem>>, vector<1x32x64xbf16>
    %39 = vector.shape_cast %38 : vector<1x32x64xbf16> to vector<32x64xbf16>
    %cst_24 = arith.constant dense<0.000000e+00> : vector<72x64xf32>
    %40 = tpu.matmul %37, %39, %cst_24 {dimension_numbers = #tpu.dot_dimension_numbers<[1], [0], [0], [1], [0, 0, 1, 1], [], []>} : vector<72x32xbf16>, vector<32x64xbf16>, vector<72x64xf32> -> vector<72x64xf32>
    %41 = arith.addf %29, %40 : vector<72x64xf32>
    %42 = vector.extract_strided_slice %7 {offsets = [432, 0], sizes = [72, 32], strides = [1, 1]} : vector<1152x32xf32> to vector<72x32xf32>
    %43 = arith.truncf %42 : vector<72x32xf32> to vector<72x32xbf16>
    %c6 = arith.constant 6 : index
    %c0_25 = arith.constant 0 : index
    %c0_26 = arith.constant 0 : index
    %44 = vector.load %arg3[%c6, %c0_25, %c0_26] : memref<16x32x64xbf16, #tpu.memory_space<vmem>>, vector<1x32x64xbf16>
    %45 = vector.shape_cast %44 : vector<1x32x64xbf16> to vector<32x64xbf16>
    %cst_27 = arith.constant dense<0.000000e+00> : vector<72x64xf32>
    %46 = tpu.matmul %43, %45, %cst_27 {dimension_numbers = #tpu.dot_dimension_numbers<[1], [0], [0], [1], [0, 0, 1, 1], [], []>} : vector<72x32xbf16>, vector<32x64xbf16>, vector<72x64xf32> -> vector<72x64xf32>
    %47 = arith.addf %35, %46 : vector<72x64xf32>
    %48 = vector.extract_strided_slice %7 {offsets = [504, 0], sizes = [72, 32], strides = [1, 1]} : vector<1152x32xf32> to vector<72x32xf32>
    %49 = arith.truncf %48 : vector<72x32xf32> to vector<72x32xbf16>
    %c7 = arith.constant 7 : index
    %c0_28 = arith.constant 0 : index
    %c0_29 = arith.constant 0 : index
    %50 = vector.load %arg3[%c7, %c0_28, %c0_29] : memref<16x32x64xbf16, #tpu.memory_space<vmem>>, vector<1x32x64xbf16>
    %51 = vector.shape_cast %50 : vector<1x32x64xbf16> to vector<32x64xbf16>
    %cst_30 = arith.constant dense<0.000000e+00> : vector<72x64xf32>
    %52 = tpu.matmul %49, %51, %cst_30 {dimension_numbers = #tpu.dot_dimension_numbers<[1], [0], [0], [1], [0, 0, 1, 1], [], []>} : vector<72x32xbf16>, vector<32x64xbf16>, vector<72x64xf32> -> vector<72x64xf32>
    %53 = arith.addf %41, %52 : vector<72x64xf32>
    %54 = vector.extract_strided_slice %7 {offsets = [576, 0], sizes = [72, 32], strides = [1, 1]} : vector<1152x32xf32> to vector<72x32xf32>
    %55 = arith.truncf %54 : vector<72x32xf32> to vector<72x32xbf16>
    %c8 = arith.constant 8 : index
    %c0_31 = arith.constant 0 : index
    %c0_32 = arith.constant 0 : index
    %56 = vector.load %arg3[%c8, %c0_31, %c0_32] : memref<16x32x64xbf16, #tpu.memory_space<vmem>>, vector<1x32x64xbf16>
    %57 = vector.shape_cast %56 : vector<1x32x64xbf16> to vector<32x64xbf16>
    %cst_33 = arith.constant dense<0.000000e+00> : vector<72x64xf32>
    %58 = tpu.matmul %55, %57, %cst_33 {dimension_numbers = #tpu.dot_dimension_numbers<[1], [0], [0], [1], [0, 0, 1, 1], [], []>} : vector<72x32xbf16>, vector<32x64xbf16>, vector<72x64xf32> -> vector<72x64xf32>
    %59 = arith.addf %47, %58 : vector<72x64xf32>
    %60 = vector.extract_strided_slice %7 {offsets = [648, 0], sizes = [72, 32], strides = [1, 1]} : vector<1152x32xf32> to vector<72x32xf32>
    %61 = arith.truncf %60 : vector<72x32xf32> to vector<72x32xbf16>
    %c9 = arith.constant 9 : index
    %c0_34 = arith.constant 0 : index
    %c0_35 = arith.constant 0 : index
    %62 = vector.load %arg3[%c9, %c0_34, %c0_35] : memref<16x32x64xbf16, #tpu.memory_space<vmem>>, vector<1x32x64xbf16>
    %63 = vector.shape_cast %62 : vector<1x32x64xbf16> to vector<32x64xbf16>
    %cst_36 = arith.constant dense<0.000000e+00> : vector<72x64xf32>
    %64 = tpu.matmul %61, %63, %cst_36 {dimension_numbers = #tpu.dot_dimension_numbers<[1], [0], [0], [1], [0, 0, 1, 1], [], []>} : vector<72x32xbf16>, vector<32x64xbf16>, vector<72x64xf32> -> vector<72x64xf32>
    %65 = arith.addf %53, %64 : vector<72x64xf32>
    %66 = vector.extract_strided_slice %7 {offsets = [720, 0], sizes = [72, 32], strides = [1, 1]} : vector<1152x32xf32> to vector<72x32xf32>
    %67 = arith.truncf %66 : vector<72x32xf32> to vector<72x32xbf16>
    %c10 = arith.constant 10 : index
    %c0_37 = arith.constant 0 : index
    %c0_38 = arith.constant 0 : index
    %68 = vector.load %arg3[%c10, %c0_37, %c0_38] : memref<16x32x64xbf16, #tpu.memory_space<vmem>>, vector<1x32x64xbf16>
    %69 = vector.shape_cast %68 : vector<1x32x64xbf16> to vector<32x64xbf16>
    %cst_39 = arith.constant dense<0.000000e+00> : vector<72x64xf32>
    %70 = tpu.matmul %67, %69, %cst_39 {dimension_numbers = #tpu.dot_dimension_numbers<[1], [0], [0], [1], [0, 0, 1, 1], [], []>} : vector<72x32xbf16>, vector<32x64xbf16>, vector<72x64xf32> -> vector<72x64xf32>
    %71 = arith.addf %59, %70 : vector<72x64xf32>
    %72 = vector.extract_strided_slice %7 {offsets = [792, 0], sizes = [72, 32], strides = [1, 1]} : vector<1152x32xf32> to vector<72x32xf32>
    %73 = arith.truncf %72 : vector<72x32xf32> to vector<72x32xbf16>
    %c11 = arith.constant 11 : index
    %c0_40 = arith.constant 0 : index
    %c0_41 = arith.constant 0 : index
    %74 = vector.load %arg3[%c11, %c0_40, %c0_41] : memref<16x32x64xbf16, #tpu.memory_space<vmem>>, vector<1x32x64xbf16>
    %75 = vector.shape_cast %74 : vector<1x32x64xbf16> to vector<32x64xbf16>
    %cst_42 = arith.constant dense<0.000000e+00> : vector<72x64xf32>
    %76 = tpu.matmul %73, %75, %cst_42 {dimension_numbers = #tpu.dot_dimension_numbers<[1], [0], [0], [1], [0, 0, 1, 1], [], []>} : vector<72x32xbf16>, vector<32x64xbf16>, vector<72x64xf32> -> vector<72x64xf32>
    %77 = arith.addf %65, %76 : vector<72x64xf32>
    %78 = vector.extract_strided_slice %7 {offsets = [864, 0], sizes = [72, 32], strides = [1, 1]} : vector<1152x32xf32> to vector<72x32xf32>
    %79 = arith.truncf %78 : vector<72x32xf32> to vector<72x32xbf16>
    %c12 = arith.constant 12 : index
    %c0_43 = arith.constant 0 : index
    %c0_44 = arith.constant 0 : index
    %80 = vector.load %arg3[%c12, %c0_43, %c0_44] : memref<16x32x64xbf16, #tpu.memory_space<vmem>>, vector<1x32x64xbf16>
    %81 = vector.shape_cast %80 : vector<1x32x64xbf16> to vector<32x64xbf16>
    %cst_45 = arith.constant dense<0.000000e+00> : vector<72x64xf32>
    %82 = tpu.matmul %79, %81, %cst_45 {dimension_numbers = #tpu.dot_dimension_numbers<[1], [0], [0], [1], [0, 0, 1, 1], [], []>} : vector<72x32xbf16>, vector<32x64xbf16>, vector<72x64xf32> -> vector<72x64xf32>
    %83 = arith.addf %71, %82 : vector<72x64xf32>
    %84 = vector.extract_strided_slice %7 {offsets = [936, 0], sizes = [72, 32], strides = [1, 1]} : vector<1152x32xf32> to vector<72x32xf32>
    %85 = arith.truncf %84 : vector<72x32xf32> to vector<72x32xbf16>
    %c13 = arith.constant 13 : index
    %c0_46 = arith.constant 0 : index
    %c0_47 = arith.constant 0 : index
    %86 = vector.load %arg3[%c13, %c0_46, %c0_47] : memref<16x32x64xbf16, #tpu.memory_space<vmem>>, vector<1x32x64xbf16>
    %87 = vector.shape_cast %86 : vector<1x32x64xbf16> to vector<32x64xbf16>
    %cst_48 = arith.constant dense<0.000000e+00> : vector<72x64xf32>
    %88 = tpu.matmul %85, %87, %cst_48 {dimension_numbers = #tpu.dot_dimension_numbers<[1], [0], [0], [1], [0, 0, 1, 1], [], []>} : vector<72x32xbf16>, vector<32x64xbf16>, vector<72x64xf32> -> vector<72x64xf32>
    %89 = arith.addf %77, %88 : vector<72x64xf32>
    %90 = vector.extract_strided_slice %7 {offsets = [1008, 0], sizes = [72, 32], strides = [1, 1]} : vector<1152x32xf32> to vector<72x32xf32>
    %91 = arith.truncf %90 : vector<72x32xf32> to vector<72x32xbf16>
    %c14 = arith.constant 14 : index
    %c0_49 = arith.constant 0 : index
    %c0_50 = arith.constant 0 : index
    %92 = vector.load %arg3[%c14, %c0_49, %c0_50] : memref<16x32x64xbf16, #tpu.memory_space<vmem>>, vector<1x32x64xbf16>
    %93 = vector.shape_cast %92 : vector<1x32x64xbf16> to vector<32x64xbf16>
    %cst_51 = arith.constant dense<0.000000e+00> : vector<72x64xf32>
    %94 = tpu.matmul %91, %93, %cst_51 {dimension_numbers = #tpu.dot_dimension_numbers<[1], [0], [0], [1], [0, 0, 1, 1], [], []>} : vector<72x32xbf16>, vector<32x64xbf16>, vector<72x64xf32> -> vector<72x64xf32>
    %95 = arith.addf %83, %94 : vector<72x64xf32>
    %96 = vector.extract_strided_slice %7 {offsets = [1080, 0], sizes = [72, 32], strides = [1, 1]} : vector<1152x32xf32> to vector<72x32xf32>
    %97 = arith.truncf %96 : vector<72x32xf32> to vector<72x32xbf16>
    %c15 = arith.constant 15 : index
    %c0_52 = arith.constant 0 : index
    %c0_53 = arith.constant 0 : index
    %98 = vector.load %arg3[%c15, %c0_52, %c0_53] : memref<16x32x64xbf16, #tpu.memory_space<vmem>>, vector<1x32x64xbf16>
    %99 = vector.shape_cast %98 : vector<1x32x64xbf16> to vector<32x64xbf16>
    %cst_54 = arith.constant dense<0.000000e+00> : vector<72x64xf32>
    %100 = tpu.matmul %97, %99, %cst_54 {dimension_numbers = #tpu.dot_dimension_numbers<[1], [0], [0], [1], [0, 0, 1, 1], [], []>} : vector<72x32xbf16>, vector<32x64xbf16>, vector<72x64xf32> -> vector<72x64xf32>
    %101 = arith.addf %89, %100 : vector<72x64xf32>
    %102 = arith.addf %95, %101 : vector<72x64xf32>
    %c0_55 = arith.constant 0 : index
    %c0_56 = arith.constant 0 : index
    %103 = vector.load %arg4[%c0_55, %c0_56] : memref<1x64xf32, #tpu.memory_space<vmem>>, vector<1x64xf32>
    %104 = vector.broadcast %103 : vector<1x64xf32> to vector<72x64xf32>
    %105 = arith.addf %102, %104 : vector<72x64xf32>
    %cst_57 = arith.constant 0.000000e+00 : f32
    %106 = vector.broadcast %cst_57 : f32 to vector<72x64xf32>
    %107 = arith.maximumf %105, %106 : vector<72x64xf32>
    %108 = arith.truncf %107 : vector<72x64xf32> to vector<72x64xbf16>
    %c0_58 = arith.constant 0 : index
    %c0_59 = arith.constant 0 : index
    %109 = vector.load %arg5[%c0_58, %c0_59] : memref<64x576xbf16, #tpu.memory_space<vmem>>, vector<64x576xbf16>
    %cst_60 = arith.constant dense<0.000000e+00> : vector<72x576xf32>
    %110 = tpu.matmul %108, %109, %cst_60 {dimension_numbers = #tpu.dot_dimension_numbers<[1], [0], [0], [1], [0, 0, 1, 1], [], []>} : vector<72x64xbf16>, vector<64x576xbf16>, vector<72x576xf32> -> vector<72x576xf32>
    %111 = vector.extract_strided_slice %110 {offsets = [0, 0], sizes = [8, 64], strides = [1, 1]} : vector<72x576xf32> to vector<8x64xf32>
    %112 = vector.extract_strided_slice %110 {offsets = [8, 64], sizes = [8, 64], strides = [1, 1]} : vector<72x576xf32> to vector<8x64xf32>
    %113 = arith.addf %111, %112 : vector<8x64xf32>
    %114 = vector.extract_strided_slice %110 {offsets = [16, 128], sizes = [8, 64], strides = [1, 1]} : vector<72x576xf32> to vector<8x64xf32>
    %115 = arith.addf %113, %114 : vector<8x64xf32>
    %116 = vector.extract_strided_slice %110 {offsets = [24, 192], sizes = [8, 64], strides = [1, 1]} : vector<72x576xf32> to vector<8x64xf32>
    %117 = arith.addf %115, %116 : vector<8x64xf32>
    %118 = vector.extract_strided_slice %110 {offsets = [32, 256], sizes = [8, 64], strides = [1, 1]} : vector<72x576xf32> to vector<8x64xf32>
    %119 = arith.addf %117, %118 : vector<8x64xf32>
    %120 = vector.extract_strided_slice %110 {offsets = [40, 320], sizes = [8, 64], strides = [1, 1]} : vector<72x576xf32> to vector<8x64xf32>
    %121 = arith.addf %119, %120 : vector<8x64xf32>
    %122 = vector.extract_strided_slice %110 {offsets = [48, 384], sizes = [8, 64], strides = [1, 1]} : vector<72x576xf32> to vector<8x64xf32>
    %123 = arith.addf %121, %122 : vector<8x64xf32>
    %124 = vector.extract_strided_slice %110 {offsets = [56, 448], sizes = [8, 64], strides = [1, 1]} : vector<72x576xf32> to vector<8x64xf32>
    %125 = arith.addf %123, %124 : vector<8x64xf32>
    %126 = vector.extract_strided_slice %110 {offsets = [64, 512], sizes = [8, 64], strides = [1, 1]} : vector<72x576xf32> to vector<8x64xf32>
    %127 = arith.addf %125, %126 : vector<8x64xf32>
    %c0_61 = arith.constant 0 : index
    %c0_62 = arith.constant 0 : index
    %128 = vector.load %arg6[%c0_61, %c0_62] : memref<1x64xf32, #tpu.memory_space<vmem>>, vector<1x64xf32>
    %129 = vector.broadcast %128 : vector<1x64xf32> to vector<8x64xf32>
    %130 = arith.addf %127, %129 : vector<8x64xf32>
    %cst_63 = arith.constant 0.000000e+00 : f32
    %131 = vector.broadcast %cst_63 : f32 to vector<8x64xf32>
    %132 = arith.maximumf %130, %131 : vector<8x64xf32>
    %133 = arith.truncf %132 : vector<8x64xf32> to vector<8x64xbf16>
    %c0_64 = arith.constant 0 : index
    %c0_65 = arith.constant 0 : index
    %134 = vector.load %arg7[%c0_64, %c0_65] : memref<64x512xbf16, #tpu.memory_space<vmem>>, vector<64x512xbf16>
    %cst_66 = arith.constant dense<0.000000e+00> : vector<8x512xf32>
    %135 = tpu.matmul %133, %134, %cst_66 {dimension_numbers = #tpu.dot_dimension_numbers<[1], [0], [0], [1], [0, 0, 1, 1], [], []>} : vector<8x64xbf16>, vector<64x512xbf16>, vector<8x512xf32> -> vector<8x512xf32>
    %c0_67 = arith.constant 0 : index
    %c0_68 = arith.constant 0 : index
    %136 = vector.load %arg8[%c0_67, %c0_68] : memref<1x512xf32, #tpu.memory_space<vmem>>, vector<1x512xf32>
    %137 = vector.broadcast %136 : vector<1x512xf32> to vector<8x512xf32>
    %138 = arith.addf %135, %137 : vector<8x512xf32>
    %cst_69 = arith.constant 0.000000e+00 : f32
    %139 = vector.broadcast %cst_69 : f32 to vector<8x512xf32>
    %140 = arith.maximumf %138, %139 : vector<8x512xf32>
    %141 = arith.truncf %140 : vector<8x512xf32> to vector<8x512xbf16>
    %c0_70 = arith.constant 0 : index
    %c0_71 = arith.constant 0 : index
    %142 = vector.load %arg9[%c0_70, %c0_71] : memref<512x128xbf16, #tpu.memory_space<vmem>>, vector<512x128xbf16>
    %cst_72 = arith.constant dense<0.000000e+00> : vector<8x128xf32>
    %143 = tpu.matmul %141, %142, %cst_72 {dimension_numbers = #tpu.dot_dimension_numbers<[1], [0], [0], [1], [0, 0, 1, 1], [], []>} : vector<8x512xbf16>, vector<512x128xbf16>, vector<8x128xf32> -> vector<8x128xf32>
    %c0_73 = arith.constant 0 : index
    %c0_74 = arith.constant 0 : index
    %144 = vector.load %arg10[%c0_73, %c0_74] : memref<1x128xf32, #tpu.memory_space<vmem>>, vector<1x128xf32>
    %145 = vector.broadcast %144 : vector<1x128xf32> to vector<8x128xf32>
    %146 = arith.addf %143, %145 : vector<8x128xf32>
    %c0_75 = arith.constant 0 : index
    %c0_76 = arith.constant 0 : index
    %147 = vector.load %arg11[%c0_75, %c0_76] : memref<8x128xf32, #tpu.memory_space<vmem>>, vector<8x128xf32>
    tpu.vector_store %arg11[%c0_75, %c0_76], %146 {strides = array<i32>} : memref<8x128xf32, #tpu.memory_space<vmem>>, vector<8x128xf32>,
    return
  }
}

</mosaic_0001>

<bundles_post_ra>
// kernel: dqn_forward.1
= control target key start
LH: loop header
LB: loop body
LE: loop exit
PB: predicated region body
PF: predicated region fallthrough
CT: control target
= control target key end

     0   :  { %v5969_v0 = vmov 0   ;;  %v5970_v57 = vmov 0.0   ;;  %vm5971_vm0 = vmmov 0   ;;  %vm1832_vm1 = vcmask 261120   ;;  %s5972_s12 = smov 64   ;;  %s7962_s1 = inlined_call_operand.vmem [shape: bf16[256,32], index: 1, kind: input, shape index: {}]   ;;  %s7963_s0 = inlined_call_operand.vmem [shape: bf16[1152,256], index: 0, kind: input, shape index: {}]   ;;  %s7964_s3 = inlined_call_operand.vmem [shape: bf16[16,32,64], index: 3, kind: input, shape index: {}]   ;;  %s7965_s2 = inlined_call_operand.vmem [shape: f32[1,32], index: 2, kind: input, shape index: {}]   ;;  %s7966_s5 = inlined_call_operand.vmem [shape: bf16[64,576], index: 5, kind: input, shape index: {}]   ;;  %s7967_s4 = inlined_call_operand.vmem [shape: f32[1,64], index: 4, kind: input, shape index: {}]   ;;  %s7968_s7 = inlined_call_operand.vmem [shape: bf16[64,512], index: 7, kind: input, shape index: {}]   ;;  %s7969_s9 = inlined_call_operand.vmem [shape: bf16[512,128], index: 9, kind: input, shape index: {}]   ;;  %s7970_s6 = inlined_call_operand.vmem [shape: f32[1,64], index: 6, kind: input, shape index: {}]   ;;  %s7971_s8 = inlined_call_operand.vmem [shape: f32[1,512], index: 8, kind: input, shape index: {}]   ;;  %s7972_s10 = inlined_call_operand.vmem [shape: f32[1,128], index: 10, kind: input, shape index: {}]   ;;  %s7973_s11 = inlined_call_operand.vmem [shape: f32[8,128], index: 11, kind: output, shape index: {}]  }
   0x1   :  { %1038 = vmatprep.subr.bf16.mxu0 %v5969_v0  ;;  %v5619_v1 = vld [vmem:[%s7962_s1 + $0x38] sm:$0xff]   ;;  %v5620_v2 = vld [vmem:[%s7962_s1 + $0x30] sm:$0xff]   ;;  %v5621_v3 = vld [vmem:[%s7962_s1 + $0x28] sm:$0xff]   ;;  %5203 = vmatprep.subr.bf16.mxu1 %v5970_v57  ;;  %vm3810_vm2 = vcmask 523264  }
   0x2   :  { %1039 = vmatpush1.bf16.msra.mxu0 %v5619_v1  ;;  %v5622_v4 = vld [vmem:[%s7962_s1 + $0x20] sm:$0xff]   ;;  %v5623_v5 = vld [vmem:[%s7962_s1 + $0x18] sm:$0xff]   ;;  %v5624_v7 = vld [vmem:[%s7962_s1 + $0x10] sm:$0xff]   ;;  %5207 = vmatprep.mubr.msk.bf16.mxu1 %vm5971_vm0, %v5970_v57 }
   0x3   :  { %1040 = vmatprep.subr.bf16.mxu0 %v5969_v0  ;;  %v5637_v6 = vld [vmem:[%s7963_s0 + $0x4] ss:$8 sps:$4 sm:$0xff]   ;;  %v5627_v10 = vld [vmem:[%s7962_s1 + $0x78] sm:$0xff]   ;;  %v5628_v11 = vld [vmem:[%s7962_s1 + $0x70] sm:$0xff]  }
   0x4   :  { %1070 = vmatprep.mubr.bf16.mxu0 %v5637_v6  ;;  %v5625_v8 = vld [vmem:[%s7962_s1 + $0x8] sm:$0xff]   ;;  %v5626_v9 = vld [vmem:[%s7962_s1] sm:$0xff]   ;;  %v5631_v14 = vld [vmem:[%s7962_s1 + $0x58] sm:$0xff]  }
   0x5   :  { %v5629_v12 = vld [vmem:[%s7962_s1 + $0x68] sm:$0xff]   ;;  %v5630_v13 = vld [vmem:[%s7962_s1 + $0x60] sm:$0xff]   ;;  %v5632_v15 = vld [vmem:[%s7962_s1 + $0x50] sm:$0xff]  }
   0x6   :  { %1041 = vmatpush1.bf16.msra.mxu0 %v5620_v2  ;;  %v5633_v16 = vld [vmem:[%s7962_s1 + $0x48] sm:$0xff]   ;;  %v5634_v17 = vld [vmem:[%s7962_s1 + $0x40] sm:$0xff]   ;;  %v5638_v19 = vld [vmem:[%s7963_s0 + $0x14] ss:$8 sps:$4 sm:$0xff]  }
   0x7   :  { %1042 = vmatprep.subr.bf16.mxu0 %v5969_v0  ;;  %v5635_v18 = vld [vmem:[%s7963_s0] ss:$8 sps:$4 sm:$0xff]   ;;  %v5640_v20 = vld [vmem:[%s7963_s0 + $0x10] ss:$8 sps:$4 sm:$0xff]   ;;  %v5641_v21 = vld [vmem:[%s7963_s0 + $0x24] ss:$8 sps:$4 sm:$0xff]  }
   0x8   :  { %v5643_v22 = vld [vmem:[%s7963_s0 + $0x20] ss:$8 sps:$4 sm:$0xff]   ;;  %v5644_v23 = vld [vmem:[%s7963_s0 + $0x34] ss:$8 sps:$4 sm:$0xff]   ;;  %v5646_v24 = vld [vmem:[%s7963_s0 + $0x30] ss:$8 sps:$4 sm:$0xff]  }
   0x9   :  { %v5647_v25 = vld [vmem:[%s7963_s0 + $0x44] ss:$8 sps:$4 sm:$0xff]   ;;  %v5649_v26 = vld [vmem:[%s7963_s0 + $0x40] ss:$8 sps:$4 sm:$0xff]   ;;  %v5650_v27 = vld [vmem:[%s7963_s0 + $0x54] ss:$8 sps:$4 sm:$0xff]  }
   0xa   :  { %1043 = vmatpush1.bf16.msra.mxu0 %v5621_v3  ;;  %v5652_v28 = vld [vmem:[%s7963_s0 + $0x50] ss:$8 sps:$4 sm:$0xff]   ;;  %v5653_v29 = vld [vmem:[%s7963_s0 + $0x64] ss:$8 sps:$4 sm:$0xff]   ;;  %v5655_v30 = vld [vmem:[%s7963_s0 + $0x60] ss:$8 sps:$4 sm:$0xff]  }
   0xb   :  { %1044 = vmatprep.subr.bf16.mxu0 %v5969_v0  ;;  %v5656_v31 = vld [vmem:[%s7963_s0 + $0x74] ss:$8 sps:$4 sm:$0xff]   ;;  %v5658_v32 = vld [vmem:[%s7963_s0 + $0x70] ss:$8 sps:$4 sm:$0xff]   ;;  %v5659_v33 = vld [vmem:[%s7963_s0 + $0x84] ss:$8 sps:$4 sm:$0xff]  }
   0xc   :  { %v5661_v34 = vld [vmem:[%s7963_s0 + $0x80] ss:$8 sps:$4 sm:$0xff]   ;;  %v5662_v35 = vld [vmem:[%s7963_s0 + $0x94] ss:$8 sps:$4 sm:$0xff]   ;;  %v5664_v36 = vld [vmem:[%s7963_s0 + $0x90] ss:$8 sps:$4 sm:$0xff]  }
   0xd   :  { %v5665_v37 = vld [vmem:[%s7963_s0 + $0xa4] ss:$8 sps:$4 sm:$0xff]   ;;  %v5667_v38 = vld [vmem:[%s7963_s0 + $0xa0] ss:$8 sps:$4 sm:$0xff]   ;;  %v5668_v39 = vld [vmem:[%s7963_s0 + $0xb4] ss:$8 sps:$4 sm:$0xff]  }
   0xe   :  { %1045 = vmatpush1.bf16.msra.mxu0 %v5622_v4  ;;  %v5670_v40 = vld [vmem:[%s7963_s0 + $0xb0] ss:$8 sps:$4 sm:$0xff]   ;;  %v5671_v41 = vld [vmem:[%s7963_s0 + $0xc4] ss:$8 sps:$4 sm:$0xff]   ;;  %v5673_v42 = vld [vmem:[%s7963_s0 + $0xc0] ss:$8 sps:$4 sm:$0xff]  }
   0xf   :  { %1046 = vmatprep.subr.bf16.mxu0 %v5969_v0  ;;  %v5674_v43 = vld [vmem:[%s7963_s0 + $0xd4] ss:$8 sps:$4 sm:$0xff]   ;;  %v5676_v44 = vld [vmem:[%s7963_s0 + $0xd0] ss:$8 sps:$4 sm:$0xff]   ;;  %v5677_v45 = vld [vmem:[%s7963_s0 + $0xe4] ss:$8 sps:$4 sm:$0xff]  }
  0x10   :  { %v5679_v46 = vld [vmem:[%s7963_s0 + $0xe0] ss:$8 sps:$4 sm:$0xff]   ;;  %v5680_v47 = vld [vmem:[%s7963_s0 + $0xf4] ss:$8 sps:$4 sm:$0xff]   ;;  %v5682_v48 = vld [vmem:[%s7963_s0 + $0xf0] ss:$8 sps:$4 sm:$0xff]  }
  0x11   :  { %v5683_v49 = vld [vmem:[%s7963_s0 + $0x104] ss:$8 sps:$4 sm:$0xff]   ;;  %v5685_v50 = vld [vmem:[%s7963_s0 + $0x100] ss:$8 sps:$4 sm:$0xff]   ;;  %v5686_v51 = vld [vmem:[%s7963_s0 + $0x114] ss:$8 sps:$4 sm:$0xff]  }
  0x12   :  { %1047 = vmatpush1.bf16.msra.mxu0 %v5623_v5  ;;  %v5688_v52 = vld [vmem:[%s7963_s0 + $0x110] ss:$8 sps:$4 sm:$0xff]   ;;  %v5689_v53 = vld [vmem:[%s7963_s0 + $0x124] ss:$8 sps:$4 sm:$0xff]   ;;  %v5691_v54 = vld [vmem:[%s7963_s0 + $0x120] ss:$8 sps:$4 sm:$0xff]  }
  0x13   :  { %1048 = vmatprep.subr.bf16.mxu0 %v5969_v0  ;;  %v5706_v55 = vld [vmem:[%s7964_s3 + $0x28] sm:$0xff]   ;;  %v5692_v56 = vld [vmem:[%s7963_s0 + $0x134] ss:$8 sps:$4 sm:$0xff]   ;;  %v5708_v58 = vld [vmem:[%s7964_s3 + $0x20] sm:$0xff]  }
  0x14   :  { %5204 = vmatpush3.bf16.msra.mxu1 %v5706_v55  ;;  %v5694_v59 = vld [vmem:[%s7963_s0 + $0x130] ss:$8 sps:$4 sm:$0xff]   ;;  %v5695_v60 = vld [vmem:[%s7963_s0 + $0x144] ss:$8 sps:$4 sm:$0xff]   ;;  %v5697_v61 = vld [vmem:[%s7963_s0 + $0x140] ss:$8 sps:$4 sm:$0xff]  }
  0x15   :  { %5205 = vmatprep.subr.bf16.mxu1 %v5970_v57  ;;  %v5698_v62 = vld [vmem:[%s7963_s0 + $0x154] ss:$8 sps:$4 sm:$0xff]   ;;  %v5700_v63 = vld [vmem:[%s7963_s0 + $0x150] ss:$8 sps:$4 sm:$0xff]   ;;  %v5701_v1 = vld [vmem:[%s7963_s0 + $0x164] ss:$8 sps:$4 sm:$0xff]  }
  0x16   :  { %1049 = vmatpush1.bf16.msra.mxu0 %v5624_v7  ;;  %v5703_v2 = vld [vmem:[%s7963_s0 + $0x160] ss:$8 sps:$4 sm:$0xff]   ;;  %v5704_v3 = vld [vmem:[%s7963_s0 + $0x174] ss:$8 sps:$4 sm:$0xff]   ;;  %v5707_v4 = vld [vmem:[%s7963_s0 + $0x170] ss:$8 sps:$4 sm:$0xff]  }
  0x17   :  { %1050 = vmatprep.subr.bf16.mxu0 %v5969_v0  ;;  %v5709_v5 = vld [vmem:[%s7963_s0 + $0x184] ss:$8 sps:$4 sm:$0xff]   ;;  %v5712_v6 = vld [vmem:[%s7963_s0 + $0x180] ss:$8 sps:$4 sm:$0xff]   ;;  %v5713_v7 = vld [vmem:[%s7963_s0 + $0x194] ss:$8 sps:$4 sm:$0xff]  }
  0x18   :  { %5206 = vmatpush3.bf16.msra.mxu1 %v5708_v58  ;;  %v5732_v58 = vld [vmem:[%s7963_s0 + $0x1e4] ss:$8 sps:$4 sm:$0xff]  }
  0x19   :  { %5227 = vmatprep.subr.bf16.mxu1 %v5970_v57 }
  0x1a   :  { %1051 = vmatpush1.bf16.msra.mxu0 %v5625_v8  ;;  %v6264_v8 = vld [vmem:[%s7965_s2] ss:$0 sm:$0xff] }
  0x1b   :  { %1052 = vmatprep.subr.bf16.mxu0 %v5969_v0 }
  0x1e   :  { %1053 = vmatpush1.bf16.msra.mxu0 %v5626_v9 }
  0x1f   :  { %1054 = vmatprep.subr.bf16.mxu0 %v5969_v0 }
  0x22   :  { %1055 = vmatpush2.bf16.msra.mxu0 %v5627_v10 }
  0x23   :  { %1056 = vmatprep.subr.bf16.mxu0 %v5969_v0 }
  0x26   :  { %1057 = vmatpush2.bf16.msra.mxu0 %v5628_v11 }
  0x27   :  { %1058 = vmatprep.subr.bf16.mxu0 %v5969_v0 }
  0x2a   :  { %1059 = vmatpush2.bf16.msra.mxu0 %v5629_v12 }
  0x2b   :  { %1060 = vmatprep.subr.bf16.mxu0 %v5969_v0 }
  0x2e   :  { %1061 = vmatpush2.bf16.msra.mxu0 %v5630_v13  ;;  %v5715_v13 = vld [vmem:[%s7963_s0 + $0x190] ss:$8 sps:$4 sm:$0xff]  }
  0x2f   :  { %1062 = vmatprep.subr.bf16.mxu0 %v5969_v0 }
  0x32   :  { %1063 = vmatpush2.bf16.msra.mxu0 %v5631_v14 }
  0x33   :  { %1064 = vmatprep.subr.bf16.mxu0 %v5969_v0 }
  0x36   :  { %1065 = vmatpush2.bf16.msra.mxu0 %v5632_v15  ;;  %v5716_v15 = vld [vmem:[%s7963_s0 + $0x1a4] ss:$8 sps:$4 sm:$0xff]  }
  0x37   :  { %1066 = vmatprep.subr.bf16.mxu0 %v5969_v0 }
  0x3a   :  { %1067 = vmatpush2.bf16.msra.mxu0 %v5633_v16 }
  0x3b   :  { %1068 = vmatprep.subr.bf16.mxu0 %v5969_v0 }
  0x3e   :  { %1069 = vmatpush2.bf16.msra.mxu0 %v5634_v17 }
  0x41   :  { %1071 = vmatmul.mubr.bf16.vlgmr.msra.gmra.mxu0 %v5635_v18 }
  0x42   :  { %1078 = vmatprep.mubr.bf16.mxu0 %v5638_v19 }
  0x49   :  { %1079 = vmatmul.mubr.bf16.gmra.mxu0 %v5640_v20 }
  0x4a   :  { %1086 = vmatprep.mubr.bf16.mxu0 %v5641_v21 }
  0x51   :  { %1087 = vmatmul.mubr.bf16.gmra.mxu0 %v5643_v22 }
  0x52   :  { %1094 = vmatprep.mubr.bf16.mxu0 %v5644_v23 }
  0x59   :  { %1095 = vmatmul.mubr.bf16.gmra.mxu0 %v5646_v24  ;;  %v5718_v24 = vld [vmem:[%s7963_s0 + $0x1a0] ss:$8 sps:$4 sm:$0xff]  }
  0x5a   :  { %1102 = vmatprep.mubr.bf16.mxu0 %v5647_v25 }
  0x61   :  { %1103 = vmatmul.mubr.bf16.gmra.mxu0 %v5649_v26  ;;  %v5720_v26 = vld [vmem:[%s7963_s0 + $0x1b4] ss:$8 sps:$4 sm:$0xff]  }
  0x62   :  { %1110 = vmatprep.mubr.bf16.mxu0 %v5650_v27 }
  0x69   :  { %1111 = vmatmul.mubr.bf16.gmra.mxu0 %v5652_v28 }
  0x6a   :  { %1118 = vmatprep.mubr.bf16.mxu0 %v5653_v29 }
  0x71   :  { %1119 = vmatmul.mubr.bf16.gmra.mxu0 %v5655_v30 }
  0x72   :  { %1126 = vmatprep.mubr.bf16.mxu0 %v5656_v31 }
  0x79   :  { %1127 = vmatmul.mubr.bf16.gmra.mxu0 %v5658_v32 }
  0x7a   :  { %1134 = vmatprep.mubr.bf16.mxu0 %v5659_v33 }
  0x81   :  { %1135 = vmatmul.mubr.bf16.gmra.mxu0 %v5661_v34 }
  0x82   :  { %1142 = vmatprep.mubr.bf16.mxu0 %v5662_v35  ;;  %v5722_v35 = vld [vmem:[%s7963_s0 + $0x1b0] ss:$8 sps:$4 sm:$0xff]  }
  0x89   :  { %1143 = vmatmul.mubr.bf16.gmra.mxu0 %v5664_v36 }
  0x8a   :  { %1150 = vmatprep.mubr.bf16.mxu0 %v5665_v37  ;;  %v5725_v37 = vld [vmem:[%s7963_s0 + $0x1c4] ss:$8 sps:$4 sm:$0xff]  }
  0x91   :  { %1151 = vmatmul.mubr.bf16.gmra.mxu0 %v5667_v38 }
  0x92   :  { %1158 = vmatprep.mubr.bf16.mxu0 %v5668_v39 }
  0x99   :  { %1159 = vmatmul.mubr.bf16.gmra.mxu0 %v5670_v40 }
  0x9a   :  { %1166 = vmatprep.mubr.bf16.mxu0 %v5671_v41 }
  0xa1   :  { %1167 = vmatmul.mubr.bf16.gmra.mxu0 %v5673_v42 }
  0xa2   :  { %1174 = vmatprep.mubr.bf16.mxu0 %v5674_v43 }
  0xa9   :  { %1175 = vmatmul.mubr.bf16.gmra.mxu0 %v5676_v44 }
  0xaa   :  { %1182 = vmatprep.mubr.bf16.mxu0 %v5677_v45 }
  0xb1   :  { %1183 = vmatmul.mubr.bf16.gmra.mxu0 %v5679_v46  ;;  %v5723_v46 = vld [vmem:[%s7963_s0 + $0x1c0] ss:$8 sps:$4 sm:$0xff]  }
  0xb2   :  { %1190 = vmatprep.mubr.bf16.mxu0 %v5680_v47 }
  0xb9   :  { %1191 = vmatmul.mubr.bf16.gmra.mxu0 %v5682_v48  ;;  %v5729_v48 = vld [vmem:[%s7963_s0 + $0x1d4] ss:$8 sps:$4 sm:$0xff]  }
  0xba   :  { %1198 = vmatprep.mubr.bf16.mxu0 %v5683_v49 }
  0xc1   :  { %1199 = vmatmul.mubr.bf16.gmra.mxu0 %v5685_v50 }
  0xc2   :  { %1206 = vmatprep.mubr.bf16.mxu0 %v5686_v51 }
  0xc9   :  { %1207 = vmatmul.mubr.bf16.gmra.mxu0 %v5688_v52 }
  0xca   :  { %1214 = vmatprep.mubr.bf16.mxu0 %v5689_v53 }
  0xd1   :  { %1215 = vmatmul.mubr.bf16.gmra.mxu0 %v5691_v54 }
  0xd2   :  { %1222 = vmatprep.mubr.bf16.mxu0 %v5692_v56  ;;  %v5727_v56 = vld [vmem:[%s7963_s0 + $0x1d0] ss:$8 sps:$4 sm:$0xff]  }
  0xd9   :  { %1223 = vmatmul.mubr.bf16.gmra.mxu0 %v5694_v59 }
  0xda   :  { %1230 = vmatprep.mubr.bf16.mxu0 %v5695_v60 }
  0xe1   :  { %1231 = vmatmul.mubr.bf16.gmra.mxu0 %v5697_v61 }
  0xe2   :  { %1238 = vmatprep.mubr.bf16.mxu0 %v5698_v62 }
  0xe9   :  { %1239 = vmatmul.mubr.bf16.gmra.mxu0 %v5700_v63 }
  0xea   :  { %1246 = vmatprep.mubr.bf16.mxu0 %v5701_v1 }
  0xf1   :  { %1247 = vmatmul.mubr.bf16.gmra.mxu0 %v5703_v2 }
  0xf2   :  { %1254 = vmatprep.mubr.bf16.mxu0 %v5704_v3 }
  0xf9   :  { %1255 = vmatmul.mubr.bf16.gmra.mxu0 %v5707_v4  ;;  %v5730_v4 = vld [vmem:[%s7963_s0 + $0x1e0] ss:$8 sps:$4 sm:$0xff]  }
  0xfa   :  { %1262 = vmatprep.mubr.bf16.mxu0 %v5709_v5 }
 0x101   :  { %v1072_v9 = vpop.f32.mrf.mxu0  ;;  %1263 = vmatmul.mubr.bf16.gmra.mxu0 %v5712_v6  ;;  %v5736_v6 = vld [vmem:[%s7963_s0 + $0x1f4] ss:$8 sps:$4 sm:$0xff]  }
 0x102   :  { %1270 = vmatprep.mubr.bf16.mxu0 %v5713_v7  ;;  %v1073_v11 = vadd.f32 %v6264_v8, %v1072_v9 }
 0x103   :  { %v1074_v10 = vpop.f32.mrf.mxu0 }
 0x104   :  { %v1647_v17 = vmax.f32 %v1073_v11, 0.0 }
 0x105   :  { %v1075_v12 = vpop.f32.mrf.mxu0 }
 0x106   :  { %v1076_v14 = vadd.f32 %v6264_v8, %v1075_v12 }
 0x107   :  { %v1077_v16 = vpop.f32.mrf.mxu0 }
 0x108   :  { %v1648_v18 = vmax.f32 %v1076_v14, 0.0  ;;  %v5734_v16 = vld [vmem:[%s7963_s0 + $0x1f0] ss:$8 sps:$4 sm:$0xff]  }
 0x109   :  { %v1080_v19 = vpop.f32.mrf.mxu0  ;;  %1271 = vmatmul.mubr.bf16.gmra.mxu0 %v5715_v13 }
 0x10a   :  { %v6274_v20 = vpack.c.bf16 %v1648_v18, %v1647_v17  ;;  %1278 = vmatprep.mubr.bf16.mxu0 %v5716_v15  ;;  %v1081_v22 = vadd.f32 %v6264_v8, %v1080_v19  ;;  %v5739_v18 = vld [vmem:[%s7963_s0 + $0x204] ss:$8 sps:$4 sm:$0xff]  }
 0x10b   :  { %v1082_v21 = vpop.f32.mrf.mxu0 }
 0x10c   :  { %v1649_v28 = vmax.f32 %v1081_v22, 0.0 }
 0x10d   :  { %v1083_v23 = vpop.f32.mrf.mxu0 }
 0x10e   :  { %v1084_v25 = vadd.f32 %v6264_v8, %v1083_v23 }
 0x10f   :  { %v1085_v27 = vpop.f32.mrf.mxu0 }
 0x110   :  { %v1650_v29 = vmax.f32 %v1084_v25, 0.0 }
 0x111   :  { %v1088_v30 = vpop.f32.mrf.mxu0  ;;  %1279 = vmatmul.mubr.bf16.gmra.mxu0 %v5718_v24 }
 0x112   :  { %v6284_v31 = vpack.c.bf16 %v1650_v29, %v1649_v28  ;;  %1286 = vmatprep.mubr.bf16.mxu0 %v5720_v26  ;;  %v1089_v33 = vadd.f32 %v6264_v8, %v1088_v30  ;;  %v5737_v28 = vld [vmem:[%s7963_s0 + $0x200] ss:$8 sps:$4 sm:$0xff]   ;;  %v5742_v30 = vld [vmem:[%s7963_s0 + $0x214] ss:$8 sps:$4 sm:$0xff]  }
 0x113   :  { %v1090_v32 = vpop.f32.mrf.mxu0 }
 0x114   :  { %v1651_v39 = vmax.f32 %v1089_v33, 0.0 }
 0x115   :  { %v1091_v34 = vpop.f32.mrf.mxu0 }
 0x116   :  { %v1092_v36 = vadd.f32 %v6264_v8, %v1091_v34 }
 0x117   :  { %v1093_v38 = vpop.f32.mrf.mxu0 }
 0x118   :  { %v1652_v40 = vmax.f32 %v1092_v36, 0.0 }
 0x119   :  { %v1096_v41 = vpop.f32.mrf.mxu0  ;;  %1287 = vmatmul.mubr.bf16.gmra.mxu0 %v5722_v35 }
 0x11a   :  { %v6294_v42 = vpack.c.bf16 %v1652_v40, %v1651_v39  ;;  %1294 = vmatprep.mubr.bf16.mxu0 %v5725_v37  ;;  %v1097_v44 = vadd.f32 %v6264_v8, %v1096_v41  ;;  %v5740_v40 = vld [vmem:[%s7963_s0 + $0x210] ss:$8 sps:$4 sm:$0xff]  }
 0x11b   :  { %v1098_v43 = vpop.f32.mrf.mxu0 }
 0x11c   :  { %v1653_v50 = vmax.f32 %v1097_v44, 0.0  ;;  %v5746_v43 = vld [vmem:[%s7963_s0 + $0x224] ss:$8 sps:$4 sm:$0xff]  }
 0x11d   :  { %v1099_v45 = vpop.f32.mrf.mxu0 }
 0x11e   :  { %v1100_v47 = vadd.f32 %v6264_v8, %v1099_v45 }
 0x11f   :  { %v1101_v49 = vpop.f32.mrf.mxu0 }
 0x120   :  { %v1654_v51 = vmax.f32 %v1100_v47, 0.0  ;;  %v5744_v49 = vld [vmem:[%s7963_s0 + $0x220] ss:$8 sps:$4 sm:$0xff]  }
 0x121   :  { %v6304_v52 = vpop.f32.mrf.mxu0  ;;  %1295 = vmatmul.mubr.bf16.gmra.mxu0 %v5723_v46 }
 0x122   :  { %v6306_v53 = vpack.c.bf16 %v1654_v51, %v1653_v50  ;;  %1302 = vmatprep.mubr.bf16.mxu0 %v5729_v48  ;;  %v5749_v51 = vld [vmem:[%s7963_s0 + $0x234] ss:$8 sps:$4 sm:$0xff]  }
 0x123   :  { %v1106_v54 = vpop.f32.mrf.mxu0 }
 0x125   :  { %v1107_v55 = vpop.f32.mrf.mxu0 }
 0x126   :  { %v1108_v60 = vadd.f32 %v6264_v8, %v1107_v55 }
 0x127   :  { %v1109_v59 = vpop.f32.mrf.mxu0 }
 0x128   :  { %v1656_v1 = vmax.f32 %v1108_v60, 0.0  ;;  %v5711_v59 = vld [vmem:[%s7964_s3 + $0x8] sm:$0xff]  }
 0x129   :  { %v1112_v61 = vpop.f32.mrf.mxu0  ;;  %1303 = vmatmul.mubr.bf16.gmra.mxu0 %v5727_v56 }
 0x12a   :  { %v1113_v62 = vadd.f32 %v6264_v8, %v1112_v61  ;;  %1310 = vmatprep.mubr.bf16.mxu0 %v5732_v58 }
 0x12b   :  { %v1114_v63 = vpop.f32.mrf.mxu0 }
 0x12c   :  { %v1657_v2 = vmax.f32 %v1113_v62, 0.0 }
 0x12d   :  { %v1115_v3 = vpop.f32.mrf.mxu0 }
 0x12e   :  { %v6319_v5 = vpack.c.bf16 %v1657_v2, %v1656_v1  ;;  %v1116_v9 = vadd.f32 %v6264_v8, %v1115_v3  ;;  %v5719_v1 = vld [vmem:[%s7964_s3] sm:$0xff]   ;;  %v5747_v2 = vld [vmem:[%s7963_s0 + $0x230] ss:$8 sps:$4 sm:$0xff]  }
 0x12f   :  { %v1117_v7 = vpop.f32.mrf.mxu0 }
 0x130   :  { %v1658_v13 = vmax.f32 %v1116_v9, 0.0 }
 0x131   :  { %v1120_v10 = vpop.f32.mrf.mxu0  ;;  %1311 = vmatmul.mubr.bf16.gmra.mxu0 %v5730_v4  ;;  %v5753_v4 = vld [vmem:[%s7963_s0 + $0x244] ss:$8 sps:$4 sm:$0xff]  }
 0x132   :  { %v1121_v11 = vadd.f32 %v6264_v8, %v1120_v10  ;;  %1318 = vmatprep.mubr.bf16.mxu0 %v5736_v6 }
 0x133   :  { %v1122_v12 = vpop.f32.mrf.mxu0 }
 0x134   :  { %v1659_v14 = vmax.f32 %v1121_v11, 0.0 }
 0x135   :  { %v1123_v15 = vpop.f32.mrf.mxu0 }
 0x136   :  { %v6329_v17 = vpack.c.bf16 %v1659_v14, %v1658_v13  ;;  %v1124_v21 = vadd.f32 %v6264_v8, %v1123_v15  ;;  %v5751_v15 = vld [vmem:[%s7963_s0 + $0x240] ss:$8 sps:$4 sm:$0xff]  }
 0x137   :  { %v1125_v19 = vpop.f32.mrf.mxu0 }
 0x138   :  { %v1660_v25 = vmax.f32 %v1124_v21, 0.0 }
 0x139   :  { %v1128_v22 = vpop.f32.mrf.mxu0  ;;  %1319 = vmatmul.mubr.bf16.gmra.mxu0 %v5734_v16 }
 0x13a   :  { %v1129_v23 = vadd.f32 %v6264_v8, %v1128_v22  ;;  %1326 = vmatprep.mubr.bf16.mxu0 %v5739_v18  ;;  %v5756_v18 = vld [vmem:[%s7963_s0 + $0x254] ss:$8 sps:$4 sm:$0xff]  }
 0x13b   :  { %v1130_v24 = vpop.f32.mrf.mxu0 }
 0x13c   :  { %v1661_v26 = vmax.f32 %v1129_v23, 0.0 }
 0x13d   :  { %v1131_v27 = vpop.f32.mrf.mxu0 }
 0x13e   :  { %v6339_v29 = vpack.c.bf16 %v1661_v26, %v1660_v25  ;;  %v1132_v33 = vadd.f32 %v6264_v8, %v1131_v27 }
 0x13f   :  { %v1133_v32 = vpop.f32.mrf.mxu0 }
 0x140   :  { %v1662_v37 = vmax.f32 %v1132_v33, 0.0  ;;  %v5760_v32 = vld [vmem:[%s7963_s0 + $0x264] ss:$8 sps:$4 sm:$0xff]  }
 0x141   :  { %v1136_v34 = vpop.f32.mrf.mxu0  ;;  %1327 = vmatmul.mubr.bf16.gmra.mxu0 %v5737_v28  ;;  %v5754_v28 = vld [vmem:[%s7963_s0 + $0x250] ss:$8 sps:$4 sm:$0xff]  }
 0x142   :  { %v1137_v35 = vadd.f32 %v6264_v8, %v1136_v34  ;;  %1334 = vmatprep.mubr.bf16.mxu0 %v5742_v30 }
 0x143   :  { %v1138_v36 = vpop.f32.mrf.mxu0 }
 0x144   :  { %v1663_v38 = vmax.f32 %v1137_v35, 0.0 }
 0x145   :  { %v6346_v39 = vpop.f32.mrf.mxu0 }
 0x146   :  { %v6351_v41 = vpack.c.bf16 %v1663_v38, %v1662_v37 }
 0x147   :  { %v1141_v44 = vpop.f32.mrf.mxu0 }
 0x149   :  { %v1144_v45 = vpop.f32.mrf.mxu0  ;;  %1335 = vmatmul.mubr.bf16.gmra.mxu0 %v5740_v40 }
 0x14a   :  { %1342 = vmatprep.mubr.bf16.mxu0 %v5746_v43  ;;  %v1145_v47 = vadd.f32 %v6264_v8, %v1144_v45  ;;  %v5758_v45 = vld [vmem:[%s7963_s0 + $0x260] ss:$8 sps:$4 sm:$0xff]  }
 0x14b   :  { %v1146_v46 = vpop.f32.mrf.mxu0 }
 0x14c   :  { %v1665_v55 = vmax.f32 %v1145_v47, 0.0  ;;  %v5763_v46 = vld [vmem:[%s7963_s0 + $0x274] ss:$8 sps:$4 sm:$0xff]  }
 0x14d   :  { %v1147_v48 = vpop.f32.mrf.mxu0 }
 0x14e   :  { %v1148_v50 = vadd.f32 %v6264_v8, %v1147_v48 }
 0x14f   :  { %v1149_v54 = vpop.f32.mrf.mxu0 }
 0x150   :  { %v1666_v56 = vmax.f32 %v1148_v50, 0.0  ;;  %v5761_v54 = vld [vmem:[%s7963_s0 + $0x270] ss:$8 sps:$4 sm:$0xff]  }
 0x151   :  { %v1152_v58 = vpop.f32.mrf.mxu0  ;;  %1343 = vmatmul.mubr.bf16.gmra.mxu0 %v5744_v49 }
 0x152   :  { %v1810_v60 = vpack.c.bf16 %v1666_v56, %v1665_v55  ;;  %1350 = vmatprep.mubr.bf16.mxu0 %v5749_v51  ;;  %v1153_v62 = vadd.f32 %v6264_v8, %v1152_v58  ;;  %v5767_v55 = vld [vmem:[%s7963_s0 + $0x284] ss:$8 sps:$4 sm:$0xff]   ;;  %v5726_v58 = vld [vmem:[%s7964_s3 + $0x38] sm:$0xff]  }
 0x153   :  { %v1154_v61 = vpop.f32.mrf.mxu0 }
 0x154   :  { %5208 = vmatmul.mubr.msk.bf16.vlgmr.msra.gmra.mxu1 %vm1832_vm1, %v1810_v60  ;;  %v1667_v7 = vmax.f32 %v1153_v62, 0.0  ;;  %v5733_v61 = vld [vmem:[%s7964_s3 + $0x30] sm:$0xff]  }
 0x155   :  { %5228 = vmatpush3.bf16.msra.mxu1 %v5711_v59  ;;  %v1155_v63 = vpop.f32.mrf.mxu0  ;;  %5211 = vmatprep.mubr.msk.bf16.mxu1 %vm5971_vm0, %v5970_v57 }
 0x156   :  { %v1156_v3 = vadd.f32 %v6264_v8, %v1155_v63  ;;  %5229 = vmatprep.subr.bf16.mxu1 %v5970_v57  ;;  %v5765_v63 = vld [vmem:[%s7963_s0 + $0x280] ss:$8 sps:$4 sm:$0xff]  }
 0x157   :  { %v1157_v6 = vpop.f32.mrf.mxu0 }
 0x158   :  { %v1668_v9 = vmax.f32 %v1156_v3, 0.0  ;;  %v5768_v6 = vld [vmem:[%s7963_s0 + $0x290] ss:$8 sps:$4 sm:$0xff]  }
 0x159   :  { %v1160_v10 = vpop.f32.mrf.mxu0  ;;  %5230 = vmatpush3.bf16.msra.mxu1 %v5719_v1  ;;  %1351 = vmatmul.mubr.bf16.gmra.mxu0 %v5747_v2 }
 0x15a   :  { %v1811_v11 = vpack.c.bf16 %v1668_v9, %v1667_v7  ;;  %5251 = vmatprep.subr.bf16.mxu1 %v5970_v57  ;;  %1358 = vmatprep.mubr.bf16.mxu0 %v5753_v4  ;;  %v1161_v13 = vadd.f32 %v6264_v8, %v1160_v10  ;;  %v5773_v7 = vld [vmem:[%s7963_s0 + $0x2a4] ss:$8 sps:$4 sm:$0xff]  }
 0x15b   :  { %v1162_v12 = vpop.f32.mrf.mxu0 }
 0x15c   :  { %5212 = vmatmul.mubr.msk.bf16.gmra.mxu1 %vm1832_vm1, %v1811_v11  ;;  %v1669_v21 = vmax.f32 %v1161_v13, 0.0  ;;  %v5771_v12 = vld [vmem:[%s7963_s0 + $0x2a0] ss:$8 sps:$4 sm:$0xff]   ;;  %v5777_v13 = vld [vmem:[%s7963_s0 + $0x2b4] ss:$8 sps:$4 sm:$0xff]  }
 0x15d   :  { %v1163_v14 = vpop.f32.mrf.mxu0  ;;  %5215 = vmatprep.mubr.msk.bf16.mxu1 %vm5971_vm0, %v5970_v57 }
 0x15e   :  { %v1164_v16 = vadd.f32 %v6264_v8, %v1163_v14 }
 0x15f   :  { %v1165_v19 = vpop.f32.mrf.mxu0 }
 0x160   :  { %v1670_v22 = vmax.f32 %v1164_v16, 0.0  ;;  %v1105_v16 = vadd.f32 %v6264_v8, %v6304_v52  ;;  %v5780_v52 = vld [vmem:[%s7963_s0 + $0x2c4] ss:$8 sps:$4 sm:$0xff]  }
 0x161   :  { %v1168_v23 = vpop.f32.mrf.mxu0  ;;  %1359 = vmatmul.mubr.bf16.gmra.mxu0 %v5751_v15 }
 0x162   :  { %v1812_v24 = vpack.c.bf16 %v1670_v22, %v1669_v21  ;;  %1366 = vmatprep.mubr.bf16.mxu0 %v5756_v18  ;;  %v1169_v26 = vadd.f32 %v6264_v8, %v1168_v23  ;;  %v5775_v21 = vld [vmem:[%s7963_s0 + $0x2b0] ss:$8 sps:$4 sm:$0xff]   ;;  %v1655_v22 = vmax.f32 %v1105_v16, 0.0 }
 0x163   :  { %v1170_v25 = vpop.f32.mrf.mxu0 }
 0x164   :  { %5216 = vmatmul.mubr.msk.bf16.gmra.mxu1 %vm1832_vm1, %v1812_v24  ;;  %v1671_v34 = vmax.f32 %v1169_v26, 0.0 }
 0x165   :  { %v1171_v27 = vpop.f32.mrf.mxu0  ;;  %5219 = vmatprep.mubr.msk.bf16.mxu1 %vm5971_vm0, %v5970_v57 }
 0x166   :  { %v1172_v30 = vadd.f32 %v6264_v8, %v1171_v27 }
 0x167   :  { %v1173_v33 = vpop.f32.mrf.mxu0 }
 0x168   :  { %v1672_v35 = vmax.f32 %v1172_v30, 0.0 }
 0x169   :  { %v1176_v36 = vpop.f32.mrf.mxu0  ;;  %1367 = vmatmul.mubr.bf16.gmra.mxu0 %v5754_v28 }
 0x16a   :  { %v1813_v37 = vpack.c.bf16 %v1672_v35, %v1671_v34  ;;  %v1177_v38 = vadd.f32 %v6264_v8, %v1176_v36  ;;  %1374 = vmatprep.mubr.bf16.mxu0 %v5760_v32  ;;  %v5778_v36 = vld [vmem:[%s7963_s0 + $0x2c0] ss:$8 sps:$4 sm:$0xff]  }
 0x16b   :  { %v1178_v40 = vpop.f32.mrf.mxu0 }
 0x16c   :  { %v1673_v43 = vmax.f32 %v1177_v38, 0.0  ;;  %5220 = vmatmul.mubr.msk.bf16.gmra.mxu1 %vm1832_vm1, %v1813_v37 }
 0x16d   :  { %v6407_v44 = vpop.f32.mrf.mxu0  ;;  %5223 = vmatprep.mubr.msk.bf16.mxu1 %vm5971_vm0, %v5970_v57 }
 0x16e   :  { %v1814_v48 = vpack.c.bf16 %v1673_v43, %v1673_v43  ;;  %v1180_v34 = vadd.f32 %v6264_v8, %v6407_v44  ;;  %v5784_v43 = vld [vmem:[%s7963_s0 + $0x2d4] ss:$8 sps:$4 sm:$0xff]  }
 0x16f   :  { %v1181_v47 = vpop.f32.mrf.mxu0 }
 0x170   :  { %v1674_v44 = vmax.f32 %v1180_v34, 0.0 }
 0x171   :  { %v6417_v49 = vpop.f32.mrf.mxu0  ;;  %1375 = vmatmul.mubr.bf16.gmra.mxu0 %v5758_v45 }
 0x172   :  { %1382 = vmatprep.mubr.bf16.mxu0 %v5763_v46  ;;  %v1185_v28 = vadd.f32 %v6264_v8, %v6417_v49  ;;  %v5743_v49 = vld [vmem:[%s7964_s3 + $0x18] sm:$0xff]  }
 0x173   :  { %v1186_v50 = vpop.f32.mrf.mxu0 }
 0x174   :  { %5224 = vmatmul.mubr.msk.bf16.gmra.mxu1 %vm1832_vm1, %v1814_v48  ;;  %v1675_v37 = vmax.f32 %v1185_v28, 0.0 }
 0x175   :  { %5231 = vmatprep.mubr.msk.bf16.mxu1 %vm5971_vm0, %v5970_v57  ;;  %v6422_v51 = vpop.f32.mrf.mxu0 }
 0x176   :  { %v1188_v47 = vadd.f32 %v6264_v8, %v6422_v51 }
 0x177   :  { %v1189_v56 = vpop.f32.mrf.mxu0 }
 0x179   :  { %v6433_v59 = vpop.f32.mrf.mxu0  ;;  %1383 = vmatmul.mubr.bf16.gmra.mxu0 %v5761_v54  ;;  %v2019_v54 = vpack.c.bf16 %v1675_v37, %v1674_v44 }
 0x17a   :  { %1390 = vmatprep.mubr.bf16.mxu0 %v5767_v55  ;;  %v1193_v48 = vadd.f32 %v6264_v8, %v6433_v59  ;;  %v5750_v59 = vld [vmem:[%s7964_s3 + $0x10] sm:$0xff]  }
 0x17b   :  { %v1194_v60 = vpop.f32.mrf.mxu0 }
 0x17c   :  { %5232 = vmatmul.mubr.msk.bf16.vlgmr.msra.gmra.mxu1 %vm1832_vm1, %v6274_v20  ;;  %v5770_v20 = vld [vmem:[%s7963_s0 + $0x294] ss:$8 sps:$4 sm:$0xff]   ;;  %v1676_v60 = vmax.f32 %v1188_v47, 0.0  ;;  %v1677_v51 = vmax.f32 %v1193_v48, 0.0  ;;  %v5792_v48 = vld [vmem:[%s7963_s0 + $0x300] ss:$8 sps:$4 sm:$0xff]  }
 0x17d   :  { %5252 = vmatpush3.bf16.msra.mxu1 %v5726_v58  ;;  %5235 = vmatprep.mubr.msk.bf16.mxu1 %vm5971_vm0, %v5970_v57  ;;  %v6442_v62 = vpop.f32.mrf.mxu0 }
 0x17e   :  { %5253 = vmatprep.subr.bf16.mxu1 %v5970_v57 }
 0x17f   :  { %v1197_v1 = vpop.f32.mrf.mxu0 }
 0x181   :  { %5254 = vmatpush3.bf16.msra.mxu1 %v5733_v61  ;;  %v6451_v2 = vpop.f32.mrf.mxu0  ;;  %1391 = vmatmul.mubr.bf16.gmra.mxu0 %v5765_v63  ;;  %v5782_v63 = vld [vmem:[%s7963_s0 + $0x2d0] ss:$8 sps:$4 sm:$0xff]  }
 0x182   :  { %5275 = vmatprep.subr.bf16.mxu1 %v5970_v57  ;;  %1398 = vmatprep.mubr.bf16.mxu0 %v5770_v20 }
 0x183   :  { %v1202_v3 = vpop.f32.mrf.mxu0 }
 0x184   :  { %5236 = vmatmul.mubr.msk.bf16.gmra.mxu1 %vm1832_vm1, %v6284_v31  ;;  %v5787_v3 = vld [vmem:[%s7963_s0 + $0x2e4] ss:$8 sps:$4 sm:$0xff]  }
 0x185   :  { %5239 = vmatprep.mubr.msk.bf16.mxu1 %vm5971_vm0, %v5970_v57  ;;  %v6458_v4 = vpop.f32.mrf.mxu0 }
 0x187   :  { %v1205_v9 = vpop.f32.mrf.mxu0 }
 0x188   :  { %v2020_v9 = vpack.c.bf16 %v1677_v51, %v1676_v60 }
 0x189   :  { %v6466_v10 = vpop.f32.mrf.mxu0  ;;  %1399 = vmatmul.mubr.bf16.gmra.mxu0 %v5768_v6 }
 0x18a   :  { %1406 = vmatprep.mubr.bf16.mxu0 %v5773_v7 }
 0x18b   :  { %v1210_v11 = vpop.f32.mrf.mxu0 }
 0x18c   :  { %5240 = vmatmul.mubr.msk.bf16.gmra.mxu1 %vm1832_vm1, %v6294_v42  ;;  %v1196_v11 = vadd.f32 %v6264_v8, %v6442_v62 }
 0x18d   :  { %5243 = vmatprep.mubr.msk.bf16.mxu1 %vm5971_vm0, %v5970_v57  ;;  %v6472_v31 = vpop.f32.mrf.mxu0 }
 0x18f   :  { %v1213_v14 = vpop.f32.mrf.mxu0 }
 0x191   :  { %v1216_v15 = vpop.f32.mrf.mxu0  ;;  %1407 = vmatmul.mubr.bf16.gmra.mxu0 %v5771_v12 }
 0x192   :  { %v1217_v42 = vadd.f32 %v6264_v8, %v1216_v15  ;;  %1414 = vmatprep.mubr.bf16.mxu0 %v5777_v13  ;;  %v1201_v13 = vadd.f32 %v6264_v8, %v6451_v2 }
 0x193   :  { %v1218_v18 = vpop.f32.mrf.mxu0 }
 0x194   :  { %5244 = vmatmul.mubr.msk.bf16.gmra.mxu1 %vm1832_vm1, %v6306_v53  ;;  %v1683_v23 = vmax.f32 %v1217_v42, 0.0  ;;  %v1795_v53 = vpack.c.bf16 %v1655_v22, %v1655_v22  ;;  %v5785_v42 = vld [vmem:[%s7963_s0 + $0x2e0] ss:$8 sps:$4 sm:$0xff]   ;;  %v1678_v18 = vmax.f32 %v1196_v11, 0.0  ;;  %v1679_v2 = vmax.f32 %v1201_v13, 0.0 }
 0x195   :  { %5247 = vmatprep.mubr.msk.bf16.mxu1 %vm5971_vm0, %v5970_v57  ;;  %v1219_v19 = vpop.f32.mrf.mxu0  ;;  %v5791_v22 = vld [vmem:[%s7963_s0 + $0x2f4] ss:$8 sps:$4 sm:$0xff]  }
 0x196   :  { %v1220_v24 = vadd.f32 %v6264_v8, %v1219_v19 }
 0x197   :  { %v1221_v25 = vpop.f32.mrf.mxu0 }
 0x198   :  { %v1684_v26 = vmax.f32 %v1220_v24, 0.0  ;;  %v2021_v25 = vpack.c.bf16 %v1679_v2, %v1678_v18  ;;  %v5764_v2 = vld [vmem:[%s7964_s3 + $0x40] sm:$0xff]  }
 0x199   :  { %v1224_v27 = vpop.f32.mrf.mxu0  ;;  %1415 = vmatmul.mubr.bf16.gmra.mxu0 %v5775_v21 }
 0x19a   :  { %v6496_v30 = vpack.c.bf16 %v1684_v26, %v1683_v23  ;;  %v1225_v32 = vadd.f32 %v6264_v8, %v1224_v27  ;;  %1422 = vmatprep.mubr.bf16.mxu0 %v5780_v52  ;;  %v1204_v26 = vadd.f32 %v6264_v8, %v6458_v4  ;;  %v1209_v27 = vadd.f32 %v6264_v8, %v6466_v10  ;;  %v5794_v10 = vld [vmem:[%s7963_s0 + $0x304] ss:$8 sps:$4 sm:$0xff]  }
 0x19b   :  { %v1226_v33 = vpop.f32.mrf.mxu0 }
 0x19c   :  { %5248 = vmatmul.mubr.msk.bf16.gmra.mxu1 %vm1832_vm1, %v1795_v53  ;;  %v1685_v38 = vmax.f32 %v1225_v32, 0.0  ;;  %v5789_v33 = vld [vmem:[%s7963_s0 + $0x2f0] ss:$8 sps:$4 sm:$0xff]   ;;  %v1680_v34 = vmax.f32 %v1204_v26, 0.0 }
 0x19d   :  { %5255 = vmatprep.mubr.msk.bf16.mxu1 %vm5971_vm0, %v5970_v57  ;;  %v1227_v35 = vpop.f32.mrf.mxu0 }
 0x19e   :  { %v1228_v40 = vadd.f32 %v6264_v8, %v1227_v35  ;;  %v1681_v35 = vmax.f32 %v1209_v27, 0.0 }
 0x19f   :  { %v1229_v45 = vpop.f32.mrf.mxu0 }
 0x1a0   :  { %v1686_v46 = vmax.f32 %v1228_v40, 0.0  ;;  %v1212_v40 = vadd.f32 %v6264_v8, %v6472_v31 }
 0x1a1   :  { %v1232_v50 = vpop.f32.mrf.mxu0  ;;  %1423 = vmatmul.mubr.bf16.gmra.mxu0 %v5778_v36 }
 0x1a2   :  { %v6518_v55 = vpack.c.bf16 %v1686_v46, %v1685_v38  ;;  %v1233_v56 = vadd.f32 %v6264_v8, %v1232_v50  ;;  %1430 = vmatprep.mubr.bf16.mxu0 %v5784_v43  ;;  %v2022_v38 = vpack.c.bf16 %v1681_v35, %v1680_v34  ;;  %v5805_v34 = vld [vmem:[%s7963_s0 + $0x330] ss:$8 sps:$4 sm:$0xff]  }
 0x1a3   :  { %v1234_v58 = vpop.f32.mrf.mxu0 }
 0x1a4   :  { %5256 = vmatmul.mubr.msk.bf16.vlgmr.msra.gmra.mxu1 %vm1832_vm1, %v2019_v54  ;;  %v1687_v20 = vmax.f32 %v1233_v56, 0.0  ;;  %v5798_v54 = vld [vmem:[%s7963_s0 + $0x314] ss:$8 sps:$4 sm:$0xff]  }
 0x1a5   :  { %5276 = vmatpush3.bf16.msra.mxu1 %v5743_v49  ;;  %5259 = vmatprep.mubr.msk.bf16.mxu1 %vm5971_vm0, %v5970_v57  ;;  %v1235_v61 = vpop.f32.mrf.mxu0  ;;  %v1682_v49 = vmax.f32 %v1212_v40, 0.0  ;;  %v5809_v40 = vld [vmem:[%s7963_s0 + $0x340] ss:$8 sps:$4 sm:$0xff]  }
 0x1a6   :  { %5277 = vmatprep.subr.bf16.mxu1 %v5970_v57  ;;  %v1236_v1 = vadd.f32 %v6264_v8, %v1235_v61 }
 0x1a7   :  { %v1237_v6 = vpop.f32.mrf.mxu0  ;;  %v2023_v60 = vpack.c.bf16 %v1682_v49, %v1682_v49 }
 0x1a8   :  { %v1688_v7 = vmax.f32 %v1236_v1, 0.0 }
 0x1a9   :  { %5278 = vmatpush3.bf16.msra.mxu1 %v5750_v59  ;;  %v1240_v12 = vpop.f32.mrf.mxu0  ;;  %1431 = vmatmul.mubr.bf16.gmra.mxu0 %v5782_v63  ;;  %v5796_v63 = vld [vmem:[%s7963_s0 + $0x310] ss:$8 sps:$4 sm:$0xff]  }
 0x1aa   :  { %5299 = vmatprep.subr.bf16.mxu1 %v5970_v57  ;;  %v6540_v14 = vpack.c.bf16 %v1688_v7, %v1687_v20  ;;  %v1241_v15 = vadd.f32 %v6264_v8, %v1240_v12  ;;  %1438 = vmatprep.mubr.bf16.mxu0 %v5787_v3  ;;  %v5802_v20 = vld [vmem:[%s7966_s5 + $0x78] ss:$20 sps:$4 sm:$0xff]   ;;  %v5804_v3 = vld [vmem:[%s7966_s5 + $0x7c] ss:$20 sps:$4 sm:$0xff]  }
 0x1ab   :  { %v1242_v16 = vpop.f32.mrf.mxu0  ;;  %v5801_v7 = vld [vmem:[%s7963_s0 + $0x324] ss:$8 sps:$4 sm:$0xff]   ;;  %3834 = vmatprep.subr.bf16.mxu0 %v5804_v3 }
 0x1ac   :  { %5260 = vmatmul.mubr.msk.bf16.gmra.mxu1 %vm1832_vm1, %v2020_v9  ;;  %v1689_v19 = vmax.f32 %v1241_v15, 0.0  ;;  %v5757_v12 = vld [vmem:[%s7964_s3 + $0x48] sm:$0xff]   ;;  %3835 = vmatpush1.bf16.msra.mxu0 %v5802_v20 }
 0x1ad   :  { %5263 = vmatprep.mubr.msk.bf16.mxu1 %vm5971_vm0, %v5970_v57  ;;  %v1243_v62 = vpop.f32.mrf.mxu0 }
 0x1ae   :  { %v1244_v21 = vadd.f32 %v6264_v8, %v1243_v62 }
 0x1af   :  { %v1245_v23 = vpop.f32.mrf.mxu0 }
 0x1b0   :  { %v1690_v24 = vmax.f32 %v1244_v21, 0.0  ;;  %v5799_v21 = vld [vmem:[%s7963_s0 + $0x320] ss:$8 sps:$4 sm:$0xff]   ;;  %v5807_v23 = vld [vmem:[%s7963_s0 + $0x334] ss:$8 sps:$4 sm:$0xff]  }
 0x1b1   :  { %v6553_v52 = vpop.f32.mrf.mxu0  ;;  %1439 = vmatmul.mubr.bf16.gmra.mxu0 %v5785_v42 }
 0x1b2   :  { %v6559_v53 = vpack.c.bf16 %v1690_v24, %v1689_v19  ;;  %1446 = vmatprep.mubr.bf16.mxu0 %v5791_v22 }
 0x1b3   :  { %v1250_v28 = vpop.f32.mrf.mxu0 }
 0x1b4   :  { %5264 = vmatmul.mubr.msk.bf16.gmra.mxu1 %vm1832_vm1, %v2021_v25 }
 0x1b5   :  { %5267 = vmatprep.mubr.msk.bf16.mxu1 %vm5971_vm0, %v5970_v57  ;;  %v1251_v32 = vpop.f32.mrf.mxu0 }
 0x1b6   :  { %v1252_v4 = vadd.f32 %v6264_v8, %v1251_v32 }
 0x1b7   :  { %v1253_v36 = vpop.f32.mrf.mxu0 }
 0x1b8   :  { %v1692_v43 = vmax.f32 %v1252_v4, 0.0  ;;  %v5811_v4 = vld [vmem:[%s7963_s0 + $0x344] ss:$8 sps:$4 sm:$0xff]  }
 0x1b9   :  { %v1256_v37 = vpop.f32.mrf.mxu0  ;;  %1447 = vmatmul.mubr.bf16.gmra.mxu0 %v5789_v33 }
 0x1ba   :  { %v1257_v45 = vadd.f32 %v6264_v8, %v1256_v37  ;;  %1454 = vmatprep.mubr.bf16.mxu0 %v5794_v10 }
 0x1bb   :  { %v1258_v44 = vpop.f32.mrf.mxu0 }
 0x1bc   :  { %5268 = vmatmul.mubr.msk.bf16.gmra.mxu1 %vm1832_vm1, %v2022_v38  ;;  %v1693_v46 = vmax.f32 %v1257_v45, 0.0  ;;  %v5814_v44 = vld [vmem:[%s7963_s0 + $0x354] ss:$8 sps:$4 sm:$0xff]  }
 0x1bd   :  { %5271 = vmatprep.mubr.msk.bf16.mxu1 %vm5971_vm0, %v5970_v57  ;;  %v1259_v47 = vpop.f32.mrf.mxu0 }
 0x1be   :  { %v6580_v50 = vpack.c.bf16 %v1693_v46, %v1692_v43  ;;  %v1260_v31 = vadd.f32 %v6264_v8, %v1259_v47 }
 0x1bf   :  { %v1261_v56 = vpop.f32.mrf.mxu0 }
 0x1c0   :  { %v1694_v51 = vmax.f32 %v1260_v31, 0.0 }
 0x1c1   :  { %v1264_v58 = vpop.f32.mrf.mxu0  ;;  %1455 = vmatmul.mubr.bf16.gmra.mxu0 %v5792_v48 }
 0x1c2   :  { %v1265_v59 = vadd.f32 %v6264_v8, %v1264_v58  ;;  %1462 = vmatprep.mubr.bf16.mxu0 %v5798_v54  ;;  %v5812_v58 = vld [vmem:[%s7963_s0 + $0x350] ss:$8 sps:$4 sm:$0xff]  }
 0x1c3   :  { %v1266_v61 = vpop.f32.mrf.mxu0 }
 0x1c4   :  { %5272 = vmatmul.mubr.msk.bf16.gmra.mxu1 %vm1832_vm1, %v2023_v60  ;;  %v1695_v1 = vmax.f32 %v1265_v59, 0.0  ;;  %v5818_v59 = vld [vmem:[%s7963_s0 + $0x364] ss:$8 sps:$4 sm:$0xff]  }
 0x1c5   :  { %5279 = vmatprep.mubr.msk.bf16.mxu1 %vm5971_vm0, %v5970_v57  ;;  %v1267_v6 = vpop.f32.mrf.mxu0 }
 0x1c6   :  { %v6602_v9 = vpack.c.bf16 %v1695_v1, %v1694_v51  ;;  %v1268_v11 = vadd.f32 %v6264_v8, %v1267_v6 }
 0x1c7   :  { %v1269_v13 = vpop.f32.mrf.mxu0 }
 0x1c8   :  { %v1696_v16 = vmax.f32 %v1268_v11, 0.0  ;;  %v5816_v11 = vld [vmem:[%s7963_s0 + $0x360] ss:$8 sps:$4 sm:$0xff]  }
 0x1c9   :  { %v1272_v15 = vpop.f32.mrf.mxu0  ;;  %1463 = vmatmul.mubr.bf16.gmra.mxu0 %v5796_v63 }
 0x1ca   :  { %v1273_v62 = vadd.f32 %v6264_v8, %v1272_v15  ;;  %1470 = vmatprep.mubr.bf16.mxu0 %v5801_v7  ;;  %v5821_v15 = vld [vmem:[%s7963_s0 + $0x374] ss:$8 sps:$4 sm:$0xff]  }
 0x1cb   :  { %v1274_v42 = vpop.f32.mrf.mxu0 }
 0x1cc   :  { %5280 = vmatmul.mubr.msk.bf16.vlgmr.msra.gmra.mxu1 %vm1832_vm1, %v6319_v5  ;;  %v1697_v18 = vmax.f32 %v1273_v62, 0.0  ;;  %v5774_v42 = vld [vmem:[%s7964_s3 + $0x58] sm:$0xff]  }
 0x1cd   :  { %5300 = vmatpush3.bf16.msra.mxu1 %v5757_v12  ;;  %5283 = vmatprep.mubr.msk.bf16.mxu1 %vm5971_vm0, %v5970_v57  ;;  %v1275_v19 = vpop.f32.mrf.mxu0 }
 0x1ce   :  { %5301 = vmatprep.subr.bf16.mxu1 %v5970_v57  ;;  %v6620_v22 = vpack.c.bf16 %v1697_v18, %v1696_v16  ;;  %v1276_v5 = vadd.f32 %v6264_v8, %v1275_v19 }
 0x1cf   :  { %v1277_v24 = vpop.f32.mrf.mxu0 }
 0x1d0   :  { %v1698_v26 = vmax.f32 %v1276_v5, 0.0  ;;  %v5781_v5 = vld [vmem:[%s7964_s3 + $0x50] sm:$0xff]  }
 0x1d1   :  { %5302 = vmatpush3.bf16.msra.mxu1 %v5764_v2  ;;  %v1280_v25 = vpop.f32.mrf.mxu0  ;;  %1471 = vmatmul.mubr.bf16.gmra.mxu0 %v5799_v21  ;;  %v5819_v24 = vld [vmem:[%s7963_s0 + $0x370] ss:$8 sps:$4 sm:$0xff]  }
 0x1d2   :  { %5323 = vmatprep.subr.bf16.mxu1 %v5970_v57  ;;  %v1281_v27 = vadd.f32 %v6264_v8, %v1280_v25  ;;  %1478 = vmatprep.mubr.bf16.mxu0 %v5807_v23 }
 0x1d3   :  { %v1282_v28 = vpop.f32.mrf.mxu0 }
 0x1d4   :  { %5284 = vmatmul.mubr.msk.bf16.gmra.mxu1 %vm1832_vm1, %v6329_v17  ;;  %v1699_v32 = vmax.f32 %v1281_v27, 0.0 }
 0x1d5   :  { %5287 = vmatprep.mubr.msk.bf16.mxu1 %vm5971_vm0, %v5970_v57  ;;  %v6632_v33 = vpop.f32.mrf.mxu0 }
 0x1d6   :  { %v6637_v35 = vpack.c.bf16 %v1699_v32, %v1698_v26 }
 0x1d7   :  { %v1285_v10 = vpop.f32.mrf.mxu0 }
 0x1d9   :  { %v1288_v36 = vpop.f32.mrf.mxu0  ;;  %1479 = vmatmul.mubr.bf16.gmra.mxu0 %v5805_v34 }
 0x1da   :  { %v1289_v17 = vadd.f32 %v6264_v8, %v1288_v36  ;;  %1486 = vmatprep.mubr.bf16.mxu0 %v5811_v4  ;;  %v5823_v36 = vld [vmem:[%s7963_s0 + $0x380] ss:$8 sps:$4 sm:$0xff]  }
 0x1db   :  { %v1290_v37 = vpop.f32.mrf.mxu0 }
 0x1dc   :  { %5288 = vmatmul.mubr.msk.bf16.gmra.mxu1 %vm1832_vm1, %v6339_v29  ;;  %v1701_v43 = vmax.f32 %v1289_v17, 0.0  ;;  %v1140_v29 = vadd.f32 %v6264_v8, %v6346_v39  ;;  %v5828_v37 = vld [vmem:[%s7963_s0 + $0x394] ss:$8 sps:$4 sm:$0xff]  }
 0x1dd   :  { %5291 = vmatprep.mubr.msk.bf16.mxu1 %vm5971_vm0, %v5970_v57  ;;  %v1291_v38 = vpop.f32.mrf.mxu0 }
 0x1de   :  { %v1292_v45 = vadd.f32 %v6264_v8, %v1291_v38  ;;  %v1664_v60 = vmax.f32 %v1140_v29, 0.0 }
 0x1df   :  { %v1293_v46 = vpop.f32.mrf.mxu0 }
 0x1e0   :  { %v1702_v47 = vmax.f32 %v1292_v45, 0.0 }
 0x1e1   :  { %v1296_v48 = vpop.f32.mrf.mxu0  ;;  %1487 = vmatmul.mubr.bf16.gmra.mxu0 %v5809_v40 }
 0x1e2   :  { %v6656_v49 = vpack.c.bf16 %v1702_v47, %v1701_v43  ;;  %v1297_v31 = vadd.f32 %v6264_v8, %v1296_v48  ;;  %1494 = vmatprep.mubr.bf16.mxu0 %v5814_v44  ;;  %v5826_v47 = vld [vmem:[%s7963_s0 + $0x390] ss:$8 sps:$4 sm:$0xff]  }
 0x1e3   :  { %v1298_v54 = vpop.f32.mrf.mxu0 }
 0x1e4   :  { %5292 = vmatmul.mubr.msk.bf16.gmra.mxu1 %vm1832_vm1, %v6351_v41  ;;  %v1703_v51 = vmax.f32 %v1297_v31, 0.0  ;;  %v1804_v41 = vpack.c.bf16 %v1664_v60, %v1664_v60  ;;  %v5832_v31 = vld [vmem:[%s7963_s0 + $0x3a4] ss:$8 sps:$4 sm:$0xff]  }
 0x1e5   :  { %5295 = vmatprep.mubr.msk.bf16.mxu1 %vm5971_vm0, %v5970_v57  ;;  %v1299_v56 = vpop.f32.mrf.mxu0 }
 0x1e6   :  { %v1300_v39 = vadd.f32 %v6264_v8, %v1299_v56 }
 0x1e7   :  { %v1301_v61 = vpop.f32.mrf.mxu0 }
 0x1e8   :  { %v1704_v63 = vmax.f32 %v1300_v39, 0.0 }
 0x1e9   :  { %v1304_v20 = vpop.f32.mrf.mxu0  ;;  %1495 = vmatmul.mubr.bf16.gmra.mxu0 %v5812_v58 }
 0x1ea   :  { %v6670_v1 = vpack.c.bf16 %v1704_v63, %v1703_v51  ;;  %v1305_v3 = vadd.f32 %v6264_v8, %v1304_v20  ;;  %1502 = vmatprep.mubr.bf16.mxu0 %v5818_v59 }
 0x1eb   :  { %v1306_v6 = vpop.f32.mrf.mxu0 }
 0x1ec   :  { %5296 = vmatmul.mubr.msk.bf16.gmra.mxu1 %vm1832_vm1, %v1804_v41  ;;  %v1705_v12 = vmax.f32 %v1305_v3, 0.0  ;;  %v5835_v41 = vld [vmem:[%s7963_s0 + $0x3b4] ss:$8 sps:$4 sm:$0xff]  }
 0x1ed   :  { %5303 = vmatprep.mubr.msk.bf16.mxu1 %vm5971_vm0, %v5970_v57  ;;  %v1307_v7 = vpop.f32.mrf.mxu0 }
 0x1ee   :  { %v1308_v13 = vadd.f32 %v6264_v8, %v1307_v7 }
 0x1ef   :  { %v1309_v16 = vpop.f32.mrf.mxu0 }
 0x1f0   :  { %v1706_v62 = vmax.f32 %v1308_v13, 0.0 }
 0x1f1   :  { %v1312_v18 = vpop.f32.mrf.mxu0  ;;  %1503 = vmatmul.mubr.bf16.gmra.mxu0 %v5816_v11 }
 0x1f2   :  { %v6686_v2 = vpack.c.bf16 %v1706_v62, %v1705_v12  ;;  %v1313_v19 = vadd.f32 %v6264_v8, %v1312_v18  ;;  %1510 = vmatprep.mubr.bf16.mxu0 %v5821_v15  ;;  %v5833_v62 = vld [vmem:[%s7963_s0 + $0x3b0] ss:$8 sps:$4 sm:$0xff]  }
 0x1f3   :  { %v1314_v21 = vpop.f32.mrf.mxu0 }
 0x1f4   :  { %5304 = vmatmul.mubr.msk.bf16.vlgmr.msra.gmra.mxu1 %vm1832_vm1, %v6496_v30  ;;  %v1707_v25 = vmax.f32 %v1313_v19, 0.0  ;;  %v5825_v30 = vld [vmem:[%s7963_s0 + $0x384] ss:$8 sps:$4 sm:$0xff]  }
 0x1f5   :  { %5324 = vmatpush3.bf16.msra.mxu1 %v5774_v42  ;;  %5307 = vmatprep.mubr.msk.bf16.mxu1 %vm5971_vm0, %v5970_v57  ;;  %v1315_v23 = vpop.f32.mrf.mxu0  ;;  %v5838_v21 = vld [vmem:[%s7963_s0 + $0x3c4] ss:$8 sps:$4 sm:$0xff]  }
 0x1f6   :  { %5325 = vmatprep.subr.bf16.mxu1 %v5970_v57  ;;  %v1316_v26 = vadd.f32 %v6264_v8, %v1315_v23 }
 0x1f7   :  { %v1317_v27 = vpop.f32.mrf.mxu0 }
 0x1f8   :  { %v1708_v28 = vmax.f32 %v1316_v26, 0.0 }
 0x1f9   :  { %5326 = vmatpush3.bf16.msra.mxu1 %v5781_v5  ;;  %v6704_v32 = vpop.f32.mrf.mxu0  ;;  %1511 = vmatmul.mubr.bf16.gmra.mxu0 %v5819_v24  ;;  %v5788_v24 = vld [vmem:[%s7964_s3 + $0x68] sm:$0xff]  }
 0x1fa   :  { %5347 = vmatprep.subr.bf16.mxu1 %v5970_v57  ;;  %v6707_v34 = vpack.c.bf16 %v1708_v28, %v1707_v25  ;;  %1518 = vmatprep.mubr.bf16.mxu0 %v5825_v30 }
 0x1fb   :  { %v1322_v4 = vpop.f32.mrf.mxu0 }
 0x1fc   :  { %5308 = vmatmul.mubr.msk.bf16.gmra.mxu1 %vm1832_vm1, %v6518_v55  ;;  %v6723_v55 = vld [vmem:[%s7965_s2] ss:$0 sm:$0xff] }
 0x1fd   :  { %5311 = vmatprep.mubr.msk.bf16.mxu1 %vm5971_vm0, %v5970_v57  ;;  %v1323_v10 = vpop.f32.mrf.mxu0 }
 0x1fe   :  { %v1324_v17 = vadd.f32 %v6264_v8, %v1323_v10 }
 0x1ff   :  { %v1325_v38 = vpop.f32.mrf.mxu0 }
 0x200   :  { %v1710_v43 = vmax.f32 %v1324_v17, 0.0 }
 0x201   :  { %v1328_v40 = vpop.f32.mrf.mxu0  ;;  %1519 = vmatmul.mubr.bf16.gmra.mxu0 %v5823_v36  ;;  %v5795_v36 = vld [vmem:[%s7964_s3 + $0x60] sm:$0xff]  }
 0x202   :  { %v1329_v45 = vadd.f32 %v6723_v55, %v1328_v40  ;;  %1526 = vmatprep.mubr.bf16.mxu0 %v5828_v37  ;;  %v5836_v37 = vld [vmem:[%s7963_s0 + $0x3c0] ss:$8 sps:$4 sm:$0xff]  }
 0x203   :  { %v1330_v44 = vpop.f32.mrf.mxu0 }
 0x204   :  { %5312 = vmatmul.mubr.msk.bf16.gmra.mxu1 %vm1832_vm1, %v6540_v14  ;;  %v1711_v8 = vmax.f32 %v1329_v45, 0.0  ;;  %v1249_v14 = vadd.f32 %v6723_v55, %v6553_v52  ;;  %v5830_v52 = vld [vmem:[%s7963_s0 + $0x3a0] ss:$8 sps:$4 sm:$0xff]  }
 0x205   :  { %5315 = vmatprep.mubr.msk.bf16.mxu1 %vm5971_vm0, %v5970_v57  ;;  %v1331_v46 = vpop.f32.mrf.mxu0 }
 0x206   :  { %v6733_v48 = vpack.c.bf16 %v1711_v8, %v1710_v43  ;;  %v1332_v29 = vadd.f32 %v6723_v55, %v1331_v46  ;;  %v1691_v39 = vmax.f32 %v1249_v14, 0.0 }
 0x207   :  { %v1333_v54 = vpop.f32.mrf.mxu0 }
 0x208   :  { %v1712_v58 = vmax.f32 %v1332_v29, 0.0  ;;  %v2231_v6 = vpack.c.bf16 %v1691_v39, %v1691_v39  ;;  %v5840_v54 = vld [vmem:[%s7963_s0 + $0x3d0] ss:$8 sps:$4 sm:$0xff]  }
 0x209   :  { %v1336_v56 = vpop.f32.mrf.mxu0  ;;  %1527 = vmatmul.mubr.bf16.gmra.mxu0 %v5826_v47 }
 0x20a   :  { %v1337_v60 = vadd.f32 %v6723_v55, %v1336_v56  ;;  %1534 = vmatprep.mubr.bf16.mxu0 %v5832_v31 }
 0x20b   :  { %v1338_v51 = vpop.f32.mrf.mxu0 }
 0x20c   :  { %5316 = vmatmul.mubr.msk.bf16.gmra.mxu1 %vm1832_vm1, %v6559_v53  ;;  %v1713_v59 = vmax.f32 %v1337_v60, 0.0  ;;  %v5845_v60 = vld [vmem:[%s7963_s0 + $0x3e4] ss:$8 sps:$4 sm:$0xff]  }
 0x20d   :  { %5319 = vmatprep.mubr.msk.bf16.mxu1 %vm5971_vm0, %v5970_v57  ;;  %v1339_v61 = vpop.f32.mrf.mxu0 }
 0x20e   :  { %v6749_v63 = vpack.c.bf16 %v1713_v59, %v1712_v58  ;;  %v1340_v20 = vadd.f32 %v6723_v55, %v1339_v61 }
 0x20f   :  { %v1341_v3 = vpop.f32.mrf.mxu0 }
 0x210   :  { %v1714_v7 = vmax.f32 %v1340_v20, 0.0 }
 0x211   :  { %v1344_v53 = vpop.f32.mrf.mxu0  ;;  %1535 = vmatmul.mubr.bf16.gmra.mxu0 %v5830_v52 }
 0x212   :  { %v1345_v11 = vadd.f32 %v6723_v55, %v1344_v53  ;;  %1542 = vmatprep.mubr.bf16.mxu0 %v5835_v41  ;;  %v5843_v53 = vld [vmem:[%s7963_s0 + $0x3e0] ss:$8 sps:$4 sm:$0xff]  }
 0x213   :  { %v1346_v12 = vpop.f32.mrf.mxu0 }
 0x214   :  { %v6756_v13 = vpop.f32.mrf.mxu1  ;;  %5320 = vmatmul.mubr.msk.bf16.gmra.mxu1 %vm1832_vm1, %v2231_v6  ;;  %v1715_v15 = vmax.f32 %v1345_v11, 0.0 }
 0x215   :  { %5327 = vmatprep.mubr.msk.bf16.mxu1 %vm5971_vm0, %v5970_v57  ;;  %v1347_v16 = vpop.f32.mrf.mxu0 }
 0x216   :  { %v5209_v42 = vpop.f32.mrf.mxu1  ;;  %v6764_v18 = vpack.c.bf16 %v1715_v15, %v1714_v7  ;;  %v1348_v19 = vadd.f32 %v6723_v55, %v1347_v16 }
 0x217   :  { %v1349_v5 = vpop.f32.mrf.mxu0 }
 0x218   :  { %v6770_v23 = vpop.f32.mrf.mxu1  ;;  %v1716_v30 = vmax.f32 %v1348_v19, 0.0  ;;  %v1284_v19 = vadd.f32 %v6723_v55, %v6632_v33  ;;  %v5847_v33 = vld [vmem:[%s7963_s0 + $0x3f0] ss:$8 sps:$4 sm:$0xff]  }
 0x219   :  { %v1352_v25 = vpop.f32.mrf.mxu0  ;;  %1543 = vmatmul.mubr.bf16.gmra.mxu0 %v5833_v62 }
 0x21a   :  { %v5210_v26 = vpop.f32.mrf.mxu1  ;;  %v1353_v27 = vadd.f32 %v6723_v55, %v1352_v25  ;;  %1550 = vmatprep.mubr.bf16.mxu0 %v5838_v21 }
 0x21b   :  { %v1354_v28 = vpop.f32.mrf.mxu0 }
 0x21c   :  { %v6776_v4 = vpop.f32.mrf.mxu1  ;;  %5328 = vmatmul.mubr.msk.bf16.vlgmr.msra.gmra.mxu1 %vm1832_vm1, %v6580_v50  ;;  %v1717_v10 = vmax.f32 %v1353_v27, 0.0  ;;  %v5842_v50 = vld [vmem:[%s7963_s0 + $0x3d4] ss:$8 sps:$4 sm:$0xff]   ;;  %v1700_v27 = vmax.f32 %v1284_v19, 0.0 }
 0x21d   :  { %5348 = vmatpush3.bf16.msra.mxu1 %v5788_v24  ;;  %5331 = vmatprep.mubr.msk.bf16.mxu1 %vm5971_vm0, %v5970_v57  ;;  %v6785_v17 = vpop.f32.mrf.mxu0 }
 0x21e   :  { %v5213_v38 = vpop.f32.mrf.mxu1  ;;  %5349 = vmatprep.subr.bf16.mxu1 %v5970_v57  ;;  %v6791_v40 = vpack.c.bf16 %v1717_v10, %v1716_v30 }
 0x21f   :  { %v1357_v43 = vpop.f32.mrf.mxu0 }
 0x220   :  { %v6796_v45 = vpop.f32.mrf.mxu1 }
 0x221   :  { %5350 = vmatpush3.bf16.msra.mxu1 %v5795_v36  ;;  %v1360_v44 = vpop.f32.mrf.mxu0  ;;  %1551 = vmatmul.mubr.bf16.gmra.mxu0 %v5836_v37 }
 0x222   :  { %v5214_v8 = vpop.f32.mrf.mxu1  ;;  %5371 = vmatprep.subr.bf16.mxu1 %v5970_v57  ;;  %v1361_v46 = vadd.f32 %v6723_v55, %v1360_v44  ;;  %1558 = vmatprep.mubr.bf16.mxu0 %v5842_v50  ;;  %v2349_v44 = vpack.c.bf16 %v1700_v27, %v1700_v27 }
 0x223   :  { %v1362_v47 = vpop.f32.mrf.mxu0 }
 0x224   :  { %v6800_v29 = vpop.f32.mrf.mxu1  ;;  %5332 = vmatmul.mubr.msk.bf16.gmra.mxu1 %vm1832_vm1, %v6602_v9  ;;  %v1719_v56 = vmax.f32 %v1361_v46, 0.0 }
 0x225   :  { %5335 = vmatprep.mubr.msk.bf16.mxu1 %vm5971_vm0, %v5970_v57  ;;  %v1363_v31 = vpop.f32.mrf.mxu0 }
 0x226   :  { %v5217_v14 = vpop.f32.mrf.mxu1  ;;  %v1364_v58 = vadd.f32 %v6723_v55, %v1363_v31 }
 0x227   :  { %v1365_v51 = vpop.f32.mrf.mxu0 }
 0x228   :  { %v6813_v39 = vpop.f32.mrf.mxu1  ;;  %v1720_v9 = vmax.f32 %v1364_v58, 0.0  ;;  %v5850_v58 = vld [vmem:[%s7963_s0 + $0x400] ss:$8 sps:$4 sm:$0xff]  }
 0x229   :  { %v1368_v59 = vpop.f32.mrf.mxu0  ;;  %1559 = vmatmul.mubr.bf16.gmra.mxu0 %v5840_v54 }
 0x22a   :  { %v5218_v61 = vpop.f32.mrf.mxu1  ;;  %v6815_v52 = vpack.c.bf16 %v1720_v9, %v1719_v56  ;;  %v1369_v20 = vadd.f32 %v6723_v55, %v1368_v59  ;;  %1566 = vmatprep.mubr.bf16.mxu0 %v5845_v60 }
 0x22b   :  { %v1370_v41 = vpop.f32.mrf.mxu0 }
 0x22c   :  { %v6818_v3 = vpop.f32.mrf.mxu1  ;;  %5336 = vmatmul.mubr.msk.bf16.gmra.mxu1 %vm1832_vm1, %v6620_v22  ;;  %v1721_v11 = vmax.f32 %v1369_v20, 0.0  ;;  %v5849_v22 = vld [vmem:[%s7963_s0 + $0x3f4] ss:$8 sps:$4 sm:$0xff]  }
 0x22d   :  { %5339 = vmatprep.mubr.msk.bf16.mxu1 %vm5971_vm0, %v5970_v57  ;;  %v1371_v6 = vpop.f32.mrf.mxu0 }
 0x22e   :  { %v5221_v7 = vpop.f32.mrf.mxu1  ;;  %v1372_v12 = vadd.f32 %v6723_v55, %v1371_v6  ;;  %v5808_v6 = vld [vmem:[%s7964_s3 + $0x78] sm:$0xff]  }
 0x22f   :  { %v1373_v15 = vpop.f32.mrf.mxu0 }
 0x230   :  { %v6828_v16 = vpop.f32.mrf.mxu1  ;;  %v1722_v62 = vmax.f32 %v1372_v12, 0.0 }
 0x231   :  { %v1376_v42 = vpop.f32.mrf.mxu0  ;;  %1567 = vmatmul.mubr.bf16.gmra.mxu0 %v5843_v53 }
 0x232   :  { %v5222_v21 = vpop.f32.mrf.mxu1  ;;  %v6835_v5 = vpack.c.bf16 %v1722_v62, %v1721_v11  ;;  %v1377_v24 = vadd.f32 %v6723_v55, %v1376_v42  ;;  %1574 = vmatprep.mubr.bf16.mxu0 %v5849_v22  ;;  %v5854_v42 = vld [vmem:[%s7963_s0 + $0x410] ss:$8 sps:$4 sm:$0xff]  }
 0x233   :  { %v1378_v25 = vpop.f32.mrf.mxu0 }
 0x234   :  { %v6838_v26 = vpop.f32.mrf.mxu1  ;;  %5340 = vmatmul.mubr.msk.bf16.gmra.mxu1 %vm1832_vm1, %v6637_v35  ;;  %v1723_v10 = vmax.f32 %v1377_v24, 0.0  ;;  %v5852_v35 = vld [vmem:[%s7963_s0 + $0x404] ss:$8 sps:$4 sm:$0xff]  }
 0x235   :  { %5343 = vmatprep.mubr.msk.bf16.mxu1 %vm5971_vm0, %v5970_v57  ;;  %v1379_v30 = vpop.f32.mrf.mxu0  ;;  %v5859_v24 = vld [vmem:[%s7963_s0 + $0x424] ss:$8 sps:$4 sm:$0xff]  }
 0x236   :  { %v5225_v28 = vpop.f32.mrf.mxu1  ;;  %v1380_v36 = vadd.f32 %v6723_v55, %v1379_v30 }
 0x237   :  { %v1381_v37 = vpop.f32.mrf.mxu0 }
 0x238   :  { %v1917_v38 = vpop.f32.mrf.mxu1  ;;  %v1724_v50 = vmax.f32 %v1380_v36, 0.0 }
 0x239   :  { %v1384_v43 = vpop.f32.mrf.mxu0  ;;  %1575 = vmatmul.mubr.bf16.gmra.mxu0 %v5847_v33 }
 0x23a   :  { %v5226_v8 = vpop.f32.mrf.mxu1  ;;  %v6851_v46 = vpack.c.bf16 %v1724_v50, %v1723_v10  ;;  %v1385_v47 = vadd.f32 %v6723_v55, %v1384_v43  ;;  %1582 = vmatprep.mubr.bf16.mxu0 %v5852_v35  ;;  %v5857_v50 = vld [vmem:[%s7963_s0 + $0x420] ss:$8 sps:$4 sm:$0xff]  }
 0x23b   :  { %v1386_v31 = vpop.f32.mrf.mxu0 }
 0x23c   :  { %v1981_v54 = vpop.f32.mrf.mxu1  ;;  %5344 = vmatmul.mubr.msk.bf16.gmra.mxu1 %vm1832_vm1, %v2349_v44  ;;  %v1725_v51 = vmax.f32 %v1385_v47, 0.0 }
 0x23d   :  { %v6856_v14 = vadd.f32 %v1981_v54, %v6756_v13  ;;  %5351 = vmatprep.mubr.msk.bf16.mxu1 %vm5971_vm0, %v5970_v57  ;;  %v1387_v56 = vpop.f32.mrf.mxu0  ;;  %v5856_v13 = vld [vmem:[%s7963_s0 + $0x414] ss:$8 sps:$4 sm:$0xff]  }
 0x23e   :  { %v5233_v60 = vpop.f32.mrf.mxu1  ;;  %v1388_v9 = vadd.f32 %v6723_v55, %v1387_v56 }
 0x23f   :  { %v1389_v59 = vpop.f32.mrf.mxu0  ;;  %v5863_v60 = vld [vmem:[%s7966_s5 + $0x54] ss:$20 sps:$4 sm:$0xff]  }
 0x240   :  { %v1984_v61 = vpop.f32.mrf.mxu1  ;;  %v1726_v20 = vmax.f32 %v1388_v9, 0.0  ;;  %3836 = vmatprep.subr.bf16.mxu0 %v5863_v60 }
 0x241   :  { %v6868_v41 = vadd.f32 %v1984_v61, %v6770_v23  ;;  %v6873_v53 = vpop.f32.mrf.mxu0  ;;  %1583 = vmatmul.mubr.bf16.gmra.mxu0 %v5850_v58  ;;  %v5815_v23 = vld [vmem:[%s7964_s3 + $0x70] sm:$0xff]  }
 0x242   :  { %v5234_v7 = vpop.f32.mrf.mxu1  ;;  %v6875_v11 = vpack.c.bf16 %v1726_v20, %v1725_v51  ;;  %1590 = vmatprep.mubr.bf16.mxu0 %v5856_v13  ;;  %v5861_v58 = vld [vmem:[%s7966_s5 + $0x50] ss:$20 sps:$4 sm:$0xff]  }
 0x243   :  { %v1394_v12 = vpop.f32.mrf.mxu0  ;;  %3837 = vmatpush1.bf16.msra.mxu0 %v5861_v58  ;;  %v5864_v13 = vld [vmem:[%s7963_s0 + $0x430] ss:$8 sps:$4 sm:$0xff]  }
 0x244   :  { %v1989_v15 = vpop.f32.mrf.mxu1  ;;  %5352 = vmatmul.mubr.msk.bf16.vlgmr.msra.gmra.mxu1 %vm1832_vm1, %v6656_v49 }
 0x245   :  { %v6880_v62 = vadd.f32 %v1989_v15, %v6776_v4  ;;  %5372 = vmatpush3.bf16.msra.mxu1 %v5808_v6  ;;  %5355 = vmatprep.mubr.msk.bf16.mxu1 %vm5971_vm0, %v5970_v57  ;;  %v1395_v22 = vpop.f32.mrf.mxu0 }
 0x246   :  { %v5237_v19 = vpop.f32.mrf.mxu1  ;;  %5373 = vmatprep.subr.bf16.mxu1 %v5970_v57  ;;  %v1396_v49 = vadd.f32 %v6723_v55, %v1395_v22 }
 0x247   :  { %v1397_v4 = vpop.f32.mrf.mxu0 }
 0x248   :  { %v1992_v21 = vpop.f32.mrf.mxu1  ;;  %v1728_v27 = vmax.f32 %v1396_v49, 0.0  ;;  %v5869_v4 = vld [vmem:[%s7963_s0 + $0x444] ss:$8 sps:$4 sm:$0xff]  }
 0x249   :  { %v6896_v25 = vadd.f32 %v1992_v21, %v6796_v45  ;;  %5374 = vmatpush3.bf16.msra.mxu1 %v5815_v23  ;;  %v1400_v30 = vpop.f32.mrf.mxu0  ;;  %1591 = vmatmul.mubr.bf16.gmra.mxu0 %v5854_v42 }
 0x24a   :  { %v5238_v33 = vpop.f32.mrf.mxu1  ;;  %5395 = vmatprep.subr.bf16.mxu1 %v5970_v57  ;;  %v1401_v28 = vadd.f32 %v6723_v55, %v1400_v30  ;;  %1598 = vmatprep.mubr.bf16.mxu0 %v5859_v24 }
 0x24b   :  { %v1402_v10 = vpop.f32.mrf.mxu0 }
 0x24c   :  { %v1997_v36 = vpop.f32.mrf.mxu1  ;;  %5356 = vmatmul.mubr.msk.bf16.gmra.mxu1 %vm1832_vm1, %v6670_v1  ;;  %v1729_v37 = vmax.f32 %v1401_v28, 0.0 }
 0x24d   :  { %v6903_v38 = vadd.f32 %v1997_v36, %v6800_v29  ;;  %5359 = vmatprep.mubr.msk.bf16.mxu1 %vm5971_vm0, %v5970_v57  ;;  %v1403_v45 = vpop.f32.mrf.mxu0 }
 0x24e   :  { %v5241_v35 = vpop.f32.mrf.mxu1  ;;  %v6910_v43 = vpack.c.bf16 %v1729_v37, %v1728_v27  ;;  %v1404_v44 = vadd.f32 %v6723_v55, %v1403_v45  ;;  %v5867_v27 = vld [vmem:[%s7963_s0 + $0x440] ss:$8 sps:$4 sm:$0xff]  }
 0x24f   :  { %v1405_v8 = vpop.f32.mrf.mxu0 }
 0x250   :  { %v2000_v47 = vpop.f32.mrf.mxu1  ;;  %v1730_v54 = vmax.f32 %v1404_v44, 0.0  ;;  %v5872_v8 = vld [vmem:[%s7963_s0 + $0x454] ss:$8 sps:$4 sm:$0xff]  }
 0x251   :  { %v6914_v1 = vadd.f32 %v2000_v47, %v6813_v39  ;;  %v1408_v29 = vpop.f32.mrf.mxu0  ;;  %1599 = vmatmul.mubr.bf16.gmra.mxu0 %v5857_v50  ;;  %v5866_v39 = vld [vmem:[%s7963_s0 + $0x434] ss:$8 sps:$4 sm:$0xff]  }
 0x252   :  { %v5242_v31 = vpop.f32.mrf.mxu1  ;;  %v1409_v56 = vadd.f32 %v6723_v55, %v1408_v29  ;;  %1606 = vmatprep.mubr.bf16.mxu0 %v5866_v39 }
 0x253   :  { %v1410_v51 = vpop.f32.mrf.mxu0 }
 0x254   :  { %v2005_v9 = vpop.f32.mrf.mxu1  ;;  %5360 = vmatmul.mubr.msk.bf16.gmra.mxu1 %vm1832_vm1, %v6686_v2  ;;  %v1731_v59 = vmax.f32 %v1409_v56, 0.0  ;;  %v5870_v56 = vld [vmem:[%s7963_s0 + $0x450] ss:$8 sps:$4 sm:$0xff]  }
 0x255   :  { %v6929_v61 = vadd.f32 %v2005_v9, %v6818_v3  ;;  %5363 = vmatprep.mubr.msk.bf16.mxu1 %vm5971_vm0, %v5970_v57  ;;  %v1411_v20 = vpop.f32.mrf.mxu0  ;;  %v1321_v3 = vadd.f32 %v6723_v55, %v6704_v32  ;;  %v5822_v9 = vld [vmem:[%s7964_s3 + $0x88] sm:$0xff]  }
 0x256   :  { %v5245_v6 = vpop.f32.mrf.mxu1  ;;  %v6936_v7 = vpack.c.bf16 %v1731_v59, %v1730_v54  ;;  %v1412_v12 = vadd.f32 %v6723_v55, %v1411_v20 }
 0x257   :  { %v1413_v2 = vpop.f32.mrf.mxu0  ;;  %v1709_v24 = vmax.f32 %v1321_v3, 0.0  ;;  %v5876_v6 = vld [vmem:[%s7963_s0 + $0x464] ss:$8 sps:$4 sm:$0xff]  }
 0x258   :  { %v2008_v15 = vpop.f32.mrf.mxu1  ;;  %v1732_v19 = vmax.f32 %v1412_v12, 0.0  ;;  %v5829_v3 = vld [vmem:[%s7964_s3 + $0x80] sm:$0xff]  }
 0x259   :  { %v6942_v23 = vadd.f32 %v2008_v15, %v6828_v16  ;;  %v1416_v22 = vpop.f32.mrf.mxu0  ;;  %1607 = vmatmul.mubr.bf16.gmra.mxu0 %v5864_v13 }
 0x25a   :  { %v5246_v42 = vpop.f32.mrf.mxu1  ;;  %v1417_v49 = vadd.f32 %v6723_v55, %v1416_v22  ;;  %1614 = vmatprep.mubr.bf16.mxu0 %v5869_v4  ;;  %v5874_v22 = vld [vmem:[%s7963_s0 + $0x460] ss:$8 sps:$4 sm:$0xff]  }
 0x25b   :  { %v1418_v21 = vpop.f32.mrf.mxu0 }
 0x25c   :  { %v2013_v30 = vpop.f32.mrf.mxu1  ;;  %5364 = vmatmul.mubr.msk.bf16.gmra.mxu1 %vm1832_vm1, %v6707_v34  ;;  %v1733_v32 = vmax.f32 %v1417_v49, 0.0  ;;  %v2467_v34 = vpack.c.bf16 %v1709_v24, %v1709_v24 }
 0x25d   :  { %v6951_v16 = vadd.f32 %v2013_v30, %v6838_v26  ;;  %5367 = vmatprep.mubr.msk.bf16.mxu1 %vm5971_vm0, %v5970_v57  ;;  %v1419_v33 = vpop.f32.mrf.mxu0 }
 0x25e   :  { %v5249_v28 = vpop.f32.mrf.mxu1  ;;  %v6958_v10 = vpack.c.bf16 %v1733_v32, %v1732_v19  ;;  %v1420_v36 = vadd.f32 %v6723_v55, %v1419_v33 }
 0x25f   :  { %v1421_v37 = vpop.f32.mrf.mxu0 }
 0x260   :  { %v2016_v45 = vpop.f32.mrf.mxu1  ;;  %v1734_v35 = vmax.f32 %v1420_v36, 0.0 }
 0x261   :  { %v1424_v50 = vpop.f32.mrf.mxu0  ;;  %1615 = vmatmul.mubr.bf16.gmra.mxu0 %v5867_v27  ;;  %v5879_v27 = vld [vmem:[%s7963_s0 + $0x474] ss:$8 sps:$4 sm:$0xff]  }
 0x262   :  { %v5250_v26 = vpop.f32.mrf.mxu1  ;;  %v1425_v44 = vadd.f32 %v6723_v55, %v1424_v50  ;;  %1622 = vmatprep.mubr.bf16.mxu0 %v5872_v8 }
 0x263   :  { %v1426_v47 = vpop.f32.mrf.mxu0 }
 0x264   :  { %v6965_v29 = vpop.f32.mrf.mxu1  ;;  %5368 = vmatmul.mubr.msk.bf16.gmra.mxu1 %vm1832_vm1, %v2467_v34  ;;  %v1735_v31 = vmax.f32 %v1425_v44, 0.0  ;;  %v5877_v34 = vld [vmem:[%s7963_s0 + $0x470] ss:$8 sps:$4 sm:$0xff]  }
 0x265   :  { %5375 = vmatprep.mubr.msk.bf16.mxu1 %vm5971_vm0, %v5970_v57  ;;  %v6970_v54 = vpop.f32.mrf.mxu0 }
 0x266   :  { %v5257_v58 = vpop.f32.mrf.mxu1  ;;  %v6975_v60 = vpack.c.bf16 %v1735_v31, %v1734_v35 }
 0x267   :  { %v1429_v51 = vpop.f32.mrf.mxu0 }
 0x268   :  { %v6977_v39 = vpop.f32.mrf.mxu1 }
 0x269   :  { %v1432_v59 = vpop.f32.mrf.mxu0  ;;  %1623 = vmatmul.mubr.bf16.gmra.mxu0 %v5870_v56 }
 0x26a   :  { %v5258_v20 = vpop.f32.mrf.mxu1  ;;  %v1433_v13 = vadd.f32 %v6723_v55, %v1432_v59  ;;  %1630 = vmatprep.mubr.bf16.mxu0 %v5876_v6 }
 0x26b   :  { %v1434_v12 = vpop.f32.mrf.mxu0 }
 0x26c   :  { %v6986_v2 = vpop.f32.mrf.mxu1  ;;  %5376 = vmatmul.mubr.msk.bf16.vlgmr.msra.gmra.mxu1 %vm1832_vm1, %v6733_v48  ;;  %v1737_v19 = vmax.f32 %v1433_v13, 0.0 }
 0x26d   :  { %5396 = vmatpush3.bf16.msra.mxu1 %v5822_v9  ;;  %5379 = vmatprep.mubr.msk.bf16.mxu1 %vm5971_vm0, %v5970_v57  ;;  %v1435_v15 = vpop.f32.mrf.mxu0 }
 0x26e   :  { %v5261_v42 = vpop.f32.mrf.mxu1  ;;  %5397 = vmatprep.subr.bf16.mxu1 %v5970_v57  ;;  %v1436_v48 = vadd.f32 %v6723_v55, %v1435_v15 }
 0x26f   :  { %v1437_v49 = vpop.f32.mrf.mxu0 }
 0x270   :  { %v7000_v4 = vpop.f32.mrf.mxu1  ;;  %v1738_v21 = vmax.f32 %v1436_v48, 0.0 }
 0x271   :  { %5398 = vmatpush3.bf16.msra.mxu1 %v5829_v3  ;;  %v1440_v24 = vpop.f32.mrf.mxu0  ;;  %1631 = vmatmul.mubr.bf16.gmra.mxu0 %v5874_v22  ;;  %v1356_v22 = vadd.f32 %v6723_v55, %v6785_v17 }
 0x272   :  { %v5262_v30 = vpop.f32.mrf.mxu1  ;;  %5419 = vmatprep.subr.bf16.mxu1 %v5970_v57  ;;  %v7003_v32 = vpack.c.bf16 %v1738_v21, %v1737_v19  ;;  %v1441_v33 = vadd.f32 %v6723_v55, %v1440_v24  ;;  %1638 = vmatprep.mubr.bf16.mxu0 %v5879_v27 }
 0x273   :  { %v1442_v28 = vpop.f32.mrf.mxu0  ;;  %v1718_v24 = vmax.f32 %v1356_v22, 0.0 }
 0x274   :  { %v7009_v36 = vpop.f32.mrf.mxu1  ;;  %5380 = vmatmul.mubr.msk.bf16.gmra.mxu1 %vm1832_vm1, %v6749_v63  ;;  %v1739_v50 = vmax.f32 %v1441_v33, 0.0 }
 0x275   :  { %5383 = vmatprep.mubr.msk.bf16.mxu1 %vm5971_vm0, %v5970_v57  ;;  %v1443_v37 = vpop.f32.mrf.mxu0 }
 0x276   :  { %v5265_v45 = vpop.f32.mrf.mxu1  ;;  %v1444_v26 = vadd.f32 %v6723_v55, %v1443_v37 }
 0x277   :  { %v1445_v35 = vpop.f32.mrf.mxu0  ;;  %v2585_v45 = vpack.c.bf16 %v1718_v24, %v1718_v24 }
 0x278   :  { %v7019_v44 = vpop.f32.mrf.mxu1  ;;  %v1740_v8 = vmax.f32 %v1444_v26, 0.0 }
 0x279   :  { %v1448_v47 = vpop.f32.mrf.mxu0  ;;  %1639 = vmatmul.mubr.bf16.gmra.mxu0 %v5877_v34 }
 0x27a   :  { %v5266_v63 = vpop.f32.mrf.mxu1  ;;  %v7021_v31 = vpack.c.bf16 %v1740_v8, %v1739_v50  ;;  %v1449_v56 = vadd.f32 %v6723_v55, %v1448_v47  ;;  %3858 = vmatprep.mubr.bf16.mxu0 %v5969_v0 }
 0x27b   :  { %v1450_v58 = vpop.f32.mrf.mxu0 }
 0x27c   :  { %v7025_v51 = vpop.f32.mrf.mxu1  ;;  %5384 = vmatmul.mubr.msk.bf16.gmra.mxu1 %vm1832_vm1, %v6764_v18  ;;  %v1741_v20 = vmax.f32 %v1449_v56, 0.0 }
 0x27d   :  { %5387 = vmatprep.mubr.msk.bf16.mxu1 %vm5971_vm0, %v5970_v57  ;;  %v1451_v9 = vpop.f32.mrf.mxu0 }
 0x27e   :  { %v5269_v59 = vpop.f32.mrf.mxu1  ;;  %v1452_v13 = vadd.f32 %v6723_v55, %v1451_v9 }
 0x27f   :  { %v1453_v6 = vpop.f32.mrf.mxu0 }
 0x280   :  { %v7032_v12 = vpop.f32.mrf.mxu1  ;;  %v1742_v3 = vmax.f32 %v1452_v13, 0.0 }
 0x281   :  { %v1456_v15 = vpop.f32.mrf.mxu0 }
 0x282   :  { %v5270_v42 = vpop.f32.mrf.mxu1  ;;  %v7036_v19 = vpack.c.bf16 %v1742_v3, %v1741_v20  ;;  %v1457_v18 = vadd.f32 %v6723_v55, %v1456_v15  ;;  %v5839_v20 = vld [vmem:[%s7964_s3 + $0x98] sm:$0xff]  }
 0x283   :  { %v1458_v48 = vpop.f32.mrf.mxu0 }
 0x284   :  { %v7039_v49 = vpop.f32.mrf.mxu1  ;;  %5388 = vmatmul.mubr.msk.bf16.gmra.mxu1 %vm1832_vm1, %v6791_v40  ;;  %v1743_v33 = vmax.f32 %v1457_v18, 0.0 }
 0x285   :  { %5391 = vmatprep.mubr.msk.bf16.mxu1 %vm5971_vm0, %v5970_v57  ;;  %v1459_v21 = vpop.f32.mrf.mxu0 }
 0x286   :  { %v5273_v30 = vpop.f32.mrf.mxu1  ;;  %v1460_v17 = vadd.f32 %v6723_v55, %v1459_v21 }
 0x287   :  { %v1461_v27 = vpop.f32.mrf.mxu0 }
 0x288   :  { %v2125_v28 = vpop.f32.mrf.mxu1  ;;  %v1744_v37 = vmax.f32 %v1460_v17, 0.0 }
 0x289   :  { %v7046_v34 = vpop.f32.mrf.mxu0 }
 0x28a   :  { %v5274_v50 = vpop.f32.mrf.mxu1  ;;  %v7048_v26 = vpack.c.bf16 %v1744_v37, %v1743_v33 }
 0x28b   :  { %v1466_v35 = vpop.f32.mrf.mxu0 }
 0x28c   :  { %v2189_v40 = vpop.f32.mrf.mxu1  ;;  %5392 = vmatmul.mubr.msk.bf16.gmra.mxu1 %vm1832_vm1, %v2585_v45 }
 0x28d   :  { %v7052_v8 = vadd.f32 %v2189_v40, %v6965_v29  ;;  %5399 = vmatprep.mubr.msk.bf16.mxu1 %vm5971_vm0, %v5970_v57  ;;  %v1467_v47 = vpop.f32.mrf.mxu0 }
 0x28e   :  { %v5281_v63 = vpop.f32.mrf.mxu1  ;;  %v1468_v56 = vadd.f32 %v6723_v55, %v1467_v47 }
 0x28f   :  { %v1469_v58 = vpop.f32.mrf.mxu0 }
 0x290   :  { %v2192_v9 = vpop.f32.mrf.mxu1  ;;  %v1746_v29 = vmax.f32 %v1468_v56, 0.0 }
 0x291   :  { %v7058_v59 = vadd.f32 %v2192_v9, %v6977_v39  ;;  %v1472_v13 = vpop.f32.mrf.mxu0  ;;  %v5846_v39 = vld [vmem:[%s7964_s3 + $0x90] sm:$0xff]  }
 0x292   :  { %v5282_v6 = vpop.f32.mrf.mxu1  ;;  %v1473_v3 = vadd.f32 %v6723_v55, %v1472_v13 }
 0x293   :  { %v1474_v15 = vpop.f32.mrf.mxu0 }
 0x294   :  { %v2197_v22 = vpop.f32.mrf.mxu1  ;;  %5400 = vmatmul.mubr.msk.bf16.vlgmr.msra.gmra.mxu1 %vm1832_vm1, %v6815_v52  ;;  %v1747_v42 = vmax.f32 %v1473_v3, 0.0 }
 0x295   :  { %v7067_v18 = vadd.f32 %v2197_v22, %v6986_v2  ;;  %5420 = vmatpush3.bf16.msra.mxu1 %v5839_v20  ;;  %5403 = vmatprep.mubr.msk.bf16.mxu1 %vm5971_vm0, %v5970_v57  ;;  %v1475_v48 = vpop.f32.mrf.mxu0 }
 0x296   :  { %v5285_v21 = vpop.f32.mrf.mxu1  ;;  %5421 = vmatprep.subr.bf16.mxu1 %v5970_v57  ;;  %v7075_v24 = vpack.c.bf16 %v1747_v42, %v1746_v29  ;;  %v1476_v52 = vadd.f32 %v6723_v55, %v1475_v48 }
 0x297   :  { %v1477_v30 = vpop.f32.mrf.mxu0 }
 0x298   :  { %v2200_v33 = vpop.f32.mrf.mxu1  ;;  %v1748_v28 = vmax.f32 %v1476_v52, 0.0  ;;  %v1393_v52 = vadd.f32 %v6723_v55, %v6873_v53 }
 0x299   :  { %v7079_v2 = vadd.f32 %v2200_v33, %v7000_v4  ;;  %5422 = vmatpush3.bf16.msra.mxu1 %v5846_v39  ;;  %v1480_v17 = vpop.f32.mrf.mxu0 }
 0x29a   :  { %v5286_v27 = vpop.f32.mrf.mxu1  ;;  %5443 = vmatprep.subr.bf16.mxu1 %v5970_v57  ;;  %v1481_v37 = vadd.f32 %v6723_v55, %v1480_v17 }
 0x29b   :  { %v1482_v45 = vpop.f32.mrf.mxu0 }
 0x29c   :  { %v2205_v50 = vpop.f32.mrf.mxu1  ;;  %5404 = vmatmul.mubr.msk.bf16.gmra.mxu1 %vm1832_vm1, %v6835_v5  ;;  %v1749_v35 = vmax.f32 %v1481_v37, 0.0  ;;  %v1727_v37 = vmax.f32 %v1393_v52, 0.0  ;;  %v5853_v52 = vld [vmem:[%s7964_s3 + $0xa8] sm:$0xff]  }
 0x29d   :  { %v7086_v40 = vadd.f32 %v2205_v50, %v7009_v36  ;;  %5407 = vmatprep.mubr.msk.bf16.mxu1 %vm5971_vm0, %v5970_v57  ;;  %v1483_v4 = vpop.f32.mrf.mxu0 }
 0x29e   :  { %v5289_v47 = vpop.f32.mrf.mxu1  ;;  %v7090_v63 = vpack.c.bf16 %v1749_v35, %v1748_v28  ;;  %v1484_v56 = vadd.f32 %v6723_v55, %v1483_v4 }
 0x29f   :  { %v1485_v58 = vpop.f32.mrf.mxu0 }
 0x2a0   :  { %v2208_v9 = vpop.f32.mrf.mxu1  ;;  %v1750_v6 = vmax.f32 %v1484_v56, 0.0  ;;  %v2703_v56 = vpack.c.bf16 %v1727_v37, %v1727_v37 }
 0x2a1   :  { %v7094_v20 = vadd.f32 %v2208_v9, %v7019_v44  ;;  %v1488_v13 = vpop.f32.mrf.mxu0 }
 0x2a2   :  { %v5290_v5 = vpop.f32.mrf.mxu1  ;;  %v1489_v36 = vadd.f32 %v6723_v55, %v1488_v13 }
 0x2a3   :  { %v1490_v29 = vpop.f32.mrf.mxu0 }
 0x2a4   :  { %v2213_v3 = vpop.f32.mrf.mxu1  ;;  %5408 = vmatmul.mubr.msk.bf16.gmra.mxu1 %vm1832_vm1, %v6851_v46  ;;  %v1751_v15 = vmax.f32 %v1489_v36, 0.0 }
 0x2a5   :  { %v7100_v22 = vadd.f32 %v2213_v3, %v7025_v51  ;;  %5411 = vmatprep.mubr.msk.bf16.mxu1 %vm5971_vm0, %v5970_v57  ;;  %v1491_v42 = vpop.f32.mrf.mxu0 }
 0x2a6   :  { %v5293_v44 = vpop.f32.mrf.mxu1  ;;  %v7104_v39 = vpack.c.bf16 %v1751_v15, %v1750_v6  ;;  %v1492_v48 = vadd.f32 %v6723_v55, %v1491_v42 }
 0x2a7   :  { %v1493_v21 = vpop.f32.mrf.mxu0 }
 0x2a8   :  { %v2216_v30 = vpop.f32.mrf.mxu1  ;;  %v1752_v17 = vmax.f32 %v1492_v48, 0.0 }
 0x2a9   :  { %v7110_v46 = vadd.f32 %v2216_v30, %v7032_v12  ;;  %v1496_v33 = vpop.f32.mrf.mxu0 }
 0x2aa   :  { %v5294_v51 = vpop.f32.mrf.mxu1  ;;  %v1497_v27 = vadd.f32 %v6723_v55, %v1496_v33 }
 0x2ab   :  { %v1498_v28 = vpop.f32.mrf.mxu0 }
 0x2ac   :  { %v2221_v45 = vpop.f32.mrf.mxu1  ;;  %5412 = vmatmul.mubr.msk.bf16.gmra.mxu1 %vm1832_vm1, %v6875_v11  ;;  %v1753_v50 = vmax.f32 %v1497_v27, 0.0 }
 0x2ad   :  { %v7116_v35 = vadd.f32 %v2221_v45, %v7039_v49  ;;  %5415 = vmatprep.mubr.msk.bf16.mxu1 %vm5971_vm0, %v5970_v57  ;;  %v7120_v53 = vpop.f32.mrf.mxu0 }
 0x2ae   :  { %v5297_v12 = vpop.f32.mrf.mxu1  ;;  %v7122_v4 = vpack.c.bf16 %v1753_v50, %v1752_v17 }
 0x2af   :  { %v1501_v47 = vpop.f32.mrf.mxu0 }
 0x2b0   :  { %v2224_v58 = vpop.f32.mrf.mxu1 }
 0x2b1   :  { %v1504_v9 = vpop.f32.mrf.mxu0 }
 0x2b2   :  { %v5298_v13 = vpop.f32.mrf.mxu1  ;;  %v1505_v5 = vadd.f32 %v6723_v55, %v1504_v9 }
 0x2b3   :  { %v1506_v11 = vpop.f32.mrf.mxu0 }
 0x2b4   :  { %v2298_v6 = vpop.f32.mrf.mxu1  ;;  %5416 = vmatmul.mubr.msk.bf16.gmra.mxu1 %vm1832_vm1, %v2703_v56  ;;  %v1755_v3 = vmax.f32 %v1505_v5, 0.0 }
 0x2b5   :  { %v7127_v49 = vadd.f32 %v2298_v6, %v6856_v14  ;;  %5423 = vmatprep.mubr.msk.bf16.mxu1 %vm5971_vm0, %v5970_v57  ;;  %v1507_v36 = vpop.f32.mrf.mxu0 }
 0x2b6   :  { %v5305_v29 = vpop.f32.mrf.mxu1  ;;  %v1508_v15 = vadd.f32 %v6723_v55, %v1507_v36 }
 0x2b7   :  { %v1509_v42 = vpop.f32.mrf.mxu0 }
 0x2b8   :  { %v2301_v44 = vpop.f32.mrf.mxu1  ;;  %v1756_v48 = vmax.f32 %v1508_v15, 0.0 }
 0x2b9   :  { %v7133_v21 = vadd.f32 %v2301_v44, %v6868_v41  ;;  %v1512_v14 = vpop.f32.mrf.mxu0  ;;  %v5860_v41 = vld [vmem:[%s7964_s3 + $0xa0] sm:$0xff]  }
 0x2ba   :  { %v5306_v30 = vpop.f32.mrf.mxu1  ;;  %v7138_v33 = vpack.c.bf16 %v1756_v48, %v1755_v3  ;;  %v1513_v51 = vadd.f32 %v6723_v55, %v1512_v14 }
 0x2bb   :  { %v1514_v17 = vpop.f32.mrf.mxu0 }
 0x2bc   :  { %v2306_v27 = vpop.f32.mrf.mxu1  ;;  %5424 = vmatmul.mubr.msk.bf16.vlgmr.msra.gmra.mxu1 %vm1832_vm1, %v6910_v43  ;;  %v1757_v50 = vmax.f32 %v1513_v51, 0.0 }
 0x2bd   :  { %v7144_v28 = vadd.f32 %v2306_v27, %v6880_v62  ;;  %5444 = vmatpush3.bf16.msra.mxu1 %v5853_v52  ;;  %5427 = vmatprep.mubr.msk.bf16.mxu1 %vm5971_vm0, %v5970_v57  ;;  %v1515_v37 = vpop.f32.mrf.mxu0 }
 0x2be   :  { %v5309_v45 = vpop.f32.mrf.mxu1  ;;  %5445 = vmatprep.subr.bf16.mxu1 %v5970_v57  ;;  %v1516_v12 = vadd.f32 %v6723_v55, %v1515_v37 }
 0x2bf   :  { %v1517_v47 = vpop.f32.mrf.mxu0 }
 0x2c0   :  { %v2309_v43 = vpop.f32.mrf.mxu1  ;;  %v1758_v56 = vmax.f32 %v1516_v12, 0.0 }
 0x2c1   :  { %v7154_v62 = vadd.f32 %v2309_v43, %v6896_v25  ;;  %5446 = vmatpush3.bf16.msra.mxu1 %v5860_v41  ;;  %v1520_v58 = vpop.f32.mrf.mxu0 }
 0x2c2   :  { %v5310_v9 = vpop.f32.mrf.mxu1  ;;  %5467 = vmatprep.subr.bf16.mxu1 %v5970_v57  ;;  %v7157_v13 = vpack.c.bf16 %v1758_v56, %v1757_v50  ;;  %v1521_v5 = vadd.f32 %v6723_v55, %v1520_v58 }
 0x2c3   :  { %v1522_v11 = vpop.f32.mrf.mxu0 }
 0x2c4   :  { %v2314_v6 = vpop.f32.mrf.mxu1  ;;  %5428 = vmatmul.mubr.msk.bf16.gmra.mxu1 %vm1832_vm1, %v6936_v7  ;;  %v1759_v3 = vmax.f32 %v1521_v5, 0.0 }
 0x2c5   :  { %v7163_v36 = vadd.f32 %v2314_v6, %v6903_v38  ;;  %5431 = vmatprep.mubr.msk.bf16.mxu1 %vm5971_vm0, %v5970_v57  ;;  %v1523_v25 = vpop.f32.mrf.mxu0 }
 0x2c6   :  { %v5313_v29 = vpop.f32.mrf.mxu1  ;;  %v1524_v15 = vadd.f32 %v6723_v55, %v1523_v25 }
 0x2c7   :  { %v1525_v42 = vpop.f32.mrf.mxu0 }
 0x2c8   :  { %v2317_v44 = vpop.f32.mrf.mxu1  ;;  %v1760_v48 = vmax.f32 %v1524_v15, 0.0 }
 0x2c9   :  { %v7169_v52 = vadd.f32 %v2317_v44, %v6914_v1  ;;  %v1528_v14 = vpop.f32.mrf.mxu0 }
 0x2ca   :  { %v5314_v30 = vpop.f32.mrf.mxu1  ;;  %v7171_v7 = vpack.c.bf16 %v1760_v48, %v1759_v3  ;;  %v1529_v38 = vadd.f32 %v6723_v55, %v1528_v14 }
 0x2cb   :  { %v1530_v51 = vpop.f32.mrf.mxu0 }
 0x2cc   :  { %v2322_v17 = vpop.f32.mrf.mxu1  ;;  %5432 = vmatmul.mubr.msk.bf16.gmra.mxu1 %vm1832_vm1, %v6958_v10  ;;  %v1761_v37 = vmax.f32 %v1529_v38, 0.0 }
 0x2cd   :  { %v7177_v27 = vadd.f32 %v2322_v17, %v6929_v61  ;;  %5435 = vmatprep.mubr.msk.bf16.mxu1 %vm5971_vm0, %v5970_v57  ;;  %v1531_v41 = vpop.f32.mrf.mxu0  ;;  %v1428_v61 = vadd.f32 %v6723_v55, %v6970_v54 }
 0x2ce   :  { %v5317_v1 = vpop.f32.mrf.mxu1  ;;  %v1532_v45 = vadd.f32 %v6723_v55, %v1531_v41  ;;  %v7201_v55 = vld [vmem:[%s7965_s2] ss:$0 sm:$0xff] }
 0x2cf   :  { %v1533_v50 = vpop.f32.mrf.mxu0  ;;  %v1736_v6 = vmax.f32 %v1428_v61, 0.0 }
 0x2d0   :  { %v2325_v12 = vpop.f32.mrf.mxu1  ;;  %v1762_v47 = vmax.f32 %v1532_v45, 0.0 }
 0x2d1   :  { %v7183_v43 = vadd.f32 %v2325_v12, %v6942_v23  ;;  %v7185_v56 = vpop.f32.mrf.mxu0  ;;  %v5873_v12 = vld [vmem:[%s7964_s3 + $0xb8] sm:$0xff]  }
 0x2d2   :  { %v5318_v10 = vpop.f32.mrf.mxu1  ;;  %v7189_v58 = vpack.c.bf16 %v1762_v47, %v1761_v37 }
 0x2d3   :  { %v1538_v9 = vpop.f32.mrf.mxu0 }
 0x2d4   :  { %v2330_v5 = vpop.f32.mrf.mxu1  ;;  %5436 = vmatmul.mubr.msk.bf16.gmra.mxu1 %vm1832_vm1, %v6975_v60  ;;  %v2821_v60 = vpack.c.bf16 %v1736_v6, %v1736_v6  ;;  %v5886_v9 = vld [vmem:[%s7966_s5 + $0x28] ss:$20 sps:$4 sm:$0xff]  }
 0x2d5   :  { %v7194_v11 = vadd.f32 %v2330_v5, %v6951_v16  ;;  %5439 = vmatprep.mubr.msk.bf16.mxu1 %vm5971_vm0, %v5970_v57  ;;  %v1539_v23 = vpop.f32.mrf.mxu0  ;;  %v5888_v5 = vld [vmem:[%s7966_s5 + $0x2c] ss:$20 sps:$4 sm:$0xff]  }
 0x2d6   :  { %v5321_v25 = vpop.f32.mrf.mxu1  ;;  %v1540_v54 = vadd.f32 %v7201_v55, %v1539_v23  ;;  %3838 = vmatprep.subr.bf16.mxu0 %v5888_v5 }
 0x2d7   :  { %v1541_v29 = vpop.f32.mrf.mxu0  ;;  %3839 = vmatpush1.bf16.msra.mxu0 %v5886_v9 }
 0x2d8   :  { %v2333_v3 = vpop.f32.mrf.mxu1  ;;  %v1764_v16 = vmax.f32 %v1540_v54, 0.0  ;;  %v5880_v54 = vld [vmem:[%s7964_s3 + $0xb0] sm:$0xff]  }
 0x2d9   :  { %v1544_v15 = vpop.f32.mrf.mxu0 }
 0x2da   :  { %v5322_v42 = vpop.f32.mrf.mxu1  ;;  %v1545_v44 = vadd.f32 %v7201_v55, %v1544_v15 }
 0x2db   :  { %v1546_v48 = vpop.f32.mrf.mxu0 }
 0x2dc   :  { %v2416_v14 = vpop.f32.mrf.mxu1  ;;  %5440 = vmatmul.mubr.msk.bf16.gmra.mxu1 %vm1832_vm1, %v2821_v60  ;;  %v1765_v30 = vmax.f32 %v1545_v44, 0.0 }
 0x2dd   :  { %v7207_v38 = vadd.f32 %v2416_v14, %v7052_v8  ;;  %5447 = vmatprep.mubr.msk.bf16.mxu1 %vm5971_vm0, %v5970_v57  ;;  %v1547_v51 = vpop.f32.mrf.mxu0 }
 0x2de   :  { %v5329_v17 = vpop.f32.mrf.mxu1  ;;  %v7211_v41 = vpack.c.bf16 %v1765_v30, %v1764_v16  ;;  %v1548_v1 = vadd.f32 %v7201_v55, %v1547_v51 }
 0x2df   :  { %v1549_v37 = vpop.f32.mrf.mxu0 }
 0x2e0   :  { %v2419_v45 = vpop.f32.mrf.mxu1  ;;  %v1766_v61 = vmax.f32 %v1548_v1, 0.0 }
 0x2e1   :  { %v7215_v50 = vadd.f32 %v2419_v45, %v7058_v59  ;;  %v1552_v8 = vpop.f32.mrf.mxu0 }
 0x2e2   :  { %v5330_v47 = vpop.f32.mrf.mxu1  ;;  %v1553_v10 = vadd.f32 %v7201_v55, %v1552_v8 }
 0x2e3   :  { %v1554_v23 = vpop.f32.mrf.mxu0 }
 0x2e4   :  { %v2424_v59 = vpop.f32.mrf.mxu1  ;;  %5448 = vmatmul.mubr.msk.bf16.vlgmr.msra.gmra.mxu1 %vm1832_vm1, %v7003_v32  ;;  %v1767_v6 = vmax.f32 %v1553_v10, 0.0 }
 0x2e5   :  { %v7230_v25 = vadd.f32 %v2424_v59, %v7067_v18  ;;  %5468 = vmatpush3.bf16.msra.mxu1 %v5873_v12  ;;  %5451 = vmatprep.mubr.msk.bf16.mxu1 %vm5971_vm0, %v5970_v57  ;;  %v1555_v29 = vpop.f32.mrf.mxu0 }
 0x2e6   :  { %v5333_v3 = vpop.f32.mrf.mxu1  ;;  %5469 = vmatprep.subr.bf16.mxu1 %v5970_v57  ;;  %v7238_v15 = vpack.c.bf16 %v1767_v6, %v1766_v61  ;;  %v1556_v32 = vadd.f32 %v7201_v55, %v1555_v29 }
 0x2e7   :  { %v1557_v60 = vpop.f32.mrf.mxu0 }
 0x2e8   :  { %v2427_v18 = vpop.f32.mrf.mxu1  ;;  %v1768_v48 = vmax.f32 %v1556_v32, 0.0  ;;  %v1465_v32 = vadd.f32 %v7201_v55, %v7046_v34 }
 0x2e9   :  { %v7242_v42 = vadd.f32 %v2427_v18, %v7079_v2  ;;  %5470 = vmatpush3.bf16.msra.mxu1 %v5880_v54  ;;  %v1560_v16 = vpop.f32.mrf.mxu0 }
 0x2ea   :  { %v5334_v44 = vpop.f32.mrf.mxu1  ;;  %5491 = vmatprep.subr.bf16.mxu1 %v5970_v57  ;;  %v1561_v14 = vadd.f32 %v7201_v55, %v1560_v16 }
 0x2eb   :  { %v1562_v30 = vpop.f32.mrf.mxu0 }
 0x2ec   :  { %v2432_v51 = vpop.f32.mrf.mxu1  ;;  %5452 = vmatmul.mubr.msk.bf16.gmra.mxu1 %vm1832_vm1, %v7021_v31  ;;  %v1769_v17 = vmax.f32 %v1561_v14, 0.0 }
 0x2ed   :  { %v7249_v1 = vadd.f32 %v2432_v51, %v7086_v40  ;;  %5455 = vmatprep.mubr.msk.bf16.mxu1 %vm5971_vm0, %v5970_v57  ;;  %v1563_v2 = vpop.f32.mrf.mxu0 }
 0x2ee   :  { %v5337_v37 = vpop.f32.mrf.mxu1  ;;  %v7253_v45 = vpack.c.bf16 %v1769_v17, %v1768_v48  ;;  %v1564_v12 = vadd.f32 %v7201_v55, %v1563_v2  ;;  %v1745_v48 = vmax.f32 %v1465_v32, 0.0 }
 0x2ef   :  { %v1565_v8 = vpop.f32.mrf.mxu0 }
 0x2f0   :  { %v2435_v47 = vpop.f32.mrf.mxu1  ;;  %v1770_v9 = vmax.f32 %v1564_v12, 0.0  ;;  %v2939_v37 = vpack.c.bf16 %v1745_v48, %v1745_v48 }
 0x2f1   :  { %v7257_v61 = vadd.f32 %v2435_v47, %v7094_v20  ;;  %v1568_v10 = vpop.f32.mrf.mxu0 }
 0x2f2   :  { %v5338_v31 = vpop.f32.mrf.mxu1  ;;  %v1569_v40 = vadd.f32 %v7201_v55, %v1568_v10 }
 0x2f3   :  { %v1570_v5 = vpop.f32.mrf.mxu0 }
 0x2f4   :  { %v2440_v23 = vpop.f32.mrf.mxu1  ;;  %5456 = vmatmul.mubr.msk.bf16.gmra.mxu1 %vm1832_vm1, %v7036_v19  ;;  %v1771_v59 = vmax.f32 %v1569_v40, 0.0 }
 0x2f5   :  { %v7263_v6 = vadd.f32 %v2440_v23, %v7100_v22  ;;  %5459 = vmatprep.mubr.msk.bf16.mxu1 %vm5971_vm0, %v5970_v57  ;;  %v7267_v54 = vpop.f32.mrf.mxu0 }
 0x2f6   :  { %v5341_v20 = vpop.f32.mrf.mxu1  ;;  %v7269_v29 = vpack.c.bf16 %v1771_v59, %v1770_v9 }
 0x2f7   :  { %v1573_v3 = vpop.f32.mrf.mxu0 }
 0x2f8   :  { %v2443_v60 = vpop.f32.mrf.mxu1 }
 0x2f9   :  { %v7274_v18 = vadd.f32 %v2443_v60, %v7110_v46  ;;  %v1576_v19 = vpop.f32.mrf.mxu0 }
 0x2fa   :  { %v5342_v16 = vpop.f32.mrf.mxu1  ;;  %v1577_v22 = vadd.f32 %v7201_v55, %v1576_v19 }
 0x2fb   :  { %v1578_v44 = vpop.f32.mrf.mxu0  ;;  %v5881_v16 = vld [vmem:[%s7964_s3 + $0xc8] sm:$0xff]  }
 0x2fc   :  { %v2448_v14 = vpop.f32.mrf.mxu1  ;;  %5460 = vmatmul.mubr.msk.bf16.gmra.mxu1 %vm1832_vm1, %v7048_v26  ;;  %v1773_v46 = vmax.f32 %v1577_v22, 0.0 }
 0x2fd   :  { %v7280_v30 = vadd.f32 %v2448_v14, %v7116_v35  ;;  %5463 = vmatprep.mubr.msk.bf16.mxu1 %vm5971_vm0, %v5970_v57  ;;  %v1579_v34 = vpop.f32.mrf.mxu0 }
 0x2fe   :  { %v5345_v51 = vpop.f32.mrf.mxu1  ;;  %v1580_v17 = vadd.f32 %v7201_v55, %v1579_v34 }
 0x2ff   :  { %v1581_v2 = vpop.f32.mrf.mxu0 }
 0x300   :  { %v2451_v12 = vpop.f32.mrf.mxu1  ;;  %v1774_v8 = vmax.f32 %v1580_v17, 0.0 }
 0x301   :  { %v1584_v47 = vpop.f32.mrf.mxu0 }
 0x302   :  { %v5346_v10 = vpop.f32.mrf.mxu1  ;;  %v7285_v31 = vpack.c.bf16 %v1774_v8, %v1773_v46  ;;  %v1585_v26 = vadd.f32 %v7201_v55, %v1584_v47 }
 0x303   :  { %v1586_v35 = vpop.f32.mrf.mxu0 }
 0x304   :  { %v2534_v9 = vpop.f32.mrf.mxu1  ;;  %5464 = vmatmul.mubr.msk.bf16.gmra.mxu1 %vm1832_vm1, %v2939_v37  ;;  %v1775_v59 = vmax.f32 %v1585_v26, 0.0 }
 0x305   :  { %v7290_v40 = vadd.f32 %v2534_v9, %v7127_v49  ;;  %5471 = vmatprep.mubr.msk.bf16.mxu1 %vm5971_vm0, %v5970_v57  ;;  %v1587_v5 = vpop.f32.mrf.mxu0 }
 0x306   :  { %v5353_v23 = vpop.f32.mrf.mxu1  ;;  %v1588_v20 = vadd.f32 %v7201_v55, %v1587_v5 }
 0x307   :  { %v1589_v3 = vpop.f32.mrf.mxu0 }
 0x308   :  { %v2537_v32 = vpop.f32.mrf.mxu1  ;;  %v1776_v60 = vmax.f32 %v1588_v20, 0.0 }
 0x309   :  { %v7296_v19 = vadd.f32 %v2537_v32, %v7133_v21  ;;  %v1592_v49 = vpop.f32.mrf.mxu0  ;;  %v5882_v21 = vld [vmem:[%s7964_s3 + $0xc0] sm:$0xff]  }
 0x30a   :  { %v5354_v22 = vpop.f32.mrf.mxu1  ;;  %v7301_v44 = vpack.c.bf16 %v1776_v60, %v1775_v59  ;;  %v1593_v48 = vadd.f32 %v7201_v55, %v1592_v49 }
 0x30b   :  { %v1594_v14 = vpop.f32.mrf.mxu0 }
 0x30c   :  { %v2542_v34 = vpop.f32.mrf.mxu1  ;;  %5472 = vmatmul.mubr.msk.bf16.vlgmr.msra.gmra.mxu1 %vm1832_vm1, %v7075_v24  ;;  %v1777_v2 = vmax.f32 %v1593_v48, 0.0 }
 0x30d   :  { %v7307_v51 = vadd.f32 %v2542_v34, %v7144_v28  ;;  %5492 = vmatpush3.bf16.msra.mxu1 %v5881_v16  ;;  %5475 = vmatprep.mubr.msk.bf16.mxu1 %vm5971_vm0, %v5970_v57  ;;  %v1595_v46 = vpop.f32.mrf.mxu0 }
 0x30e   :  { %v5357_v17 = vpop.f32.mrf.mxu1  ;;  %5493 = vmatprep.subr.bf16.mxu1 %v5970_v57  ;;  %v1596_v37 = vadd.f32 %v7201_v55, %v1595_v46 }
 0x30f   :  { %v1597_v12 = vpop.f32.mrf.mxu0 }
 0x310   :  { %v2545_v24 = vpop.f32.mrf.mxu1  ;;  %v1778_v8 = vmax.f32 %v1596_v37, 0.0 }
 0x311   :  { %v7317_v28 = vadd.f32 %v2545_v24, %v7154_v62  ;;  %5494 = vmatpush3.bf16.msra.mxu1 %v5882_v21  ;;  %v1600_v47 = vpop.f32.mrf.mxu0  ;;  %v1500_v24 = vadd.f32 %v7201_v55, %v7120_v53 }
 0x312   :  { %v5358_v10 = vpop.f32.mrf.mxu1  ;;  %5515 = vmatprep.subr.bf16.mxu1 %v5970_v57  ;;  %v7320_v26 = vpack.c.bf16 %v1778_v8, %v1777_v2  ;;  %v1601_v35 = vadd.f32 %v7201_v55, %v1600_v47 }
 0x313   :  { %v1602_v9 = vpop.f32.mrf.mxu0 }
 0x314   :  { %v2550_v5 = vpop.f32.mrf.mxu1  ;;  %5476 = vmatmul.mubr.msk.bf16.gmra.mxu1 %vm1832_vm1, %v7090_v63  ;;  %v1779_v20 = vmax.f32 %v1601_v35, 0.0 }
 0x315   :  { %v7326_v23 = vadd.f32 %v2550_v5, %v7163_v36  ;;  %5479 = vmatprep.mubr.msk.bf16.mxu1 %vm5971_vm0, %v5970_v57  ;;  %v1603_v62 = vpop.f32.mrf.mxu0  ;;  %v1754_v5 = vmax.f32 %v1500_v24, 0.0 }
 0x316   :  { %v5361_v59 = vpop.f32.mrf.mxu1  ;;  %v1604_v3 = vadd.f32 %v7201_v55, %v1603_v62 }
 0x317   :  { %v1605_v32 = vpop.f32.mrf.mxu0 }
 0x318   :  { %v2553_v60 = vpop.f32.mrf.mxu1  ;;  %v1780_v16 = vmax.f32 %v1604_v3, 0.0 }
 0x319   :  { %v7332_v49 = vadd.f32 %v2553_v60, %v7169_v52  ;;  %v7334_v22 = vpop.f32.mrf.mxu0  ;;  %v3057_v60 = vpack.c.bf16 %v1754_v5, %v1754_v5 }
 0x31a   :  { %v5362_v63 = vpop.f32.mrf.mxu1  ;;  %v7336_v48 = vpack.c.bf16 %v1780_v16, %v1779_v20 }
 0x31b   :  { %v1610_v36 = vpop.f32.mrf.mxu0 }
 0x31c   :  { %v2558_v14 = vpop.f32.mrf.mxu1  ;;  %5480 = vmatmul.mubr.msk.bf16.gmra.mxu1 %vm1832_vm1, %v7104_v39 }
 0x31d   :  { %v7341_v34 = vadd.f32 %v2558_v14, %v7177_v27  ;;  %5483 = vmatprep.mubr.msk.bf16.mxu1 %vm5971_vm0, %v5970_v57  ;;  %v1611_v21 = vpop.f32.mrf.mxu0 }
 0x31e   :  { %v5365_v46 = vpop.f32.mrf.mxu1  ;;  %v1612_v52 = vadd.f32 %v7201_v55, %v1611_v21 }
 0x31f   :  { %v1613_v17 = vpop.f32.mrf.mxu0 }
 0x320   :  { %v2561_v2 = vpop.f32.mrf.mxu1  ;;  %v1782_v8 = vmax.f32 %v1612_v52, 0.0 }
 0x321   :  { %v7347_v37 = vadd.f32 %v2561_v2, %v7183_v43  ;;  %v1616_v12 = vpop.f32.mrf.mxu0 }
 0x322   :  { %v5366_v39 = vpop.f32.mrf.mxu1  ;;  %v1617_v27 = vadd.f32 %v7201_v55, %v1616_v12 }
 0x323   :  { %v1618_v47 = vpop.f32.mrf.mxu0 }
 0x324   :  { %v2566_v10 = vpop.f32.mrf.mxu1  ;;  %5484 = vmatmul.mubr.msk.bf16.gmra.mxu1 %vm1832_vm1, %v7122_v4  ;;  %v1783_v35 = vmax.f32 %v1617_v27, 0.0 }
 0x325   :  { %v7355_v9 = vadd.f32 %v2566_v10, %v7194_v11  ;;  %5487 = vmatprep.mubr.msk.bf16.mxu1 %vm5971_vm0, %v5970_v57  ;;  %v1619_v43 = vpop.f32.mrf.mxu0 }
 0x326   :  { %v5369_v62 = vpop.f32.mrf.mxu1  ;;  %v7359_v53 = vpack.c.bf16 %v1783_v35, %v1782_v8  ;;  %v1620_v59 = vadd.f32 %v7201_v55, %v1619_v43  ;;  %v5883_v8 = vld [vmem:[%s7964_s3 + $0xd8] sm:$0xff]  }
 0x327   :  { %v1621_v20 = vpop.f32.mrf.mxu0 }
 0x328   :  { %v2569_v3 = vpop.f32.mrf.mxu1  ;;  %v1784_v4 = vmax.f32 %v1620_v59, 0.0 }
 0x329   :  { %v1624_v32 = vpop.f32.mrf.mxu0 }
 0x32a   :  { %v5370_v16 = vpop.f32.mrf.mxu1  ;;  %v1625_v63 = vadd.f32 %v7201_v55, %v1624_v32 }
 0x32b   :  { %v1626_v11 = vpop.f32.mrf.mxu0 }
 0x32c   :  { %v2652_v36 = vpop.f32.mrf.mxu1  ;;  %5488 = vmatmul.mubr.msk.bf16.gmra.mxu1 %vm1832_vm1, %v3057_v60  ;;  %v1785_v14 = vmax.f32 %v1625_v63, 0.0 }
 0x32d   :  { %v7365_v21 = vadd.f32 %v2652_v36, %v7207_v38  ;;  %5495 = vmatprep.mubr.msk.bf16.mxu1 %vm5971_vm0, %v5970_v57  ;;  %v1627_v46 = vpop.f32.mrf.mxu0 }
 0x32e   :  { %v5377_v52 = vpop.f32.mrf.mxu1  ;;  %v7369_v17 = vpack.c.bf16 %v1785_v14, %v1784_v4  ;;  %v1628_v2 = vadd.f32 %v7201_v55, %v1627_v46 }
 0x32f   :  { %v1629_v12 = vpop.f32.mrf.mxu0 }
 0x330   :  { %v2655_v24 = vpop.f32.mrf.mxu1  ;;  %v1786_v47 = vmax.f32 %v1628_v2, 0.0 }
 0x331   :  { %v7373_v39 = vadd.f32 %v2655_v24, %v7215_v50  ;;  %v1632_v38 = vpop.f32.mrf.mxu0  ;;  %v5884_v50 = vld [vmem:[%s7964_s3 + $0xd0] sm:$0xff]  }
 0x332   :  { %v5378_v27 = vpop.f32.mrf.mxu1  ;;  %v1633_v10 = vadd.f32 %v7201_v55, %v1632_v38 }
 0x333   :  { %v1634_v35 = vpop.f32.mrf.mxu0 }
 0x334   :  { %v2660_v43 = vpop.f32.mrf.mxu1  ;;  %5496 = vmatmul.mubr.msk.bf16.vlgmr.msra.gmra.mxu1 %vm1832_vm1, %v7138_v33  ;;  %v1787_v5 = vmax.f32 %v1633_v10, 0.0  ;;  %v1537_v10 = vadd.f32 %v7201_v55, %v7185_v56 }
 0x335   :  { %v7382_v62 = vadd.f32 %v2660_v43, %v7230_v25  ;;  %5516 = vmatpush3.bf16.msra.mxu1 %v5883_v8  ;;  %5499 = vmatprep.mubr.msk.bf16.mxu1 %vm5971_vm0, %v5970_v57  ;;  %v1635_v59 = vpop.f32.mrf.mxu0 }
 0x336   :  { %v5381_v20 = vpop.f32.mrf.mxu1  ;;  %5517 = vmatprep.subr.bf16.mxu1 %v5970_v57  ;;  %v7390_v3 = vpack.c.bf16 %v1787_v5, %v1786_v47  ;;  %v1636_v33 = vadd.f32 %v7201_v55, %v1635_v59  ;;  %v1763_v5 = vmax.f32 %v1537_v10, 0.0  ;;  %v5892_v10 = vld [vmem:[%s7966_s5] ss:$20 sps:$4 sm:$0xff]  }
 0x337   :  { %v1637_v32 = vpop.f32.mrf.mxu0 }
 0x338   :  { %v2663_v60 = vpop.f32.mrf.mxu1  ;;  %v1788_v63 = vmax.f32 %v1636_v33, 0.0  ;;  %v3175_v59 = vpack.c.bf16 %v1763_v5, %v1763_v5 }
 0x339   :  { %v7394_v25 = vadd.f32 %v2663_v60, %v7242_v42  ;;  %5518 = vmatpush3.bf16.msra.mxu1 %v5884_v50  ;;  %v1640_v16 = vpop.f32.mrf.mxu0  ;;  %v5885_v60 = vld [vmem:[%s7964_s3 + $0xe8] sm:$0xff]  }
 0x33a   :  { %v5382_v4 = vpop.f32.mrf.mxu1  ;;  %5539 = vmatprep.subr.bf16.mxu1 %v5970_v57  ;;  %v1641_v11 = vadd.f32 %v7201_v55, %v1640_v16 }
 0x33b   :  { %v1642_v36 = vpop.f32.mrf.mxu0 }
 0x33c   :  { %v2668_v14 = vpop.f32.mrf.mxu1  ;;  %5500 = vmatmul.mubr.msk.bf16.gmra.mxu1 %vm1832_vm1, %v7157_v13  ;;  %v1789_v46 = vmax.f32 %v1641_v11, 0.0 }
 0x33d   :  { %v7401_v52 = vadd.f32 %v2668_v14, %v7249_v1  ;;  %5503 = vmatprep.mubr.msk.bf16.mxu1 %vm5971_vm0, %v5970_v57  ;;  %v7405_v42 = vpop.f32.mrf.mxu0 }
 0x33e   :  { %v5385_v2 = vpop.f32.mrf.mxu1  ;;  %v7407_v12 = vpack.c.bf16 %v1789_v46, %v1788_v63 }
 0x33f   :  { %v1645_v24 = vpop.f32.mrf.mxu0 }
 0x340   :  { %v2671_v8 = vpop.f32.mrf.mxu1 }
 0x341   :  { %v7410_v38 = vadd.f32 %v2671_v8, %v7257_v61 }
 0x342   :  { %v5386_v27 = vpop.f32.mrf.mxu1 }
 0x344   :  { %v2676_v47 = vpop.f32.mrf.mxu1  ;;  %5504 = vmatmul.mubr.msk.bf16.gmra.mxu1 %vm1832_vm1, %v7171_v7 }
 0x345   :  { %v7415_v13 = vadd.f32 %v2676_v47, %v7263_v6  ;;  %5507 = vmatprep.mubr.msk.bf16.mxu1 %vm5971_vm0, %v5970_v57 }
 0x346   :  { %v5389_v1 = vpop.f32.mrf.mxu1 }
 0x348   :  { %v2679_v35 = vpop.f32.mrf.mxu1 }
 0x349   :  { %v7422_v43 = vadd.f32 %v2679_v35, %v7274_v18 }
 0x34a   :  { %v5390_v61 = vpop.f32.mrf.mxu1 }
 0x34c   :  { %v2684_v50 = vpop.f32.mrf.mxu1  ;;  %5508 = vmatmul.mubr.msk.bf16.gmra.mxu1 %vm1832_vm1, %v7189_v58 }
 0x34d   :  { %v7427_v7 = vadd.f32 %v2684_v50, %v7280_v30  ;;  %5511 = vmatprep.mubr.msk.bf16.mxu1 %vm5971_vm0, %v5970_v57 }
 0x34e   :  { %v5393_v6 = vpop.f32.mrf.mxu1 }
 0x350   :  { %v2687_v20 = vpop.f32.mrf.mxu1 }
 0x352   :  { %v5394_v56 = vpop.f32.mrf.mxu1 }
 0x353   :  { %v5890_v56 = vld [vmem:[%s7964_s3 + $0xf8] sm:$0xff]  }
 0x354   :  { %v2770_v33 = vpop.f32.mrf.mxu1  ;;  %5512 = vmatmul.mubr.msk.bf16.gmra.mxu1 %vm1832_vm1, %v3175_v59 }
 0x355   :  { %v7433_v18 = vadd.f32 %v2770_v33, %v7290_v40  ;;  %5519 = vmatprep.mubr.msk.bf16.mxu1 %vm5971_vm0, %v5970_v57 }
 0x356   :  { %v5401_v58 = vpop.f32.mrf.mxu1 }
 0x358   :  { %v2773_v32 = vpop.f32.mrf.mxu1 }
 0x359   :  { %v7438_v30 = vadd.f32 %v2773_v32, %v7296_v19  ;;  %v5889_v19 = vld [vmem:[%s7964_s3 + $0xe0] sm:$0xff]  }
 0x35a   :  { %v5402_v16 = vpop.f32.mrf.mxu1 }
 0x35c   :  { %v2778_v4 = vpop.f32.mrf.mxu1  ;;  %5520 = vmatmul.mubr.msk.bf16.vlgmr.msra.gmra.mxu1 %vm1832_vm1, %v7211_v41 }
 0x35d   :  { %v7446_v40 = vadd.f32 %v2778_v4, %v7307_v51  ;;  %5540 = vmatpush3.bf16.msra.mxu1 %v5885_v60  ;;  %5523 = vmatprep.mubr.msk.bf16.mxu1 %vm5971_vm0, %v5970_v57 }
 0x35e   :  { %v5405_v63 = vpop.f32.mrf.mxu1  ;;  %5541 = vmatprep.subr.bf16.mxu1 %v5970_v57 }
 0x360   :  { %v2781_v11 = vpop.f32.mrf.mxu1 }
 0x361   :  { %v7455_v36 = vadd.f32 %v2781_v11, %v7317_v28  ;;  %5542 = vmatpush3.bf16.msra.mxu1 %v5889_v19 }
 0x362   :  { %v5406_v41 = vpop.f32.mrf.mxu1  ;;  %5563 = vmatprep.subr.bf16.mxu1 %v5970_v57 }
 0x364   :  { %v2786_v51 = vpop.f32.mrf.mxu1  ;;  %5524 = vmatmul.mubr.msk.bf16.gmra.mxu1 %vm1832_vm1, %v7238_v15 }
 0x365   :  { %v7461_v14 = vadd.f32 %v2786_v51, %v7326_v23  ;;  %5527 = vmatprep.mubr.msk.bf16.mxu1 %vm5971_vm0, %v5970_v57 }
 0x366   :  { %v5409_v46 = vpop.f32.mrf.mxu1 }
 0x368   :  { %v2789_v2 = vpop.f32.mrf.mxu1 }
 0x369   :  { %v7466_v24 = vadd.f32 %v2789_v2, %v7332_v49  ;;  %v1572_v49 = vadd.f32 %v7201_v55, %v7267_v54 }
 0x36a   :  { %v5410_v28 = vpop.f32.mrf.mxu1 }
 0x36b   :  { %v1772_v54 = vmax.f32 %v1572_v49, 0.0 }
 0x36c   :  { %v2794_v8 = vpop.f32.mrf.mxu1  ;;  %5528 = vmatmul.mubr.msk.bf16.gmra.mxu1 %vm1832_vm1, %v7253_v45  ;;  %v5894_v45 = vld [vmem:[%s7966_s5 + $0x4] ss:$20 sps:$4 sm:$0xff]  }
 0x36d   :  { %v7471_v27 = vadd.f32 %v2794_v8, %v7341_v34  ;;  %5531 = vmatprep.mubr.msk.bf16.mxu1 %vm5971_vm0, %v5970_v57  ;;  %3840 = vmatprep.subr.bf16.mxu0 %v5894_v45  ;;  %v3293_v5 = vpack.c.bf16 %v1772_v54, %v1772_v54 }
 0x36e   :  { %v5413_v15 = vpop.f32.mrf.mxu1  ;;  %3841 = vmatpush1.bf16.msra.mxu0 %v5892_v10 }
 0x36f   :  { %5587 = vmatprep.subr.bf16.mxu0 %v5970_v57 }
 0x370   :  { %v2797_v23 = vpop.f32.mrf.mxu1 }
 0x371   :  { %v7476_v47 = vadd.f32 %v2797_v23, %v7347_v37 }
 0x372   :  { %v5414_v1 = vpop.f32.mrf.mxu1 }
 0x374   :  { %v2802_v34 = vpop.f32.mrf.mxu1  ;;  %5532 = vmatmul.mubr.msk.bf16.gmra.mxu1 %vm1832_vm1, %v7269_v29 }
 0x375   :  { %v7489_v37 = vadd.f32 %v2802_v34, %v7355_v9  ;;  %5535 = vmatprep.mubr.msk.bf16.mxu1 %vm5971_vm0, %v5970_v57 }
 0x376   :  { %v5417_v35 = vpop.f32.mrf.mxu1 }
 0x378   :  { %v2805_v61 = vpop.f32.mrf.mxu1 }
 0x37a   :  { %v5418_v50 = vpop.f32.mrf.mxu1 }
 0x37c   :  { %v2888_v6 = vpop.f32.mrf.mxu1  ;;  %5536 = vmatmul.mubr.msk.bf16.gmra.mxu1 %vm1832_vm1, %v3293_v5 }
 0x37d   :  { %v7496_v29 = vadd.f32 %v2888_v6, %v7365_v21  ;;  %5543 = vmatprep.mubr.msk.bf16.mxu1 %vm5971_vm0, %v5970_v57 }
 0x37e   :  { %v5425_v9 = vpop.f32.mrf.mxu1 }
 0x380   :  { %v2891_v59 = vpop.f32.mrf.mxu1 }
 0x381   :  { %v7501_v20 = vadd.f32 %v2891_v59, %v7373_v39  ;;  %v5891_v39 = vld [vmem:[%s7964_s3 + $0xf0] sm:$0xff]  }
 0x382   :  { %v5426_v33 = vpop.f32.mrf.mxu1 }
 0x384   :  { %v2896_v58 = vpop.f32.mrf.mxu1  ;;  %5544 = vmatmul.mubr.msk.bf16.vlgmr.msra.gmra.mxu1 %vm1832_vm1, %v7285_v31 }
 0x385   :  { %v7509_v21 = vadd.f32 %v2896_v58, %v7382_v62  ;;  %5564 = vmatpush3.bf16.msra.mxu1 %v5890_v56  ;;  %5547 = vmatprep.mubr.msk.bf16.mxu1 %vm5971_vm0, %v5970_v57 }
 0x386   :  { %v5429_v32 = vpop.f32.mrf.mxu1  ;;  %5565 = vmatprep.subr.bf16.mxu1 %v5970_v57 }
 0x388   :  { %v2899_v60 = vpop.f32.mrf.mxu1 }
 0x389   :  { %v7518_v16 = vadd.f32 %v2899_v60, %v7394_v25  ;;  %5566 = vmatpush3.bf16.msra.mxu1 %v5891_v39 }
 0x38a   :  { %v5430_v31 = vpop.f32.mrf.mxu1 }
 0x38c   :  { %v2904_v4 = vpop.f32.mrf.mxu1  ;;  %5548 = vmatmul.mubr.msk.bf16.gmra.mxu1 %vm1832_vm1, %v7301_v44 }
 0x38d   :  { %v7523_v62 = vadd.f32 %v2904_v4, %v7401_v52  ;;  %5551 = vmatprep.mubr.msk.bf16.mxu1 %vm5971_vm0, %v5970_v57  ;;  %v1609_v52 = vadd.f32 %v7201_v55, %v7334_v22  ;;  %v5895_v4 = vld [vmem:[%s7966_s5 + $0x80] ss:$20 sps:$4 sm:$0xff]  }
 0x38e   :  { %v5433_v19 = vpop.f32.mrf.mxu1 }
 0x38f   :  { %v1781_v28 = vmax.f32 %v1609_v52, 0.0  ;;  %v5897_v19 = vld [vmem:[%s7966_s5 + $0x84] ss:$20 sps:$4 sm:$0xff]  }
 0x390   :  { %v2907_v63 = vpop.f32.mrf.mxu1  ;;  %3901 = vmatprep.subr.bf16.mxu1 %v5897_v19 }
 0x391   :  { %v7528_v11 = vadd.f32 %v2907_v63, %v7410_v38  ;;  %v3411_v15 = vpack.c.bf16 %v1781_v28, %v1781_v28 }
 0x392   :  { %v5434_v41 = vpop.f32.mrf.mxu1 }
 0x394   :  { %v2912_v25 = vpop.f32.mrf.mxu1  ;;  %5552 = vmatmul.mubr.msk.bf16.gmra.mxu1 %vm1832_vm1, %v7320_v26 }
 0x395   :  { %v7533_v51 = vadd.f32 %v2912_v25, %v7415_v13  ;;  %5555 = vmatprep.mubr.msk.bf16.mxu1 %vm5971_vm0, %v5970_v57 }
 0x396   :  { %v5437_v44 = vpop.f32.mrf.mxu1 }
 0x398   :  { %v2915_v46 = vpop.f32.mrf.mxu1 }
 0x399   :  { %v7540_v2 = vadd.f32 %v2915_v46, %v7422_v43 }
 0x39a   :  { %v5438_v38 = vpop.f32.mrf.mxu1 }
 0x39b   :  { %v5898_v38 = vld [vmem:[%s7966_s5 + $0x58] ss:$20 sps:$4 sm:$0xff]  }
 0x39c   :  { %v2920_v8 = vpop.f32.mrf.mxu1  ;;  %5556 = vmatmul.mubr.msk.bf16.gmra.mxu1 %vm1832_vm1, %v7336_v48 }
 0x39d   :  { %v7545_v26 = vadd.f32 %v2920_v8, %v7427_v7  ;;  %5559 = vmatprep.mubr.msk.bf16.mxu1 %vm5971_vm0, %v5970_v57 }
 0x39e   :  { %v5441_v13 = vpop.f32.mrf.mxu1 }
 0x3a0   :  { %v2923_v23 = vpop.f32.mrf.mxu1 }
 0x3a2   :  { %v5442_v22 = vpop.f32.mrf.mxu1 }
 0x3a3   :  { %v5901_v22 = vld [vmem:[%s7966_s5 + $0x30] ss:$20 sps:$4 sm:$0xff]  }
 0x3a4   :  { %v3006_v49 = vpop.f32.mrf.mxu1  ;;  %5560 = vmatmul.mubr.msk.bf16.gmra.mxu1 %vm1832_vm1, %v3411_v15 }
 0x3a5   :  { %v7551_v43 = vadd.f32 %v3006_v49, %v7433_v18  ;;  %5567 = vmatprep.mubr.msk.bf16.mxu1 %vm5971_vm0, %v5970_v57  ;;  %v5903_v49 = vld [vmem:[%s7966_s5 + $0x34] ss:$20 sps:$4 sm:$0xff]  }
 0x3a6   :  { %v5449_v48 = vpop.f32.mrf.mxu1 }
 0x3a8   :  { %v3009_v1 = vpop.f32.mrf.mxu1 }
 0x3a9   :  { %v7556_v7 = vadd.f32 %v3009_v1, %v7438_v30 }
 0x3aa   :  { %v5450_v10 = vpop.f32.mrf.mxu1 }
 0x3ac   :  { %v3014_v45 = vpop.f32.mrf.mxu1  ;;  %5568 = vmatmul.mubr.msk.bf16.vlgmr.msra.gmra.mxu1 %vm1832_vm1, %v7359_v53 }
 0x3ad   :  { %v7561_v34 = vadd.f32 %v3014_v45, %v7446_v40  ;;  %5571 = vmatprep.mubr.msk.bf16.mxu1 %vm5971_vm0, %v5970_v57  ;;  %3902 = vmatpush1.bf16.msra.mxu1 %v5895_v4 }
 0x3ae   :  { %v5453_v18 = vpop.f32.mrf.mxu1 }
 0x3b0   :  { %v3017_v54 = vpop.f32.mrf.mxu1 }
 0x3b1   :  { %v7566_v35 = vadd.f32 %v3017_v54, %v7455_v36 }
 0x3b2   :  { %v5454_v61 = vpop.f32.mrf.mxu1 }
 0x3b4   :  { %v3022_v5 = vpop.f32.mrf.mxu1  ;;  %5572 = vmatmul.mubr.msk.bf16.gmra.mxu1 %vm1832_vm1, %v7369_v17 }
 0x3b5   :  { %v7571_v30 = vadd.f32 %v3022_v5, %v7461_v14  ;;  %5575 = vmatprep.mubr.msk.bf16.mxu1 %vm5971_vm0, %v5970_v57 }
 0x3b6   :  { %v5457_v53 = vpop.f32.mrf.mxu1 }
 0x3b7   :  { %v5906_v53 = vld [vmem:[%s7966_s5 + $0xc] ss:$20 sps:$4 sm:$0xff]  }
 0x3b8   :  { %v3025_v40 = vpop.f32.mrf.mxu1 }
 0x3b9   :  { %v7576_v50 = vadd.f32 %v3025_v40, %v7466_v24  ;;  %v1644_v24 = vadd.f32 %v7201_v55, %v7405_v42 }
 0x3ba   :  { %v5458_v6 = vpop.f32.mrf.mxu1 }
 0x3bc   :  { %v3030_v9 = vpop.f32.mrf.mxu1  ;;  %5576 = vmatmul.mubr.msk.bf16.gmra.mxu1 %vm1832_vm1, %v7390_v3 }
 0x3bd   :  { %v7581_v36 = vadd.f32 %v3030_v9, %v7471_v27  ;;  %5579 = vmatprep.mubr.msk.bf16.mxu1 %vm5971_vm0, %v5970_v57  ;;  %v1790_v27 = vmax.f32 %v1644_v24, 0.0 }
 0x3be   :  { %v5461_v17 = vpop.f32.mrf.mxu1 }
 0x3bf   :  { %v3529_v32 = vpack.c.bf16 %v1790_v27, %v1790_v27 }
 0x3c0   :  { %v3033_v14 = vpop.f32.mrf.mxu1 }
 0x3c1   :  { %v7586_v59 = vadd.f32 %v3033_v14, %v7476_v47 }
 0x3c2   :  { %v5462_v56 = vpop.f32.mrf.mxu1 }
 0x3c4   :  { %v3038_v33 = vpop.f32.mrf.mxu1  ;;  %5580 = vmatmul.mubr.msk.bf16.gmra.mxu1 %vm1832_vm1, %v7407_v12 }
 0x3c5   :  { %v7593_v3 = vadd.f32 %v3038_v33, %v7489_v37  ;;  %5583 = vmatprep.mubr.msk.bf16.mxu1 %vm5971_vm0, %v5970_v57 }
 0x3c6   :  { %v5465_v58 = vpop.f32.mrf.mxu1 }
 0x3c8   :  { %v3041_v39 = vpop.f32.mrf.mxu1 }
 0x3ca   :  { %v5466_v47 = vpop.f32.mrf.mxu1 }
 0x3cc   :  { %v3124_v60 = vpop.f32.mrf.mxu1  ;;  %5584 = vmatmul.mubr.msk.bf16.gmra.mxu1 %vm1832_vm1, %v3529_v32 }
 0x3cd   :  { %v7599_v55 = vadd.f32 %v3124_v60, %v7496_v29  ;;  %3925 = vmatprep.mubr.bf16.mxu1 %v5969_v0 }
 0x3ce   :  { %v5473_v42 = vpop.f32.mrf.mxu1 }
 0x3d0   :  { %v3127_v12 = vpop.f32.mrf.mxu1 }
 0x3d1   :  { %v7603_v37 = vadd.f32 %v3127_v12, %v7501_v20 }
 0x3d2   :  { %v5474_v31 = vpop.f32.mrf.mxu1 }
 0x3d4   :  { %v3132_v63 = vpop.f32.mrf.mxu1 }
 0x3d5   :  { %v7612_v29 = vadd.f32 %v3132_v63, %v7509_v21  ;;  %v5900_v21 = vld [vmem:[%s7966_s5 + $0x5c] ss:$20 sps:$4 sm:$0xff]  }
 0x3d6   :  { %v5477_v41 = vpop.f32.mrf.mxu1  ;;  %3903 = vmatprep.subr.bf16.mxu1 %v5900_v21 }
 0x3d7   :  { %3904 = vmatpush1.bf16.msra.mxu1 %v5898_v38 }
 0x3d8   :  { %v3135_v25 = vpop.f32.mrf.mxu1  ;;  %3905 = vmatprep.subr.bf16.mxu1 %v5903_v49 }
 0x3d9   :  { %v7615_v20 = vadd.f32 %v3135_v25, %v7518_v16 }
 0x3da   :  { %v5478_v44 = vpop.f32.mrf.mxu1 }
 0x3db   :  { %3906 = vmatpush1.bf16.msra.mxu1 %v5901_v22 }
 0x3dc   :  { %v3140_v52 = vpop.f32.mrf.mxu1  ;;  %3907 = vmatprep.subr.bf16.mxu1 %v5906_v53 }
 0x3dd   :  { %v7618_v46 = vadd.f32 %v3140_v52, %v7523_v62 }
 0x3de   :  { %v5481_v28 = vpop.f32.mrf.mxu1 }
 0x3e0   :  { %v3143_v8 = vpop.f32.mrf.mxu1 }
 0x3e1   :  { %v7627_v16 = vadd.f32 %v3143_v8, %v7528_v11 }
 0x3e2   :  { %v5482_v13 = vpop.f32.mrf.mxu1 }
 0x3e4   :  { %v3148_v15 = vpop.f32.mrf.mxu1 }
 0x3e5   :  { %v7630_v62 = vadd.f32 %v3148_v15, %v7533_v51 }
 0x3e6   :  { %v5485_v23 = vpop.f32.mrf.mxu1 }
 0x3e8   :  { %v3151_v48 = vpop.f32.mrf.mxu1 }
 0x3e9   :  { %v7639_v1 = vadd.f32 %v3151_v48, %v7540_v2  ;;  %v5904_v2 = vld [vmem:[%s7966_s5 + $0x8] ss:$20 sps:$4 sm:$0xff]  }
 0x3ea   :  { %v5486_v11 = vpop.f32.mrf.mxu1  ;;  %3908 = vmatpush1.bf16.msra.mxu1 %v5904_v2 }
 0x3ec   :  { %v3156_v10 = vpop.f32.mrf.mxu1 }
 0x3ed   :  { %v3170_v51 = vadd.f32 %v3156_v10, %v7545_v26 }
 0x3ee   :  { %v5489_v45 = vpop.f32.mrf.mxu1 }
 0x3f0   :  { %v3159_v18 = vpop.f32.mrf.mxu1 }
 0x3f2   :  { %v5490_v54 = vpop.f32.mrf.mxu1 }
 0x3f4   :  { %v3242_v61 = vpop.f32.mrf.mxu1 }
 0x3f5   :  { %v7643_v5 = vadd.f32 %v3242_v61, %v7551_v43 }
 0x3f6   :  { %v5497_v40 = vpop.f32.mrf.mxu1 }
 0x3f8   :  { %v3245_v6 = vpop.f32.mrf.mxu1 }
 0x3f9   :  { %v7652_v26 = vadd.f32 %v3245_v6, %v7556_v7 }
 0x3fa   :  { %v5498_v9 = vpop.f32.mrf.mxu1 }
 0x3fc   :  { %v3250_v17 = vpop.f32.mrf.mxu1 }
 0x3fd   :  { %v7655_v43 = vadd.f32 %v3250_v17, %v7561_v34 }
 0x3fe   :  { %v5501_v14 = vpop.f32.mrf.mxu1 }
 0x400   :  { %v3253_v24 = vpop.f32.mrf.mxu1 }
 0x401   :  { %v7658_v56 = vadd.f32 %v3253_v24, %v7566_v35 }
 0x402   :  { %v5502_v33 = vpop.f32.mrf.mxu1 }
 0x404   :  { %v3258_v27 = vpop.f32.mrf.mxu1 }
 0x405   :  { %v7661_v58 = vadd.f32 %v3258_v27, %v7571_v30 }
 0x406   :  { %v5505_v39 = vpop.f32.mrf.mxu1 }
 0x408   :  { %v3261_v32 = vpop.f32.mrf.mxu1 }
 0x409   :  { %v7664_v7 = vadd.f32 %v3261_v32, %v7576_v50 }
 0x40a   :  { %v5506_v47 = vpop.f32.mrf.mxu1 }
 0x40c   :  { %v3266_v60 = vpop.f32.mrf.mxu1 }
 0x40d   :  { %v7667_v34 = vadd.f32 %v3266_v60, %v7581_v36 }
 0x40e   :  { %v5509_v42 = vpop.f32.mrf.mxu1 }
 0x410   :  { %v3269_v12 = vpop.f32.mrf.mxu1 }
 0x411   :  { %v7670_v35 = vadd.f32 %v3269_v12, %v7586_v59 }
 0x412   :  { %v5510_v31 = vpop.f32.mrf.mxu1 }
 0x414   :  { %v3274_v4 = vpop.f32.mrf.mxu1 }
 0x415   :  { %v7673_v30 = vadd.f32 %v3274_v4, %v7593_v3 }
 0x416   :  { %v5513_v19 = vpop.f32.mrf.mxu1 }
 0x418   :  { %v3277_v63 = vpop.f32.mrf.mxu1 }
 0x41a   :  { %v5514_v41 = vpop.f32.mrf.mxu1 }
 0x41c   :  { %v3360_v50 = vpop.f32.mrf.mxu1 }
 0x41d   :  { %v3398_v25 = vadd.f32 %v3360_v50, %v7599_v55 }
 0x41e   :  { %v5521_v44 = vpop.f32.mrf.mxu1 }
 0x41f   :  { %v7705_v44 = vld [vmem:[%s7967_s4] ss:$0 sm:$0xff] }
 0x420   :  { %v3363_v52 = vpop.f32.mrf.mxu1 }
 0x421   :  { %v3399_v36 = vadd.f32 %v3363_v52, %v7603_v37 }
 0x422   :  { %v5522_v38 = vpop.f32.mrf.mxu1 }
 0x424   :  { %v3368_v21 = vpop.f32.mrf.mxu1 }
 0x425   :  { %v3400_v59 = vadd.f32 %v3368_v21, %v7612_v29 }
 0x426   :  { %v5525_v28 = vpop.f32.mrf.mxu1 }
 0x428   :  { %v3371_v8 = vpop.f32.mrf.mxu1 }
 0x429   :  { %v7679_v13 = vadd.f32 %v3371_v8, %v7615_v20 }
 0x42a   :  { %v5526_v3 = vpop.f32.mrf.mxu1 }
 0x42c   :  { %v3376_v15 = vpop.f32.mrf.mxu1 }
 0x42d   :  { %v7682_v23 = vadd.f32 %v3376_v15, %v7618_v46 }
 0x42e   :  { %v5529_v22 = vpop.f32.mrf.mxu1 }
 0x430   :  { %v3379_v55 = vpop.f32.mrf.mxu1 }
 0x431   :  { %v7685_v49 = vadd.f32 %v3379_v55, %v7627_v16 }
 0x432   :  { %v5530_v37 = vpop.f32.mrf.mxu1 }
 0x434   :  { %v3384_v48 = vpop.f32.mrf.mxu1 }
 0x435   :  { %v7688_v11 = vadd.f32 %v3384_v48, %v7630_v62 }
 0x436   :  { %v5533_v29 = vpop.f32.mrf.mxu1 }
 0x438   :  { %v3387_v10 = vpop.f32.mrf.mxu1 }
 0x439   :  { %v7691_v20 = vadd.f32 %v3387_v10, %v7639_v1 }
 0x43a   :  { %v5534_v45 = vpop.f32.mrf.mxu1 }
 0x43c   :  { %v3392_v18 = vpop.f32.mrf.mxu1 }
 0x43d   :  { %v7693_v54 = vadd.f32 %v3392_v18, %v3170_v51  ;;  %v5907_v18 = vld [vmem:[%s7966_s5 + $0x88] ss:$20 sps:$4 sm:$0xff]  }
 0x43e   :  { %v5537_v46 = vpop.f32.mrf.mxu1 }
 0x440   :  { %v3395_v61 = vpop.f32.mrf.mxu1 }
 0x442   :  { %v5538_v53 = vpop.f32.mrf.mxu1 }
 0x444   :  { %v3478_v40 = vpop.f32.mrf.mxu1 }
 0x445   :  { %v3516_v19 = vadd.f32 %v3478_v40, %v7643_v5  ;;  %v5908_v40 = vld [vmem:[%s7966_s5 + $0x60] ss:$20 sps:$4 sm:$0xff]  }
 0x446   :  { %v5545_v16 = vpop.f32.mrf.mxu1 }
 0x448   :  { %v3481_v2 = vpop.f32.mrf.mxu1 }
 0x449   :  { %v3517_v38 = vadd.f32 %v3481_v2, %v7652_v26 }
 0x44a   :  { %v5546_v6 = vpop.f32.mrf.mxu1 }
 0x44c   :  { %v3486_v9 = vpop.f32.mrf.mxu1 }
 0x44d   :  { %v3518_v22 = vadd.f32 %v3486_v9, %v7655_v43 }
 0x44e   :  { %v5549_v17 = vpop.f32.mrf.mxu1 }
 0x450   :  { %v3489_v62 = vpop.f32.mrf.mxu1 }
 0x451   :  { %v3519_v45 = vadd.f32 %v3489_v62, %v7658_v56 }
 0x452   :  { %v5550_v14 = vpop.f32.mrf.mxu1 }
 0x454   :  { %v3494_v24 = vpop.f32.mrf.mxu1 }
 0x455   :  { %v3520_v56 = vadd.f32 %v3494_v24, %v7661_v58 }
 0x456   :  { %v5553_v33 = vpop.f32.mrf.mxu1 }
 0x458   :  { %v3497_v27 = vpop.f32.mrf.mxu1 }
 0x459   :  { %v3521_v62 = vadd.f32 %v3497_v27, %v7664_v7 }
 0x45a   :  { %v5554_v1 = vpop.f32.mrf.mxu1 }
 0x45c   :  { %v7695_v39 = vpop.f32.mrf.mxu1 }
 0x45d   :  { %v3522_v7 = vadd.f32 %v7695_v39, %v7667_v34 }
 0x45e   :  { %v5557_v32 = vpop.f32.mrf.mxu1 }
 0x460   :  { %v7697_v51 = vpop.f32.mrf.mxu1 }
 0x462   :  { %v5558_v47 = vpop.f32.mrf.mxu1 }
 0x463   :  { %v5910_v47 = vld [vmem:[%s7966_s5 + $0x10] ss:$20 sps:$4 sm:$0xff]  }
 0x464   :  { %v7699_v60 = vpop.f32.mrf.mxu1 }
 0x466   :  { %v5561_v42 = vpop.f32.mrf.mxu1 }
 0x468   :  { %v3513_v12 = vpop.f32.mrf.mxu1 }
 0x46a   :  { %v5562_v31 = vpop.f32.mrf.mxu1 }
 0x46c   :  { %v3596_v4 = vpop.f32.mrf.mxu1 }
 0x46d   :  { %v3634_v63 = vadd.f32 %v3596_v4, %v3398_v25 }
 0x46e   :  { %v5569_v41 = vpop.f32.mrf.mxu1 }
 0x46f   :  { %v3643_v50 = vadd.f32 %v3634_v63, %v3516_v19  ;;  %v3523_v63 = vadd.f32 %v7697_v51, %v7670_v35  ;;  %v3524_v35 = vadd.f32 %v7699_v60, %v7673_v30 }
 0x470   :  { %v3599_v52 = vpop.f32.mrf.mxu1 }
 0x471   :  { %v3635_v21 = vadd.f32 %v3599_v52, %v3399_v36  ;;  %v3659_v8 = vadd.f32 %v7705_v44, %v3643_v50 }
 0x472   :  { %v5570_v28 = vpop.f32.mrf.mxu1 }
 0x473   :  { %v3644_v3 = vadd.f32 %v3635_v21, %v3517_v38  ;;  %v3668_v37 = vmax.f32 %v3659_v8, 0.0 }
 0x474   :  { %v3604_v15 = vpop.f32.mrf.mxu1 }
 0x475   :  { %v3660_v5 = vadd.f32 %v7705_v44, %v3644_v3  ;;  %v3636_v25 = vadd.f32 %v3604_v15, %v3400_v59 }
 0x476   :  { %v5573_v55 = vpop.f32.mrf.mxu1 }
 0x477   :  { %v3669_v48 = vmax.f32 %v3660_v5, 0.0  ;;  %v3645_v29 = vadd.f32 %v3636_v25, %v3518_v22  ;;  %v5914_v25 = vld [vmem:[%s7968_s7 + $0x40] ss:$16 sps:$4 sm:$0xff]  }
 0x478   :  { %v3607_v10 = vpop.f32.mrf.mxu1 }
 0x479   :  { %v7712_v26 = vpack.c.bf16 %v3669_v48, %v3668_v37  ;;  %v3637_v36 = vadd.f32 %v3607_v10, %v7679_v13  ;;  %v3661_v46 = vadd.f32 %v7705_v44, %v3645_v29  ;;  %v5917_v10 = vld [vmem:[%s7968_s7 + $0x20] ss:$16 sps:$4 sm:$0xff]  }
 0x47a   :  { %v5574_v43 = vpop.f32.mrf.mxu1 }
 0x47b   :  { %v3646_v59 = vadd.f32 %v3637_v36, %v3519_v45  ;;  %4971 = vmatmul.mubr.msk.bf16.vlgmr.msra.gmra.mxu0 %vm3810_vm2, %v7712_v26  ;;  %4976 = vmatmul.mubr.msk.bf16.vlgmr.msra.gmra.mxu1 %vm3810_vm2, %v7712_v26  ;;  %v3670_v2 = vmax.f32 %v3661_v46, 0.0  ;;  %v5919_v45 = vld [vmem:[%s7968_s7 + $0x24] ss:$16 sps:$4 sm:$0xff]  }
 0x47c   :  { %v3612_v61 = vpop.f32.mrf.mxu1  ;;  %3866 = vmatprep.mubr.bf16.mxu0 %v5969_v0  ;;  %3931 = vmatprep.mubr.bf16.mxu1 %v5969_v0 }
 0x47d   :  { %v3662_v13 = vadd.f32 %v7705_v44, %v3646_v59  ;;  %v3638_v53 = vadd.f32 %v3612_v61, %v7682_v23  ;;  %5588 = vmatpush3.bf16.msra.mxu0 %v5907_v18  ;;  %v5909_v23 = vld [vmem:[%s7966_s5 + $0x38] ss:$20 sps:$4 sm:$0xff]   ;;  %v5920_v61 = vld [vmem:[%s7968_s7] ss:$16 sps:$4 sm:$0xff]  }
 0x47e   :  { %v5577_v16 = vpop.f32.mrf.mxu1  ;;  %5589 = vmatprep.subr.bf16.mxu0 %v5970_v57 }
 0x47f   :  { %v3671_v6 = vmax.f32 %v3662_v13, 0.0  ;;  %v3647_v9 = vadd.f32 %v3638_v53, %v3520_v56  ;;  %v5922_v56 = vld [vmem:[%s7968_s7 + $0x4] ss:$16 sps:$4 sm:$0xff]  }
 0x480   :  { %v3615_v17 = vpop.f32.mrf.mxu1 }
 0x481   :  { %v3678_v14 = vpack.c.bf16 %v3671_v6, %v3670_v2  ;;  %v3639_v58 = vadd.f32 %v3615_v17, %v7685_v49  ;;  %5590 = vmatpush3.bf16.msra.mxu0 %v5908_v40  ;;  %v3663_v33 = vadd.f32 %v7705_v44, %v3647_v9 }
 0x482   :  { %v5578_v24 = vpop.f32.mrf.mxu1  ;;  %5591 = vmatprep.subr.bf16.mxu0 %v5970_v57 }
 0x483   :  { %v3648_v1 = vadd.f32 %v3639_v58, %v3521_v62  ;;  %4972 = vmatmul.mubr.msk.bf16.gmra.mxu0 %vm3810_vm2, %v3678_v14  ;;  %4977 = vmatmul.mubr.msk.bf16.gmra.mxu1 %vm3810_vm2, %v3678_v14  ;;  %v3672_v12 = vmax.f32 %v3663_v33, 0.0 }
 0x484   :  { %v3620_v32 = vpop.f32.mrf.mxu1  ;;  %3874 = vmatprep.mubr.bf16.mxu0 %v5969_v0  ;;  %3937 = vmatprep.mubr.bf16.mxu1 %v5969_v0 }
 0x485   :  { %v3664_v49 = vadd.f32 %v7705_v44, %v3648_v1  ;;  %v3640_v27 = vadd.f32 %v3620_v32, %v7688_v11  ;;  %5592 = vmatpush3.bf16.msra.mxu0 %v5909_v23 }
 0x486   :  { %v5581_v42 = vpop.f32.mrf.mxu1  ;;  %5593 = vmatprep.subr.bf16.mxu0 %v5970_v57 }
 0x487   :  { %v3673_v31 = vmax.f32 %v3664_v49, 0.0  ;;  %v3649_v4 = vadd.f32 %v3640_v27, %v3522_v7  ;;  %v5925_v7 = vld [vmem:[%s7968_s7 + $0x6c] ss:$16 sps:$4 sm:$0xff]  }
 0x488   :  { %v3623_v19 = vpop.f32.mrf.mxu1 }
 0x489   :  { %v3679_v34 = vpack.c.bf16 %v3673_v31, %v3672_v12  ;;  %v3641_v39 = vadd.f32 %v3623_v19, %v7691_v20  ;;  %5594 = vmatpush3.bf16.msra.mxu0 %v5910_v47  ;;  %v3665_v41 = vadd.f32 %v7705_v44, %v3649_v4 }
 0x48a   :  { %v5582_v11 = vpop.f32.mrf.mxu1 }
 0x48b   :  { %v3650_v50 = vadd.f32 %v3641_v39, %v3523_v63  ;;  %4973 = vmatmul.mubr.msk.bf16.gmra.mxu0 %vm3810_vm2, %v3679_v34  ;;  %4978 = vmatmul.mubr.msk.bf16.gmra.mxu1 %vm3810_vm2, %v3679_v34  ;;  %v3674_v21 = vmax.f32 %v3665_v41, 0.0 }
 0x48c   :  { %v3628_v52 = vpop.f32.mrf.mxu1  ;;  %3880 = vmatprep.mubr.bf16.mxu0 %v5969_v0  ;;  %3945 = vmatprep.mubr.bf16.mxu1 %v5969_v0 }
 0x48d   :  { %v3666_v51 = vadd.f32 %v7705_v44, %v3650_v50  ;;  %v3642_v20 = vadd.f32 %v3628_v52, %v7693_v54  ;;  %v5911_v54 = vld [vmem:[%s7968_s7 + $0x60] ss:$16 sps:$4 sm:$0xff]  }
 0x48e   :  { %v5585_v38 = vpop.f32.mrf.mxu1 }
 0x48f   :  { %v3675_v28 = vmax.f32 %v3666_v51, 0.0  ;;  %v3651_v8 = vadd.f32 %v3642_v20, %v3524_v35  ;;  %v5935_v20 = vld [vmem:[%s7969_s9 + $0x78] sm:$0xff]  }
 0x490   :  { %v3631_v3 = vpop.f32.mrf.mxu1  ;;  %5159 = vmatprep.subr.bf16.mxu0 %v5935_v20  ;;  %v5959_v20 = vld [vmem:[%s7969_s9 + $0xd8] sm:$0xff]  }
 0x491   :  { %v3680_v15 = vpack.c.bf16 %v3675_v28, %v3674_v21  ;;  %v3667_v22 = vadd.f32 %v7705_v44, %v3651_v8  ;;  %v5913_v44 = vld [vmem:[%s7968_s7 + $0x64] ss:$16 sps:$4 sm:$0xff]   ;;  %v5936_v21 = vld [vmem:[%s7969_s9 + $0x38] sm:$0xff]  }
 0x492   :  { %v5586_v5 = vpop.f32.mrf.mxu1  ;;  %4187 = vmatprep.subr.bf16.mxu1 %v5913_v44  ;;  %v5937_v28 = vld [vmem:[%s7969_s9 + $0x70] sm:$0xff]  }
 0x493   :  { %4974 = vmatmul.mubr.msk.bf16.gmra.mxu0 %vm3810_vm2, %v3680_v15  ;;  %4979 = vmatmul.mubr.msk.bf16.gmra.mxu1 %vm3810_vm2, %v3680_v15  ;;  %v3676_v30 = vmax.f32 %v3667_v22, 0.0  ;;  %v5938_v3 = vld [vmem:[%s7969_s9 + $0x30] sm:$0xff]  }
 0x494   :  { %3886 = vmatprep.mubr.bf16.mxu0 %v5969_v0  ;;  %3953 = vmatprep.mubr.bf16.mxu1 %v5969_v0 }
 0x495   :  { %v3681_v60 = vpack.c.bf16 %v3676_v30, %v3676_v30  ;;  %4188 = vmatpush1.bf16.msra.mxu1 %v5911_v54  ;;  %v5940_v30 = vld [vmem:[%s7969_s9 + $0x28] sm:$0xff]  }
 0x49b   :  { %4975 = vmatmul.mubr.msk.bf16.gmra.mxu0 %vm3810_vm2, %v3681_v60  ;;  %4980 = vmatmul.mubr.msk.bf16.gmra.mxu1 %vm3810_vm2, %v3681_v60 }
 0x49c   :  { %5595 = vmatprep.mubr.msk.bf16.mxu0 %vm5971_vm0, %v5970_v57  ;;  %4211 = vmatprep.mubr.bf16.mxu1 %v5969_v0 }
 0x4a3   :  { %5596 = vmatmul.mubr.msk.bf16.vlgmr.msra.gmra.mxu0 %vm3810_vm2, %v7712_v26 }
 0x4a4   :  { %5599 = vmatprep.mubr.msk.bf16.mxu0 %vm5971_vm0, %v5970_v57  ;;  %5160 = vmatpush3.bf16.msra.mxu0 %v5936_v21  ;;  %v5961_v21 = vld [vmem:[%s7969_s9 + $0xd0] sm:$0xff]  }
 0x4a5   :  { %5161 = vmatprep.subr.bf16.mxu0 %v5937_v28  ;;  %v5962_v28 = vld [vmem:[%s7969_s9 + $0x90] sm:$0xff]  }
 0x4a8   :  { %5162 = vmatpush3.bf16.msra.mxu0 %v5938_v3  ;;  %v5964_v3 = vld [vmem:[%s7969_s9 + $0x88] sm:$0xff]  }
 0x4ab   :  { %5600 = vmatmul.mubr.msk.bf16.gmra.mxu0 %vm3810_vm2, %v3678_v14 }
 0x4ac   :  { %5603 = vmatprep.mubr.msk.bf16.mxu0 %vm5971_vm0, %v5970_v57 }
 0x4b3   :  { %5604 = vmatmul.mubr.msk.bf16.gmra.mxu0 %vm3810_vm2, %v3679_v34 }
 0x4b4   :  { %5607 = vmatprep.mubr.msk.bf16.mxu0 %vm5971_vm0, %v5970_v57 }
 0x4bb   :  { %5608 = vmatmul.mubr.msk.bf16.gmra.mxu0 %vm3810_vm2, %v3680_v15  ;;  %v5939_v15 = vld [vmem:[%s7969_s9 + $0x68] sm:$0xff]  }
 0x4bc   :  { %5611 = vmatprep.mubr.msk.bf16.mxu0 %vm5971_vm0, %v5970_v57  ;;  %v5916_v57 = vld [vmem:[%s7968_s7 + $0x44] ss:$16 sps:$4 sm:$0xff]   ;;  %5163 = vmatprep.subr.bf16.mxu0 %v5939_v15 }
 0x4bd   :  { %4189 = vmatprep.subr.bf16.mxu1 %v5916_v57  ;;  %5164 = vmatpush3.bf16.msra.mxu0 %v5940_v30  ;;  %v5944_v57 = vld [vmem:[%s7969_s9 + $0x58] sm:$0xff]   ;;  %v5965_v15 = vld [vmem:[%s7969_s9 + $0xc0] sm:$0xff]  }
 0x4be   :  { %4190 = vmatpush1.bf16.msra.mxu1 %v5914_v25  ;;  %v5942_v25 = vld [vmem:[%s7969_s9 + $0x20] sm:$0xff]  }
 0x4bf   :  { %4191 = vmatprep.subr.bf16.mxu1 %v5919_v45 }
 0x4c2   :  { %4192 = vmatpush1.bf16.msra.mxu1 %v5917_v10  ;;  %v5948_v10 = vld [vmem:[%s7969_s9 + $0x50] sm:$0xff]  }
 0x4c3   :  { %5612 = vmatmul.mubr.msk.bf16.gmra.mxu0 %vm3810_vm2, %v3681_v60  ;;  %4193 = vmatprep.subr.bf16.mxu1 %v5922_v56  ;;  %v5941_v60 = vld [vmem:[%s7969_s9 + $0x60] sm:$0xff]  }
 0x4c4   :  { %5165 = vmatprep.subr.bf16.mxu0 %v5941_v60 }
 0x4c5   :  { %5166 = vmatpush3.bf16.msra.mxu0 %v5942_v25 }
 0x4c6   :  { %4194 = vmatpush1.bf16.msra.mxu1 %v5920_v61  ;;  %5167 = vmatprep.subr.bf16.mxu0 %v5944_v57 }
 0x4c7   :  { %4228 = vmatprep.subr.bf16.mxu1 %v5925_v7 }
 0x53b   :  { %v7799_v55 = vpop.f32.mrf.mxu0  ;;  %v3927_v37 = vpop.f32.mrf.mxu1 }
 0x53d   :  { %v3862_v48 = vpop.f32.mrf.mxu0  ;;  %v3928_v29 = vpop.f32.mrf.mxu1 }
 0x53e   :  { %v5946_v29 = vld [vmem:[%s7969_s9 + $0x18] sm:$0xff]  }
 0x53f   :  { %v3863_v26 = vpop.f32.mrf.mxu0  ;;  %v3929_v36 = vpop.f32.mrf.mxu1  ;;  %5168 = vmatpush3.bf16.msra.mxu0 %v5946_v29 }
 0x540   :  { %4025 = vrot.lane.b32.xlu0 %v3863_v26, %s5972_s12  ;;  %v5950_v26 = vld [vmem:[%s7969_s9 + $0x10] sm:$0xff]   ;;  %5169 = vmatprep.subr.bf16.mxu0 %v5948_v10 }
 0x541   :  { %v3865_v18 = vpop.f32.mrf.mxu0  ;;  %v3930_v43 = vpop.f32.mrf.mxu1 }
 0x543   :  { %v3868_v46 = vpop.f32.mrf.mxu0  ;;  %v3933_v59 = vpop.f32.mrf.mxu1  ;;  %5170 = vmatpush3.bf16.msra.mxu0 %v5950_v26 }
 0x545   :  { %v7814_v13 = vpop.f32.mrf.mxu0  ;;  %v3934_v53 = vpop.f32.mrf.mxu1 }
 0x547   :  { %v3871_v40 = vpop.f32.mrf.mxu0  ;;  %v3935_v16 = vpop.f32.mrf.mxu1 }
 0x549   :  { %v3872_v2 = vpop.f32.mrf.mxu0  ;;  %v3936_v6 = vpop.f32.mrf.mxu1 }
 0x54a   :  { %4031 = vrot.lane.b32.xlu0 %v3872_v2, %s5972_s12 }
 0x54b   :  { %v3876_v9 = vpop.f32.mrf.mxu0  ;;  %v7817_v17 = vpop.f32.mrf.mxu1 }
 0x54d   :  { %v3877_v62 = vpop.f32.mrf.mxu0  ;;  %v3941_v14 = vpop.f32.mrf.mxu1 }
 0x54f   :  { %v3878_v58 = vpop.f32.mrf.mxu0  ;;  %v3942_v23 = vpop.f32.mrf.mxu1 }
 0x550   :  { %4037 = vrot.lane.b32.xlu1 %v3942_v23, %s5972_s12 }
 0x551   :  { %v3879_v24 = vpop.f32.mrf.mxu0  ;;  %v3944_v33 = vpop.f32.mrf.mxu1 }
 0x553   :  { %v3882_v1 = vpop.f32.mrf.mxu0  ;;  %v3947_v32 = vpop.f32.mrf.mxu1 }
 0x554   :  { %v4986_v1 = vld [vmem:[%s7970_s6] ss:$0 sm:$0xff] }
 0x555   :  { %v3883_v49 = vpop.f32.mrf.mxu0  ;;  %v7823_v27 = vpop.f32.mrf.mxu1 }
 0x557   :  { %v3884_v47 = vpop.f32.mrf.mxu0  ;;  %v3950_v42 = vpop.f32.mrf.mxu1 }
 0x558   :  { %v5931_v47 = vld [vmem:[%s7968_s7 + $0x2c] ss:$16 sps:$4 sm:$0xff]   ;;  %v5929_v42 = vld [vmem:[%s7968_s7 + $0x28] ss:$16 sps:$4 sm:$0xff]  }
 0x559   :  { %v3885_v12 = vpop.f32.mrf.mxu0  ;;  %v3951_v31 = vpop.f32.mrf.mxu1 }
 0x55a   :  { %4043 = vrot.lane.b32.xlu1 %v3951_v31, %s5972_s12  ;;  %v5934_v12 = vld [vmem:[%s7968_s7 + $0xc] ss:$16 sps:$4 sm:$0xff]  }
 0x55b   :  { %v3888_v4 = vpop.f32.mrf.mxu0  ;;  %v3955_v19 = vpop.f32.mrf.mxu1  ;;  %v5943_v31 = vld [vmem:[%s7969_s9 + $0xf8] sm:$0xff]  }
 0x55c   :  { %v5945_v4 = vld [vmem:[%s7969_s9 + $0xb8] sm:$0xff]   ;;  %v5947_v19 = vld [vmem:[%s7969_s9 + $0xf0] sm:$0xff]  }
 0x55d   :  { %v3889_v63 = vpop.f32.mrf.mxu0  ;;  %v3956_v34 = vpop.f32.mrf.mxu1 }
 0x55e   :  { %v5949_v63 = vld [vmem:[%s7969_s9 + $0xb0] sm:$0xff]   ;;  %v5951_v34 = vld [vmem:[%s7969_s9 + $0xe8] sm:$0xff]  }
 0x55f   :  { %v3890_v39 = vpop.f32.mrf.mxu0  ;;  %v3957_v11 = vpop.f32.mrf.mxu1 }
 0x560   :  { %v5952_v39 = vld [vmem:[%s7969_s9 + $0x48] sm:$0xff]  }
 0x561   :  { %v3891_v41 = vpop.f32.mrf.mxu0  ;;  %v3958_v50 = vpop.f32.mrf.mxu1  ;;  %v5953_v11 = vld [vmem:[%s7969_s9 + $0xa8] sm:$0xff]   ;;  %5171 = vmatprep.subr.bf16.mxu0 %v5952_v39 }
 0x562   :  { %v5954_v41 = vld [vmem:[%s7969_s9 + $0x8] sm:$0xff]   ;;  %v5955_v50 = vld [vmem:[%s7969_s9 + $0xe0] sm:$0xff]  }
 0x563   :  { %v3994_v52 = vpop.f32.mrf.mxu0  ;;  %5172 = vmatpush3.bf16.msra.mxu0 %v5954_v41 }
 0x564   :  { %v5956_v52 = vld [vmem:[%s7969_s9 + $0x40] sm:$0xff]  }
 0x565   :  { %v5597_v35 = vpop.f32.mrf.mxu0  ;;  %5173 = vmatprep.subr.bf16.mxu0 %v5956_v52 }
 0x566   :  { %v5957_v35 = vld [vmem:[%s7969_s9 + $0xa0] sm:$0xff]  }
 0x567   :  { %v3996_v51 = vpop.f32.mrf.mxu0 }
 0x568   :  { %v5958_v51 = vld [vmem:[%s7969_s9] sm:$0xff]  }
 0x569   :  { %v5598_v38 = vpop.f32.mrf.mxu0  ;;  %5174 = vmatpush3.bf16.msra.mxu0 %v5958_v51 }
 0x56a   :  { %v5960_v38 = vld [vmem:[%s7969_s9 + $0x98] sm:$0xff]  }
 0x56b   :  { %v4000_v8 = vpop.f32.mrf.mxu0 }
 0x56c   :  { %v5963_v8 = vld [vmem:[%s7969_s9 + $0xc8] sm:$0xff]  }
 0x56d   :  { %v5601_v22 = vpop.f32.mrf.mxu0 }
 0x56e   :  { %v5966_v22 = vld [vmem:[%s7969_s9 + $0x80] sm:$0xff]  }
 0x56f   :  { %v4002_v5 = vpop.f32.mrf.mxu0 }
 0x570   :  { %v4076_v5 = vlaneseq }
 0x571   :  { %v5602_v54 = vpop.f32.mrf.mxu0 }
 0x572   :  { %v4077_v30 = vshrl.u32 %v4076_v5, 7  ;;  %v4074_v54 = vld [vmem:[%s7971_s8] sm:$0xf] }
 0x573   :  { %v4006_v44 = vpop.f32.mrf.mxu0 }
 0x574   :  { %v4078_v60 = vsub.s32 0, %v4077_v30  ;;  %v4082_v44 = vsub.s32 1, %v4077_v30 }
 0x575   :  { %v5605_v37 = vpop.f32.mrf.mxu0 }
 0x576   :  { %v4079_v25 = vrot.slane %v4074_v54, %v4078_v60  ;;  %v4083_v57 = vrot.slane %v4074_v54, %v4082_v44 }
 0x577   :  { %v4008_v48 = vpop.f32.mrf.mxu0 }
 0x579   :  { %v5606_v45 = vpop.f32.mrf.mxu0 }
 0x57b   :  { %v4012_v36 = vpop.f32.mrf.mxu0 }
 0x57d   :  { %v5609_v18 = vpop.f32.mrf.mxu0 }
 0x57f   :  { %v4014_v43 = vpop.f32.mrf.mxu0 }
 0x581   :  { %v5610_v46 = vpop.f32.mrf.mxu0 }
 0x583   :  { %v4018_v59 = vpop.f32.mrf.mxu0 }
 0x585   :  { %v5613_v61 = vpop.f32.mrf.mxu0 }
 0x586   :  { %v4090_v61 = vsub.s32 3, %v4077_v30 }
 0x587   :  { %v4021_v56 = vpop.f32.mrf.mxu0 }
 0x589   :  { %v5614_v53 = vpop.f32.mrf.mxu0 }
 0x58a   :  { %v4091_v53 = vrot.slane %v4074_v54, %v4090_v61 }
 0x5b2   :  { %v4026_v40 = vpop.permute.xlu0 %4025 }
 0x5b3   :  { %v4028_v16 = vadd.f32 %v4026_v40, %v7799_v55  ;;  %v5923_v55 = vld [vmem:[%s7968_s7 + $0x68] ss:$16 sps:$4 sm:$0xff]  }
 0x5b5   :  { %v4029_v6 = vadd.f32 %v4028_v16, %v7814_v13 }
 0x5bc   :  { %v4032_v2 = vpop.permute.xlu0 %4031 }
 0x5bd   :  { %v4034_v9 = vadd.f32 %v4032_v2, %v4029_v6 }
 0x5bf   :  { %v4035_v14 = vadd.f32 %v4034_v9, %v7817_v17  ;;  %v5928_v17 = vld [vmem:[%s7968_s7 + $0x4c] ss:$16 sps:$4 sm:$0xff]  }
 0x5c2   :  { %v4038_v62 = vpop.permute.xlu1 %4037 }
 0x5c3   :  { %v4040_v58 = vadd.f32 %v4038_v62, %v4035_v14 }
 0x5c5   :  { %v4041_v23 = vadd.f32 %v4040_v58, %v7823_v27  ;;  %v5926_v27 = vld [vmem:[%s7968_s7 + $0x48] ss:$16 sps:$4 sm:$0xff]  }
 0x5cc   :  { %v4044_v24 = vpop.permute.xlu1 %4043 }
 0x5cd   :  { %v4046_v33 = vadd.f32 %v4044_v24, %v4041_v23 }
 0x5cf   :  { %v4047_v32 = vadd.f32 %v4046_v33, %v4018_v59  ;;  %v4086_v59 = vsub.s32 2, %v4077_v30 }
 0x5d1   :  { %v4055_v7 = vadd.f32 %v4986_v1, %v4047_v32  ;;  %v4087_v56 = vrot.slane %v4074_v54, %v4086_v59 }
 0x5d3   :  { %v4056_v49 = vmax.f32 %v4055_v7, 0.0 }
 0x5d5   :  { %v4057_v13 = vpack.c.bf16 %v4056_v49, %v4056_v49 }
 0x5d7   :  { %5003 = vmatmul.mubr.msk.bf16.vlgmr.msra.gmra.mxu1 %vm3810_vm2, %v4057_v13 }
 0x5d8   :  { %4229 = vmatpush1.bf16.msra.mxu1 %v5923_v55  ;;  %4252 = vmatprep.mubr.bf16.mxu1 %v5969_v0  ;;  %v5932_v0 = vld [vmem:[%s7968_s7 + $0x8] ss:$16 sps:$4 sm:$0xff]   ;;  %v5005_v55 = vld [vmem:[%s7972_s10] ss:$0 sm:$0xff] }
 0x5d9   :  { %4230 = vmatprep.subr.bf16.mxu1 %v5928_v17 }
 0x5dc   :  { %4231 = vmatpush1.bf16.msra.mxu1 %v5926_v27 }
 0x5dd   :  { %4232 = vmatprep.subr.bf16.mxu1 %v5931_v47 }
 0x5e0   :  { %4233 = vmatpush1.bf16.msra.mxu1 %v5929_v42 }
 0x5e1   :  { %4234 = vmatprep.subr.bf16.mxu1 %v5934_v12 }
 0x5e4   :  { %4235 = vmatpush1.bf16.msra.mxu1 %v5932_v0 }
 0x5e5   :  { %5181 = vmatprep.subr.bf16.mxu1 %v5943_v31 }
 0x5e7   :  { %5004 = vmatmul.mubr.msk.bf16.vlgmr.msra.gmra.mxu1 %vm3810_vm2, %v4057_v13 }
 0x5e8   :  { %5182 = vmatpush3.bf16.msra.mxu1 %v5945_v4 }
 0x5e9   :  { %5183 = vmatprep.subr.bf16.mxu1 %v5947_v19 }
 0x5ec   :  { %5184 = vmatpush3.bf16.msra.mxu1 %v5949_v63 }
 0x5ed   :  { %5185 = vmatprep.subr.bf16.mxu1 %v5951_v34 }
 0x5f0   :  { %5186 = vmatpush3.bf16.msra.mxu1 %v5953_v11 }
 0x5f1   :  { %5187 = vmatprep.subr.bf16.mxu1 %v5955_v50 }
 0x5f4   :  { %5188 = vmatpush3.bf16.msra.mxu1 %v5957_v35 }
 0x5f5   :  { %5189 = vmatprep.subr.bf16.mxu1 %v5959_v20 }
 0x5f8   :  { %5190 = vmatpush3.bf16.msra.mxu1 %v5960_v38 }
 0x5f9   :  { %5191 = vmatprep.subr.bf16.mxu1 %v5961_v21 }
 0x5fc   :  { %5192 = vmatpush3.bf16.msra.mxu1 %v5962_v28 }
 0x5fd   :  { %5193 = vmatprep.subr.bf16.mxu1 %v5963_v8 }
 0x600   :  { %5194 = vmatpush3.bf16.msra.mxu1 %v5964_v3 }
 0x601   :  { %5195 = vmatprep.subr.bf16.mxu1 %v5965_v15 }
 0x604   :  { %5196 = vmatpush3.bf16.msra.mxu1 %v5966_v22 }
 0x697   :  { %v4213_v37 = vpop.f32.mrf.mxu1 }
 0x698   :  { %v4214_v48 = vadd.f32 %v4213_v37, %v4079_v25 }
 0x699   :  { %v4215_v29 = vpop.f32.mrf.mxu1 }
 0x69a   :  { %v4216_v10 = vadd.f32 %v4215_v29, %v4083_v57  ;;  %v4261_v45 = vmax.f32 %v4214_v48, 0.0 }
 0x69b   :  { %v4217_v26 = vpop.f32.mrf.mxu1 }
 0x69c   :  { %v4262_v36 = vmax.f32 %v4216_v10, 0.0  ;;  %v4265_v46 = vpack.c.bf16 %v4261_v45, %v4261_v45 }
 0x69d   :  { %v4218_v18 = vpop.f32.mrf.mxu1 }
 0x69e   :  { %v4266_v43 = vpack.c.bf16 %v4262_v36, %v4262_v36 }
 0x6a0   :  { %4564 = vmatprep.mubr.bf16.mxu0 %v4266_v43 }
 0x6a1   :  { %4565 = vmatmul.mubr.bf16.vlgmr.msra.gmra.mxu0 %v4265_v46 }
 0x6a7   :  { %v4254_v40 = vpop.f32.mrf.mxu1 }
 0x6a8   :  { %v4255_v16 = vadd.f32 %v4254_v40, %v4087_v56 }
 0x6a9   :  { %v4256_v2 = vpop.f32.mrf.mxu1 }
 0x6aa   :  { %v4257_v6 = vadd.f32 %v4256_v2, %v4091_v53  ;;  %v4263_v9 = vmax.f32 %v4255_v16, 0.0 }
 0x6ab   :  { %v4258_v62 = vpop.f32.mrf.mxu1 }
 0x6ac   :  { %v4264_v14 = vmax.f32 %v4257_v6, 0.0  ;;  %v4267_v24 = vpack.c.bf16 %v4263_v9, %v4263_v9 }
 0x6ad   :  { %v4259_v58 = vpop.f32.mrf.mxu1 }
 0x6ae   :  { %v4268_v23 = vpack.c.bf16 %v4264_v14, %v4264_v14 }
 0x6b0   :  { %4604 = vmatprep.mubr.bf16.mxu1 %v4268_v23 }
 0x6b1   :  { %4605 = vmatmul.mubr.bf16.vlgmr.msra.gmra.mxu1 %v4267_v24 }
 0x761   :  { %v5175_v33 = vpop.f32.mrf.mxu0 }
 0x763   :  { %v5176_v1 = vpop.f32.mrf.mxu0 }
 0x764   :  { %v5177_v49 = vadd.f32 %v5176_v1, %v5175_v33 }
 0x765   :  { %v5178_v32 = vpop.f32.mrf.mxu0 }
 0x766   :  { %v4567_v27 = vadd.f32 %v5177_v49, %v5005_v55 }
 0x767   :  { %v5179_v7 = vpop.f32.mrf.mxu0 }
 0x771   :  { %v5197_v13 = vpop.f32.mrf.mxu1 }
 0x773   :  { %v5198_v17 = vpop.f32.mrf.mxu1 }
 0x774   :  { %v5199_v47 = vadd.f32 %v5198_v17, %v5197_v13 }
 0x775   :  { %v5200_v42 = vpop.f32.mrf.mxu1 }
 0x776   :  { %v4607_v12 = vadd.f32 %v5199_v47, %v4567_v27 }
 0x777   :  { %v5201_v0 = vpop.f32.mrf.mxu1 }
 0x778   :  { %4612 = vst [vmem:[%s7973_s11] sm:$0xff] %v4607_v12 }

</bundles_post_ra>
